<compile_context>
chip_gen: v6e
topology: v6e:2x2x1
jax: 0.10.0
libtpu: 0.0.40
codegen_flags: <defaults>
</compile_context>

<pallas_src>
import functools
import math

import jax
import jax.numpy as jnp
from jax import lax
from jax.experimental import pallas as pl
from jax.experimental.pallas import tpu as pltpu


def _largest_divisor(n, cap):
    """Largest divisor of n that is <= cap."""
    best = 1
    for k in range(1, min(n, cap) + 1):
        if n % k == 0:
            best = k
    return best


# ----------------------------------------------------------------------------
# TimeBlock kernel: out = relu(conv1(x) + sigmoid(conv2(x)) + conv3(x))
# (optionally followed by a fused @Theta projection).  Weights of the three convs
# are concatenated along the output-channel axis -> (3, Cin, 3*Cout).
# ----------------------------------------------------------------------------
def _timeblock_kernel(has_post, x_ref, w_ref, b_ref, *rest):
    if has_post:
        p_ref, o_ref, xpad_ref = rest
    else:
        o_ref, xpad_ref = rest

    TBN, T, Cin = x_ref.shape

    # Build the time-padded tile in VMEM (avoids an HBM-level jnp.pad of the activation).
    xpad_ref[:, 1:T + 1, :] = x_ref[...]
    zrow = jnp.zeros((TBN, 1, Cin), jnp.float32)
    xpad_ref[:, 0:1, :] = zrow
    xpad_ref[:, T + 1:T + 2, :] = zrow

    xp = xpad_ref[...].astype(jnp.bfloat16)            # (TBN, T+2, Cin)
    rows = TBN * T
    x_prev = xp[:, 0:T, :].reshape(rows, Cin)          # x[t-1]
    x_curr = xp[:, 1:T + 1, :].reshape(rows, Cin)      # x[t]
    x_next = xp[:, 2:T + 2, :].reshape(rows, Cin)      # x[t+1]

    acc = jnp.dot(x_prev, w_ref[0], preferred_element_type=jnp.float32)
    acc += jnp.dot(x_curr, w_ref[1], preferred_element_type=jnp.float32)
    acc += jnp.dot(x_next, w_ref[2], preferred_element_type=jnp.float32)
    acc += b_ref[...]                                  # (1, 3*Cout), added once

    Cout = acc.shape[1] // 3
    gated = jnp.maximum(
        acc[:, 0:Cout] + jax.nn.sigmoid(acc[:, Cout:2 * Cout]) + acc[:, 2 * Cout:],
        0.0)                                           # (rows, Cout)

    if has_post:
        proj = jnp.dot(gated.astype(jnp.bfloat16), p_ref[...],
                       preferred_element_type=jnp.float32)   # (rows, S)
        o_ref[...] = proj.reshape(TBN, T, proj.shape[1])
    else:
        o_ref[...] = gated.reshape(TBN, T, Cout)


def time_block(x, w, b, post_w=None, tile_bn=128):
    """x: (B, N, T, Cin); w: (3, Cin, 3*Cout); b: (1, 3*Cout) -> (B, N, T, Cout|S)."""
    B, N, T, Cin = x.shape
    Cout3 = w.shape[2]
    Cout = Cout3 // 3
    BN = B * N
    xf = x.reshape(BN, T, Cin)
    tbn = min(tile_bn, BN)
    out_c = Cout if post_w is None else post_w.shape[1]

    in_specs = [
        pl.BlockSpec((tbn, T, Cin), lambda i: (i, 0, 0)),
        pl.BlockSpec((3, Cin, Cout3), lambda i: (0, 0, 0)),
        pl.BlockSpec((1, Cout3), lambda i: (0, 0)),
    ]
    args = [xf, w.astype(jnp.bfloat16), b]
    if post_w is not None:
        in_specs.append(pl.BlockSpec((Cout, out_c), lambda i: (0, 0)))
        args.append(post_w.astype(jnp.bfloat16))

    out = pl.pallas_call(
        functools.partial(_timeblock_kernel, post_w is not None),
        grid=(pl.cdiv(BN, tbn),),
        out_shape=jax.ShapeDtypeStruct((BN, T, out_c), jnp.float32),
        in_specs=in_specs,
        out_specs=pl.BlockSpec((tbn, T, out_c), lambda i: (i, 0, 0)),
        scratch_shapes=[pltpu.VMEM((tbn, T + 2, Cin), jnp.float32)],
        compiler_params=pltpu.CompilerParams(
            dimension_semantics=("parallel",)),
    )(*args)
    return out.reshape(B, N, T, out_c)


# ----------------------------------------------------------------------------
# Graph convolution + ReLU: t2[b,i,t,s] = relu( sum_j A_hat[i,j] * m[b,j,t,s] )
# Operates on (N, T*S) blocks per batch element -- no transposes needed.
# ----------------------------------------------------------------------------
def _graphconv_relu_kernel(a_ref, m_ref, o_ref):
    lfs = jnp.dot(a_ref[...], m_ref[0].astype(jnp.bfloat16),
                  preferred_element_type=jnp.float32)
    o_ref[0] = jnp.maximum(lfs, 0.0)


def graph_conv_relu(m, a_hat_bf16):
    B, N, T, S = m.shape
    m2 = m.reshape(B, N, T * S)
    out = pl.pallas_call(
        _graphconv_relu_kernel,
        grid=(B,),
        out_shape=jax.ShapeDtypeStruct((B, N, T * S), jnp.float32),
        in_specs=[
            pl.BlockSpec((N, N), lambda b: (0, 0)),
            pl.BlockSpec((1, N, T * S), lambda b: (b, 0, 0)),
        ],
        out_specs=pl.BlockSpec((1, N, T * S), lambda b: (b, 0, 0)),
        compiler_params=pltpu.CompilerParams(
            dimension_semantics=("parallel",)),
    )(a_hat_bf16, m2)
    return out.reshape(B, N, T, S)


# ----------------------------------------------------------------------------
# Generic M-tiled matmul kernel (optional bias / ReLU), bf16 MXU + f32 accumulate.
# K and N are small in this model (<= 512), so only M is tiled.
# ----------------------------------------------------------------------------
def _matmul_kernel(relu, x_ref, w_ref, b_ref, o_ref):
    acc = jnp.dot(x_ref[...].astype(jnp.bfloat16), w_ref[...],
                  preferred_element_type=jnp.float32) + b_ref[...]
    if relu:
        acc = jnp.maximum(acc, 0.0)
    o_ref[...] = acc


def pallas_matmul(x, w, b=None, relu=False, tile_m=512):
    M, K = x.shape
    N = w.shape[1]
    if b is None:
        b = jnp.zeros((1, N), jnp.float32)
    else:
        b = b.reshape(1, N).astype(jnp.float32)
    tm = min(tile_m, M)
    return pl.pallas_call(
        functools.partial(_matmul_kernel, relu),
        grid=(pl.cdiv(M, tm),),
        out_shape=jax.ShapeDtypeStruct((M, N), jnp.float32),
        in_specs=[
            pl.BlockSpec((tm, K), lambda i: (i, 0)),
            pl.BlockSpec((K, N), lambda i: (0, 0)),
            pl.BlockSpec((1, N), lambda i: (0, 0)),
        ],
        out_specs=pl.BlockSpec((tm, N), lambda i: (i, 0)),
        compiler_params=pltpu.CompilerParams(
            dimension_semantics=("parallel",)),
    )(x, w.astype(jnp.bfloat16), b)


# ----------------------------------------------------------------------------
# BatchNorm2d(num_nodes), training-mode batch stats (biased variance), tiled over
# nodes and computed directly from the (B, N, T, C) layout (no transposes).
# ----------------------------------------------------------------------------
def _bn_kernel(eps, inv_count, x_ref, g_ref, b_ref, o_ref):
    x = x_ref[...]                                       # (B, tn, T, C), f32
    s = jnp.sum(x, axis=3, keepdims=True)
    s = jnp.sum(s, axis=2, keepdims=True)
    s = jnp.sum(s, axis=0, keepdims=True)                # (1, tn, 1, 1)
    mean = s * inv_count
    xc = x - mean
    v = jnp.sum(xc * xc, axis=3, keepdims=True)
    v = jnp.sum(v, axis=2, keepdims=True)
    v = jnp.sum(v, axis=0, keepdims=True)
    var = v * inv_count                                  # biased variance
    o_ref[...] = xc * lax.rsqrt(var + eps) * g_ref[...] + b_ref[...]


def pallas_batchnorm_nodes(x, gamma, beta, eps=1e-5, tile_n=8):
    B, N, T, C = x.shape
    tn = _largest_divisor(N, tile_n)
    inv_count = 1.0 / float(B * T * C)
    return pl.pallas_call(
        functools.partial(_bn_kernel, eps, inv_count),
        grid=(N // tn,),
        out_shape=jax.ShapeDtypeStruct((B, N, T, C), jnp.float32),
        in_specs=[
            pl.BlockSpec((B, tn, T, C), lambda i: (0, i, 0, 0)),
            pl.BlockSpec((1, tn, 1, 1), lambda i: (0, i, 0, 0)),
            pl.BlockSpec((1, tn, 1, 1), lambda i: (0, i, 0, 0)),
        ],
        out_specs=pl.BlockSpec((B, tn, T, C), lambda i: (0, i, 0, 0)),
        compiler_params=pltpu.CompilerParams(
            dimension_semantics=("parallel",)),
    )(x, gamma.reshape(1, N, 1, 1), beta.reshape(1, N, 1, 1))


# ----------------------------------------------------------------------------
# LSTM layer: the input projection (x @ W_ih + b) is precomputed for the whole
# sequence; the recurrent kernel processes CHUNK steps per grid iteration with an
# unrolled loop.  Gate order (i, f, g, o), zero initial state, like nn.LSTM.
# ----------------------------------------------------------------------------
def _lstm_kernel(chunk, H, xw_ref, whh_ref, o_ref, h_sc, c_sc):
    @pl.when(pl.program_id(0) == 0)
    def _():
        h_sc[...] = jnp.zeros_like(h_sc)
        c_sc[...] = jnp.zeros_like(c_sc)

    whh = whh_ref[...]                                   # (H, 4H) bf16

    def step(k, carry):
        h, c = carry
        gates = xw_ref[k] + jnp.dot(h.astype(jnp.bfloat16), whh,
                                    preferred_element_type=jnp.float32)
        i_g = jax.nn.sigmoid(gates[:, 0:H])
        f_g = jax.nn.sigmoid(gates[:, H:2 * H])
        g_g = jnp.tanh(gates[:, 2 * H:3 * H])
        o_g = jax.nn.sigmoid(gates[:, 3 * H:4 * H])
        c = f_g * c + i_g * g_g
        h = o_g * jnp.tanh(c)
        o_ref[k] = h
        return (h, c)

    h, c = lax.fori_loop(0, chunk, step, (h_sc[...], c_sc[...]), unroll=True)
    h_sc[...] = h
    c_sc[...] = c


def pallas_lstm_layer(x, wih_t, whh_t, bias, chunk_cap=16):
    """x: (S, Bl, In) sequence-major -> (S, Bl, H)."""
    S, Bl, In = x.shape
    H = whh_t.shape[0]
    # Hoisted input projection (no sequential dependence): one big tiled matmul.
    xw = pallas_matmul(x.reshape(S * Bl, In), wih_t, bias)     # (S*Bl, 4H), f32
    xw = xw.reshape(S, Bl, 4 * H)
    chunk = _largest_divisor(S, chunk_cap)
    return pl.pallas_call(
        functools.partial(_lstm_kernel, chunk, H),
        grid=(S // chunk,),
        out_shape=jax.ShapeDtypeStruct((S, Bl, H), jnp.float32),
        in_specs=[
            pl.BlockSpec((chunk, Bl, 4 * H), lambda s: (s, 0, 0)),
            pl.BlockSpec((H, 4 * H), lambda s: (0, 0)),
        ],
        out_specs=pl.BlockSpec((chunk, Bl, H), lambda s: (s, 0, 0)),
        scratch_shapes=[pltpu.VMEM((Bl, H), jnp.float32),
                        pltpu.VMEM((Bl, H), jnp.float32)],
        compiler_params=pltpu.CompilerParams(
            dimension_semantics=("arbitrary",)),
    )(xw, whh_t.astype(jnp.bfloat16))


# ----------------------------------------------------------------------------
# Model composition
# ----------------------------------------------------------------------------
def stgcn_block(x, A_bf, p):
    # relu((A_hat ⊗ t) @ Theta) == relu(A_hat ⊗ (t @ Theta)) -> fuse Theta into the
    # first TimeBlock output, then a single transpose-free graph-conv+ReLU kernel.
    m = time_block(x, p["tb1_w"], p["tb1_b"], post_w=p["theta"])   # (B, N, T, S)
    t2 = graph_conv_relu(m, A_bf)                                  # (B, N, T, S)
    t3 = time_block(t2, p["tb2_w"], p["tb2_b"])                    # (B, N, T, 64)
    return pallas_batchnorm_nodes(t3, p["bn_gamma"], p["bn_beta"])


def stgcn_forward(A_hat, X, params):
    A_bf = A_hat.astype(jnp.bfloat16)
    out = X
    for name in ("block1", "block2", "block3"):
        out = stgcn_block(out, A_bf, params[name])
    out4 = time_block(out, params["lt_w"], params["lt_b"])         # (B, N, T, 64)
    B, N, T, C = out4.shape

    # LSTMBlock: torch runs nn.LSTM(batch_first=True) on (T, B*N, C), i.e.
    # batch = T and sequence = B*N.  Our kernel is sequence-major: (B*N, T, C).
    h = out4.reshape(B * N, T, C)
    for (wih_t, whh_t, bias) in params["lstm"]:
        h = pallas_lstm_layer(h, wih_t, whh_t, bias)

    flat = h.reshape(B * N, T * C)                                 # == torch reshape
    out6 = pallas_matmul(flat, params["fully_w"], params["fully_b"])
    return out6.reshape(B, N, -1)


# ----------------------------------------------------------------------------
# Deterministic synthetic parameter initialization
# ----------------------------------------------------------------------------
def init_timeblock(key, cin, cout):
    ks = jax.random.split(key, 6)
    s = 1.0 / math.sqrt(cin * 3)
    u = lambda k, shape: jax.random.uniform(k, shape, jnp.float32, -s, s)
    # conv1 / conv2 / conv3 weights concatenated along the output-channel axis.
    w = jnp.concatenate([u(ks[0], (3, cin, cout)),
                         u(ks[1], (3, cin, cout)),
                         u(ks[2], (3, cin, cout))], axis=-1)       # (3, cin, 3*cout)
    b = jnp.concatenate([u(ks[3], (1, cout)),
                         u(ks[4], (1, cout)),
                         u(ks[5], (1, cout))], axis=-1)            # (1, 3*cout)
    return w, b


def init_block(key, cin, spatial, cout, num_nodes):
    ks = jax.random.split(key, 3)
    sv = 1.0 / math.sqrt(spatial)
    w1, b1 = init_timeblock(ks[0], cin, cout)
    w2, b2 = init_timeblock(ks[2], spatial, cout)
    return dict(
        tb1_w=w1, tb1_b=b1,
        theta=jax.random.uniform(ks[1], (cout, spatial), jnp.float32, -sv, sv),
        tb2_w=w2, tb2_b=b2,
        bn_gamma=jnp.ones((num_nodes,), jnp.float32),
        bn_beta=jnp.zeros((num_nodes,), jnp.float32),
    )


def init_stgcn(key, num_nodes, num_features, t_in, t_out):
    ks = jax.random.split(key, 8)
    p = {
        "block1": init_block(ks[0], num_features, 16, 64, num_nodes),
        "block2": init_block(ks[1], 64, 16, 64, num_nodes),
        "block3": init_block(ks[2], 64, 16, 64, num_nodes),
    }
    p["lt_w"], p["lt_b"] = init_timeblock(ks[3], 64, 64)
    H = 64
    s = 1.0 / math.sqrt(H)
    lstm = []
    for l in range(3):
        kk = jax.random.split(ks[4 + l], 4)
        wih_t = jax.random.uniform(kk[0], (64, 4 * H), jnp.float32, -s, s)
        whh_t = jax.random.uniform(kk[1], (H, 4 * H), jnp.float32, -s, s)
        bias = (jax.random.uniform(kk[2], (1, 4 * H), jnp.float32, -s, s)
                + jax.random.uniform(kk[3], (1, 4 * H), jnp.float32, -s, s))
        lstm.append((wih_t, whh_t, bias))
    p["lstm"] = lstm
    # TODO(synk): LSTMBlock.classifier Linear is dead code in the torch forward; omitted.
    sf = 1.0 / math.sqrt(t_in * 64)
    kf = jax.random.split(ks[7], 2)
    p["fully_w"] = jax.random.uniform(kf[0], (t_in * 64, t_out),
                                      jnp.float32, -sf, sf)
    p["fully_b"] = jax.random.uniform(kf[1], (t_out,), jnp.float32, -sf, sf)
    return p


if __name__ == "__main__":
    B, N, F, T_IN, T_OUT = 2, 4, 4, 8, 3
    key = jax.random.PRNGKey(0)
    k_x, k_a, k_p = jax.random.split(key, 3)

    X = jax.random.normal(k_x, (B, N, T_IN, F), jnp.float32)
    A = jax.random.uniform(k_a, (N, N), jnp.float32, 0.1, 1.0)
    A_hat = A / jnp.sum(A, axis=1, keepdims=True)       # row-normalized adjacency

    params = init_stgcn(k_p, N, F, T_IN, T_OUT)

    fwd = jax.jit(stgcn_forward)
    out = jax.block_until_ready(fwd(A_hat, X, params))
    assert out.shape == (B, N, T_OUT), out.shape
    assert bool(jnp.all(jnp.isfinite(out)))
    print("KERNEL_OK")
</pallas_src>

<mosaic_0001>
module attributes {stable_mosaic.version = 11 : i64} {
  func.func @_graphconv_relu_kernel(%arg0: i32, %arg1: memref<4x4xbf16, #tpu.memory_space<vmem>>, %arg2: memref<1x4x128xf32, #tpu.memory_space<vmem>>, %arg3: memref<1x4x128xf32, #tpu.memory_space<vmem>>) attributes {dimension_semantics = [#tpu.dimension_semantics<parallel>], iteration_bounds = array<i64: 2>, scalar_prefetch = 0 : i64, scratch_operands = 0 : i64, tpu.core_type = #tpu.core_type<tc>, window_params = [{pipeline_mode = #tpu.pipeline_mode<synchronous>, transform_indices = @transform_0, window_bounds = array<i64: 4, 4>}, {transform_indices = @transform_1, window_bounds = array<i64: 1, 4, 128>}, {transform_indices = @transform_2, window_bounds = array<i64: 1, 4, 128>}]} {
    %c0 = arith.constant 0 : index
    %c0_0 = arith.constant 0 : index
    %0 = vector.load %arg1[%c0, %c0_0] : memref<4x4xbf16, #tpu.memory_space<vmem>>, vector<4x4xbf16>
    %c0_1 = arith.constant 0 : index
    %c0_2 = arith.constant 0 : index
    %c0_3 = arith.constant 0 : index
    %1 = vector.load %arg2[%c0_1, %c0_2, %c0_3] : memref<1x4x128xf32, #tpu.memory_space<vmem>>, vector<1x4x128xf32>
    %2 = vector.shape_cast %1 : vector<1x4x128xf32> to vector<4x128xf32>
    %3 = arith.truncf %2 : vector<4x128xf32> to vector<4x128xbf16>
    %cst = arith.constant dense<0.000000e+00> : vector<4x128xf32>
    %4 = tpu.matmul %0, %3, %cst {dimension_numbers = #tpu.dot_dimension_numbers<[1], [0], [0], [1], [0, 0, 1, 1], [], []>} : vector<4x4xbf16>, vector<4x128xbf16>, vector<4x128xf32> -> vector<4x128xf32>
    %cst_4 = arith.constant 0.000000e+00 : f32
    %5 = vector.broadcast %cst_4 : f32 to vector<4x128xf32>
    %6 = arith.maximumf %4, %5 : vector<4x128xf32>
    %c0_5 = arith.constant 0 : index
    %c0_6 = arith.constant 0 : index
    %c0_7 = arith.constant 0 : index
    %7 = vector.load %arg3[%c0_5, %c0_6, %c0_7] : memref<1x4x128xf32, #tpu.memory_space<vmem>>, vector<1x4x128xf32>
    %8 = vector.shape_cast %7 : vector<1x4x128xf32> to vector<4x128xf32>
    %9 = vector.shape_cast %6 : vector<4x128xf32> to vector<1x4x128xf32>
    tpu.vector_store %arg3[%c0_5, %c0_6, %c0_7], %9 {strides = array<i32>} : memref<1x4x128xf32, #tpu.memory_space<vmem>>, vector<1x4x128xf32>,
    return
  }
  func.func @transform_0(%arg0: i32) -> (i32, i32) {
    %c0_i32 = arith.constant 0 : i32
    %c0_i32_0 = arith.constant 0 : i32
    %c0_i32_1 = arith.constant 0 : i32
    return %c0_i32, %c0_i32_0 : i32, i32
  }
  func.func @transform_1(%arg0: i32) -> (i32, i32, i32) {
    %c0_i32 = arith.constant 0 : i32
    %c0_i32_0 = arith.constant 0 : i32
    %c0_i32_1 = arith.constant 0 : i32
    return %arg0, %c0_i32, %c0_i32_0 : i32, i32, i32
  }
  func.func @transform_2(%arg0: i32) -> (i32, i32, i32) {
    %c0_i32 = arith.constant 0 : i32
    %c0_i32_0 = arith.constant 0 : i32
    %c0_i32_1 = arith.constant 0 : i32
    return %arg0, %c0_i32, %c0_i32_0 : i32, i32, i32
  }
}

module attributes {stable_mosaic.version = 11 : i64} {
  func.func @_timeblock_kernel(%arg0: i32, %arg1: memref<8x8x4xf32, #tpu.memory_space<vmem>>, %arg2: memref<3x4x192xbf16, #tpu.memory_space<vmem>>, %arg3: memref<1x192xf32, #tpu.memory_space<vmem>>, %arg4: memref<64x16xbf16, #tpu.memory_space<vmem>>, %arg5: memref<8x8x16xf32, #tpu.memory_space<vmem>>, %arg6: memref<8x10x4xf32, #tpu.memory_space<vmem>>) attributes {dimension_semantics = [#tpu.dimension_semantics<parallel>], iteration_bounds = array<i64: 1>, scalar_prefetch = 0 : i64, scratch_operands = 1 : i64, tpu.core_type = #tpu.core_type<tc>, window_params = [{transform_indices = @transform_0, window_bounds = array<i64: 8, 8, 4>}, {pipeline_mode = #tpu.pipeline_mode<synchronous>, transform_indices = @transform_1, window_bounds = array<i64: 3, 4, 192>}, {pipeline_mode = #tpu.pipeline_mode<synchronous>, transform_indices = @transform_2, window_bounds = array<i64: 1, 192>}, {pipeline_mode = #tpu.pipeline_mode<synchronous>, transform_indices = @transform_3, window_bounds = array<i64: 64, 16>}, {transform_indices = @transform_4, window_bounds = array<i64: 8, 8, 16>}]} {
    %c0 = arith.constant 0 : index
    %c0_0 = arith.constant 0 : index
    %c0_1 = arith.constant 0 : index
    %0 = vector.load %arg1[%c0, %c0_0, %c0_1] : memref<8x8x4xf32, #tpu.memory_space<vmem>>, vector<8x8x4xf32>
    %c0_2 = arith.constant 0 : index
    %c1 = arith.constant 1 : index
    %c0_3 = arith.constant 0 : index
    %1 = vector.load %arg6[%c0_2, %c1, %c0_3] : memref<8x10x4xf32, #tpu.memory_space<vmem>>, vector<8x8x4xf32>
    tpu.vector_store %arg6[%c0_2, %c1, %c0_3], %0 {strides = array<i32>} : memref<8x10x4xf32, #tpu.memory_space<vmem>>, vector<8x8x4xf32>,
    %cst = arith.constant 0.000000e+00 : f32
    %2 = vector.broadcast %cst : f32 to vector<8x1x4xf32>
    %c0_4 = arith.constant 0 : index
    %c0_5 = arith.constant 0 : index
    %c0_6 = arith.constant 0 : index
    %3 = vector.load %arg6[%c0_4, %c0_5, %c0_6] : memref<8x10x4xf32, #tpu.memory_space<vmem>>, vector<8x1x4xf32>
    tpu.vector_store %arg6[%c0_4, %c0_5, %c0_6], %2 {strides = array<i32>} : memref<8x10x4xf32, #tpu.memory_space<vmem>>, vector<8x1x4xf32>,
    %c0_7 = arith.constant 0 : index
    %c9 = arith.constant 9 : index
    %c0_8 = arith.constant 0 : index
    %4 = vector.load %arg6[%c0_7, %c9, %c0_8] : memref<8x10x4xf32, #tpu.memory_space<vmem>>, vector<8x1x4xf32>
    tpu.vector_store %arg6[%c0_7, %c9, %c0_8], %2 {strides = array<i32>} : memref<8x10x4xf32, #tpu.memory_space<vmem>>, vector<8x1x4xf32>,
    %c0_9 = arith.constant 0 : index
    %c0_10 = arith.constant 0 : index
    %c0_11 = arith.constant 0 : index
    %5 = vector.load %arg6[%c0_9, %c0_10, %c0_11] : memref<8x10x4xf32, #tpu.memory_space<vmem>>, vector<8x10x4xf32>
    %6 = arith.truncf %5 : vector<8x10x4xf32> to vector<8x10x4xbf16>
    %7 = vector.extract_strided_slice %6 {offsets = [0, 0, 0], sizes = [8, 8, 4], strides = [1, 1, 1]} : vector<8x10x4xbf16> to vector<8x8x4xbf16>
    %8 = vector.shape_cast %7 : vector<8x8x4xbf16> to vector<64x4xbf16>
    %9 = vector.extract_strided_slice %6 {offsets = [0, 1, 0], sizes = [8, 8, 4], strides = [1, 1, 1]} : vector<8x10x4xbf16> to vector<8x8x4xbf16>
    %10 = vector.shape_cast %9 : vector<8x8x4xbf16> to vector<64x4xbf16>
    %11 = vector.extract_strided_slice %6 {offsets = [0, 2, 0], sizes = [8, 8, 4], strides = [1, 1, 1]} : vector<8x10x4xbf16> to vector<8x8x4xbf16>
    %12 = vector.shape_cast %11 : vector<8x8x4xbf16> to vector<64x4xbf16>
    %c0_12 = arith.constant 0 : index
    %c0_13 = arith.constant 0 : index
    %c0_14 = arith.constant 0 : index
    %13 = vector.load %arg2[%c0_12, %c0_13, %c0_14] : memref<3x4x192xbf16, #tpu.memory_space<vmem>>, vector<1x4x192xbf16>
    %14 = vector.shape_cast %13 : vector<1x4x192xbf16> to vector<4x192xbf16>
    %cst_15 = arith.constant dense<0.000000e+00> : vector<64x192xf32>
    %15 = tpu.matmul %8, %14, %cst_15 {dimension_numbers = #tpu.dot_dimension_numbers<[1], [0], [0], [1], [0, 0, 1, 1], [], []>} : vector<64x4xbf16>, vector<4x192xbf16>, vector<64x192xf32> -> vector<64x192xf32>
    %c1_16 = arith.constant 1 : index
    %c0_17 = arith.constant 0 : index
    %c0_18 = arith.constant 0 : index
    %16 = vector.load %arg2[%c1_16, %c0_17, %c0_18] : memref<3x4x192xbf16, #tpu.memory_space<vmem>>, vector<1x4x192xbf16>
    %17 = vector.shape_cast %16 : vector<1x4x192xbf16> to vector<4x192xbf16>
    %cst_19 = arith.constant dense<0.000000e+00> : vector<64x192xf32>
    %18 = tpu.matmul %10, %17, %cst_19 {dimension_numbers = #tpu.dot_dimension_numbers<[1], [0], [0], [1], [0, 0, 1, 1], [], []>} : vector<64x4xbf16>, vector<4x192xbf16>, vector<64x192xf32> -> vector<64x192xf32>
    %19 = arith.addf %15, %18 : vector<64x192xf32>
    %c2 = arith.constant 2 : index
    %c0_20 = arith.constant 0 : index
    %c0_21 = arith.constant 0 : index
    %20 = vector.load %arg2[%c2, %c0_20, %c0_21] : memref<3x4x192xbf16, #tpu.memory_space<vmem>>, vector<1x4x192xbf16>
    %21 = vector.shape_cast %20 : vector<1x4x192xbf16> to vector<4x192xbf16>
    %cst_22 = arith.constant dense<0.000000e+00> : vector<64x192xf32>
    %22 = tpu.matmul %12, %21, %cst_22 {dimension_numbers = #tpu.dot_dimension_numbers<[1], [0], [0], [1], [0, 0, 1, 1], [], []>} : vector<64x4xbf16>, vector<4x192xbf16>, vector<64x192xf32> -> vector<64x192xf32>
    %23 = arith.addf %19, %22 : vector<64x192xf32>
    %c0_23 = arith.constant 0 : index
    %c0_24 = arith.constant 0 : index
    %24 = vector.load %arg3[%c0_23, %c0_24] : memref<1x192xf32, #tpu.memory_space<vmem>>, vector<1x192xf32>
    %25 = vector.broadcast %24 : vector<1x192xf32> to vector<64x192xf32>
    %26 = arith.addf %23, %25 : vector<64x192xf32>
    %27 = vector.extract_strided_slice %26 {offsets = [0, 0], sizes = [64, 64], strides = [1, 1]} : vector<64x192xf32> to vector<64x64xf32>
    %28 = vector.extract_strided_slice %26 {offsets = [0, 64], sizes = [64, 64], strides = [1, 1]} : vector<64x192xf32> to vector<64x64xf32>
    %29 = arith.negf %28 : vector<64x64xf32>
    %30 = math.exp %29 : vector<64x64xf32>
    %cst_25 = arith.constant 1.000000e+00 : f32
    %31 = vector.broadcast %cst_25 : f32 to vector<64x64xf32>
    %32 = arith.addf %31, %30 : vector<64x64xf32>
    %33 = arith.divf %31, %32 : vector<64x64xf32>
    %34 = arith.addf %27, %33 : vector<64x64xf32>
    %35 = vector.extract_strided_slice %26 {offsets = [0, 128], sizes = [64, 64], strides = [1, 1]} : vector<64x192xf32> to vector<64x64xf32>
    %36 = arith.addf %34, %35 : vector<64x64xf32>
    %cst_26 = arith.constant 0.000000e+00 : f32
    %37 = vector.broadcast %cst_26 : f32 to vector<64x64xf32>
    %38 = arith.maximumf %36, %37 : vector<64x64xf32>
    %39 = arith.truncf %38 : vector<64x64xf32> to vector<64x64xbf16>
    %c0_27 = arith.constant 0 : index
    %c0_28 = arith.constant 0 : index
    %40 = vector.load %arg4[%c0_27, %c0_28] : memref<64x16xbf16, #tpu.memory_space<vmem>>, vector<64x16xbf16>
    %cst_29 = arith.constant dense<0.000000e+00> : vector<64x16xf32>
    %41 = tpu.matmul %39, %40, %cst_29 {dimension_numbers = #tpu.dot_dimension_numbers<[1], [0], [0], [1], [0, 0, 1, 1], [], []>} : vector<64x64xbf16>, vector<64x16xbf16>, vector<64x16xf32> -> vector<64x16xf32>
    %42 = vector.shape_cast %41 : vector<64x16xf32> to vector<8x8x16xf32>
    %c0_30 = arith.constant 0 : index
    %c0_31 = arith.constant 0 : index
    %c0_32 = arith.constant 0 : index
    %43 = vector.load %arg5[%c0_30, %c0_31, %c0_32] : memref<8x8x16xf32, #tpu.memory_space<vmem>>, vector<8x8x16xf32>
    tpu.vector_store %arg5[%c0_30, %c0_31, %c0_32], %42 {strides = array<i32>} : memref<8x8x16xf32, #tpu.memory_space<vmem>>, vector<8x8x16xf32>,
    return
  }
  func.func @transform_0(%arg0: i32) -> (i32, i32, i32) {
    %c0_i32 = arith.constant 0 : i32
    %c0_i32_0 = arith.constant 0 : i32
    %c0_i32_1 = arith.constant 0 : i32
    return %arg0, %c0_i32, %c0_i32_0 : i32, i32, i32
  }
  func.func @transform_1(%arg0: i32) -> (i32, i32, i32) {
    %c0_i32 = arith.constant 0 : i32
    %c0_i32_0 = arith.constant 0 : i32
    %c0_i32_1 = arith.constant 0 : i32
    %c0_i32_2 = arith.constant 0 : i32
    return %c0_i32, %c0_i32_0, %c0_i32_1 : i32, i32, i32
  }
  func.func @transform_2(%arg0: i32) -> (i32, i32) {
    %c0_i32 = arith.constant 0 : i32
    %c0_i32_0 = arith.constant 0 : i32
    %c0_i32_1 = arith.constant 0 : i32
    return %c0_i32, %c0_i32_0 : i32, i32
  }
  func.func @transform_3(%arg0: i32) -> (i32, i32) {
    %c0_i32 = arith.constant 0 : i32
    %c0_i32_0 = arith.constant 0 : i32
    %c0_i32_1 = arith.constant 0 : i32
    return %c0_i32, %c0_i32_0 : i32, i32
  }
  func.func @transform_4(%arg0: i32) -> (i32, i32, i32) {
    %c0_i32 = arith.constant 0 : i32
    %c0_i32_0 = arith.constant 0 : i32
    %c0_i32_1 = arith.constant 0 : i32
    return %arg0, %c0_i32, %c0_i32_0 : i32, i32, i32
  }
}

module attributes {stable_mosaic.version = 11 : i64} {
  func.func @_timeblock_kernel(%arg0: i32, %arg1: memref<8x8x16xf32, #tpu.memory_space<vmem>>, %arg2: memref<3x16x192xbf16, #tpu.memory_space<vmem>>, %arg3: memref<1x192xf32, #tpu.memory_space<vmem>>, %arg4: memref<8x8x64xf32, #tpu.memory_space<vmem>>, %arg5: memref<8x10x16xf32, #tpu.memory_space<vmem>>) attributes {dimension_semantics = [#tpu.dimension_semantics<parallel>], iteration_bounds = array<i64: 1>, scalar_prefetch = 0 : i64, scratch_operands = 1 : i64, tpu.core_type = #tpu.core_type<tc>, window_params = [{transform_indices = @transform_0, window_bounds = array<i64: 8, 8, 16>}, {pipeline_mode = #tpu.pipeline_mode<synchronous>, transform_indices = @transform_1, window_bounds = array<i64: 3, 16, 192>}, {pipeline_mode = #tpu.pipeline_mode<synchronous>, transform_indices = @transform_2, window_bounds = array<i64: 1, 192>}, {transform_indices = @transform_3, window_bounds = array<i64: 8, 8, 64>}]} {
    %c0 = arith.constant 0 : index
    %c0_0 = arith.constant 0 : index
    %c0_1 = arith.constant 0 : index
    %0 = vector.load %arg1[%c0, %c0_0, %c0_1] : memref<8x8x16xf32, #tpu.memory_space<vmem>>, vector<8x8x16xf32>
    %c0_2 = arith.constant 0 : index
    %c1 = arith.constant 1 : index
    %c0_3 = arith.constant 0 : index
    %1 = vector.load %arg5[%c0_2, %c1, %c0_3] : memref<8x10x16xf32, #tpu.memory_space<vmem>>, vector<8x8x16xf32>
    tpu.vector_store %arg5[%c0_2, %c1, %c0_3], %0 {strides = array<i32>} : memref<8x10x16xf32, #tpu.memory_space<vmem>>, vector<8x8x16xf32>,
    %cst = arith.constant 0.000000e+00 : f32
    %2 = vector.broadcast %cst : f32 to vector<8x1x16xf32>
    %c0_4 = arith.constant 0 : index
    %c0_5 = arith.constant 0 : index
    %c0_6 = arith.constant 0 : index
    %3 = vector.load %arg5[%c0_4, %c0_5, %c0_6] : memref<8x10x16xf32, #tpu.memory_space<vmem>>, vector<8x1x16xf32>
    tpu.vector_store %arg5[%c0_4, %c0_5, %c0_6], %2 {strides = array<i32>} : memref<8x10x16xf32, #tpu.memory_space<vmem>>, vector<8x1x16xf32>,
    %c0_7 = arith.constant 0 : index
    %c9 = arith.constant 9 : index
    %c0_8 = arith.constant 0 : index
    %4 = vector.load %arg5[%c0_7, %c9, %c0_8] : memref<8x10x16xf32, #tpu.memory_space<vmem>>, vector<8x1x16xf32>
    tpu.vector_store %arg5[%c0_7, %c9, %c0_8], %2 {strides = array<i32>} : memref<8x10x16xf32, #tpu.memory_space<vmem>>, vector<8x1x16xf32>,
    %c0_9 = arith.constant 0 : index
    %c0_10 = arith.constant 0 : index
    %c0_11 = arith.constant 0 : index
    %5 = vector.load %arg5[%c0_9, %c0_10, %c0_11] : memref<8x10x16xf32, #tpu.memory_space<vmem>>, vector<8x10x16xf32>
    %6 = arith.truncf %5 : vector<8x10x16xf32> to vector<8x10x16xbf16>
    %7 = vector.extract_strided_slice %6 {offsets = [0, 0, 0], sizes = [8, 8, 16], strides = [1, 1, 1]} : vector<8x10x16xbf16> to vector<8x8x16xbf16>
    %8 = vector.shape_cast %7 : vector<8x8x16xbf16> to vector<64x16xbf16>
    %9 = vector.extract_strided_slice %6 {offsets = [0, 1, 0], sizes = [8, 8, 16], strides = [1, 1, 1]} : vector<8x10x16xbf16> to vector<8x8x16xbf16>
    %10 = vector.shape_cast %9 : vector<8x8x16xbf16> to vector<64x16xbf16>
    %11 = vector.extract_strided_slice %6 {offsets = [0, 2, 0], sizes = [8, 8, 16], strides = [1, 1, 1]} : vector<8x10x16xbf16> to vector<8x8x16xbf16>
    %12 = vector.shape_cast %11 : vector<8x8x16xbf16> to vector<64x16xbf16>
    %c0_12 = arith.constant 0 : index
    %c0_13 = arith.constant 0 : index
    %c0_14 = arith.constant 0 : index
    %13 = vector.load %arg2[%c0_12, %c0_13, %c0_14] : memref<3x16x192xbf16, #tpu.memory_space<vmem>>, vector<1x16x192xbf16>
    %14 = vector.shape_cast %13 : vector<1x16x192xbf16> to vector<16x192xbf16>
    %cst_15 = arith.constant dense<0.000000e+00> : vector<64x192xf32>
    %15 = tpu.matmul %8, %14, %cst_15 {dimension_numbers = #tpu.dot_dimension_numbers<[1], [0], [0], [1], [0, 0, 1, 1], [], []>} : vector<64x16xbf16>, vector<16x192xbf16>, vector<64x192xf32> -> vector<64x192xf32>
    %c1_16 = arith.constant 1 : index
    %c0_17 = arith.constant 0 : index
    %c0_18 = arith.constant 0 : index
    %16 = vector.load %arg2[%c1_16, %c0_17, %c0_18] : memref<3x16x192xbf16, #tpu.memory_space<vmem>>, vector<1x16x192xbf16>
    %17 = vector.shape_cast %16 : vector<1x16x192xbf16> to vector<16x192xbf16>
    %cst_19 = arith.constant dense<0.000000e+00> : vector<64x192xf32>
    %18 = tpu.matmul %10, %17, %cst_19 {dimension_numbers = #tpu.dot_dimension_numbers<[1], [0], [0], [1], [0, 0, 1, 1], [], []>} : vector<64x16xbf16>, vector<16x192xbf16>, vector<64x192xf32> -> vector<64x192xf32>
    %19 = arith.addf %15, %18 : vector<64x192xf32>
    %c2 = arith.constant 2 : index
    %c0_20 = arith.constant 0 : index
    %c0_21 = arith.constant 0 : index
    %20 = vector.load %arg2[%c2, %c0_20, %c0_21] : memref<3x16x192xbf16, #tpu.memory_space<vmem>>, vector<1x16x192xbf16>
    %21 = vector.shape_cast %20 : vector<1x16x192xbf16> to vector<16x192xbf16>
    %cst_22 = arith.constant dense<0.000000e+00> : vector<64x192xf32>
    %22 = tpu.matmul %12, %21, %cst_22 {dimension_numbers = #tpu.dot_dimension_numbers<[1], [0], [0], [1], [0, 0, 1, 1], [], []>} : vector<64x16xbf16>, vector<16x192xbf16>, vector<64x192xf32> -> vector<64x192xf32>
    %23 = arith.addf %19, %22 : vector<64x192xf32>
    %c0_23 = arith.constant 0 : index
    %c0_24 = arith.constant 0 : index
    %24 = vector.load %arg3[%c0_23, %c0_24] : memref<1x192xf32, #tpu.memory_space<vmem>>, vector<1x192xf32>
    %25 = vector.broadcast %24 : vector<1x192xf32> to vector<64x192xf32>
    %26 = arith.addf %23, %25 : vector<64x192xf32>
    %27 = vector.extract_strided_slice %26 {offsets = [0, 0], sizes = [64, 64], strides = [1, 1]} : vector<64x192xf32> to vector<64x64xf32>
    %28 = vector.extract_strided_slice %26 {offsets = [0, 64], sizes = [64, 64], strides = [1, 1]} : vector<64x192xf32> to vector<64x64xf32>
    %29 = arith.negf %28 : vector<64x64xf32>
    %30 = math.exp %29 : vector<64x64xf32>
    %cst_25 = arith.constant 1.000000e+00 : f32
    %31 = vector.broadcast %cst_25 : f32 to vector<64x64xf32>
    %32 = arith.addf %31, %30 : vector<64x64xf32>
    %33 = arith.divf %31, %32 : vector<64x64xf32>
    %34 = arith.addf %27, %33 : vector<64x64xf32>
    %35 = vector.extract_strided_slice %26 {offsets = [0, 128], sizes = [64, 64], strides = [1, 1]} : vector<64x192xf32> to vector<64x64xf32>
    %36 = arith.addf %34, %35 : vector<64x64xf32>
    %cst_26 = arith.constant 0.000000e+00 : f32
    %37 = vector.broadcast %cst_26 : f32 to vector<64x64xf32>
    %38 = arith.maximumf %36, %37 : vector<64x64xf32>
    %39 = vector.shape_cast %38 : vector<64x64xf32> to vector<8x8x64xf32>
    %c0_27 = arith.constant 0 : index
    %c0_28 = arith.constant 0 : index
    %c0_29 = arith.constant 0 : index
    %40 = vector.load %arg4[%c0_27, %c0_28, %c0_29] : memref<8x8x64xf32, #tpu.memory_space<vmem>>, vector<8x8x64xf32>
    tpu.vector_store %arg4[%c0_27, %c0_28, %c0_29], %39 {strides = array<i32>} : memref<8x8x64xf32, #tpu.memory_space<vmem>>, vector<8x8x64xf32>,
    return
  }
  func.func @transform_0(%arg0: i32) -> (i32, i32, i32) {
    %c0_i32 = arith.constant 0 : i32
    %c0_i32_0 = arith.constant 0 : i32
    %c0_i32_1 = arith.constant 0 : i32
    return %arg0, %c0_i32, %c0_i32_0 : i32, i32, i32
  }
  func.func @transform_1(%arg0: i32) -> (i32, i32, i32) {
    %c0_i32 = arith.constant 0 : i32
    %c0_i32_0 = arith.constant 0 : i32
    %c0_i32_1 = arith.constant 0 : i32
    %c0_i32_2 = arith.constant 0 : i32
    return %c0_i32, %c0_i32_0, %c0_i32_1 : i32, i32, i32
  }
  func.func @transform_2(%arg0: i32) -> (i32, i32) {
    %c0_i32 = arith.constant 0 : i32
    %c0_i32_0 = arith.constant 0 : i32
    %c0_i32_1 = arith.constant 0 : i32
    return %c0_i32, %c0_i32_0 : i32, i32
  }
  func.func @transform_3(%arg0: i32) -> (i32, i32, i32) {
    %c0_i32 = arith.constant 0 : i32
    %c0_i32_0 = arith.constant 0 : i32
    %c0_i32_1 = arith.constant 0 : i32
    return %arg0, %c0_i32, %c0_i32_0 : i32, i32, i32
  }
}

module attributes {stable_mosaic.version = 11 : i64} {
  func.func @_bn_kernel(%arg0: i32, %arg1: memref<2x4x8x64xf32, #tpu.memory_space<vmem>>, %arg2: memref<1x4x1x1xf32, #tpu.memory_space<vmem>>, %arg3: memref<1x4x1x1xf32, #tpu.memory_space<vmem>>, %arg4: memref<2x4x8x64xf32, #tpu.memory_space<vmem>>) attributes {dimension_semantics = [#tpu.dimension_semantics<parallel>], iteration_bounds = array<i64: 1>, scalar_prefetch = 0 : i64, scratch_operands = 0 : i64, tpu.core_type = #tpu.core_type<tc>, window_params = [{transform_indices = @transform_0, window_bounds = array<i64: 2, 4, 8, 64>}, {transform_indices = @transform_1, window_bounds = array<i64: 1, 4, 1, 1>}, {transform_indices = @transform_2, window_bounds = array<i64: 1, 4, 1, 1>}, {transform_indices = @transform_3, window_bounds = array<i64: 2, 4, 8, 64>}]} {
    %c0 = arith.constant 0 : index
    %c0_0 = arith.constant 0 : index
    %c0_1 = arith.constant 0 : index
    %c0_2 = arith.constant 0 : index
    %0 = vector.load %arg1[%c0, %c0_0, %c0_1, %c0_2] : memref<2x4x8x64xf32, #tpu.memory_space<vmem>>, vector<2x4x8x64xf32>
    %cst = arith.constant dense<0.000000e+00> : vector<2x4x8xf32>
    %1 = vector.multi_reduction <add>, %0, %cst [3] : vector<2x4x8x64xf32> to vector<2x4x8xf32>
    %2 = vector.shape_cast %1 : vector<2x4x8xf32> to vector<2x4x8x1xf32>
    %cst_3 = arith.constant dense<0.000000e+00> : vector<2x4x1xf32>
    %3 = vector.multi_reduction <add>, %2, %cst_3 [2] : vector<2x4x8x1xf32> to vector<2x4x1xf32>
    %4 = vector.shape_cast %3 : vector<2x4x1xf32> to vector<2x4x1x1xf32>
    %cst_4 = arith.constant dense<0.000000e+00> : vector<4x1x1xf32>
    %5 = vector.multi_reduction <add>, %4, %cst_4 [0] : vector<2x4x1x1xf32> to vector<4x1x1xf32>
    %6 = vector.shape_cast %5 : vector<4x1x1xf32> to vector<1x4x1x1xf32>
    %cst_5 = arith.constant 9.765625E-4 : f32
    %7 = vector.broadcast %cst_5 : f32 to vector<1x4x1x1xf32>
    %8 = arith.mulf %6, %7 : vector<1x4x1x1xf32>
    %9 = vector.broadcast %8 : vector<1x4x1x1xf32> to vector<2x4x8x64xf32>
    %10 = arith.subf %0, %9 : vector<2x4x8x64xf32>
    %11 = arith.mulf %10, %10 : vector<2x4x8x64xf32>
    %cst_6 = arith.constant dense<0.000000e+00> : vector<2x4x8xf32>
    %12 = vector.multi_reduction <add>, %11, %cst_6 [3] : vector<2x4x8x64xf32> to vector<2x4x8xf32>
    %13 = vector.shape_cast %12 : vector<2x4x8xf32> to vector<2x4x8x1xf32>
    %cst_7 = arith.constant dense<0.000000e+00> : vector<2x4x1xf32>
    %14 = vector.multi_reduction <add>, %13, %cst_7 [2] : vector<2x4x8x1xf32> to vector<2x4x1xf32>
    %15 = vector.shape_cast %14 : vector<2x4x1xf32> to vector<2x4x1x1xf32>
    %cst_8 = arith.constant dense<0.000000e+00> : vector<4x1x1xf32>
    %16 = vector.multi_reduction <add>, %15, %cst_8 [0] : vector<2x4x1x1xf32> to vector<4x1x1xf32>
    %17 = vector.shape_cast %16 : vector<4x1x1xf32> to vector<1x4x1x1xf32>
    %cst_9 = arith.constant 9.765625E-4 : f32
    %18 = vector.broadcast %cst_9 : f32 to vector<1x4x1x1xf32>
    %19 = arith.mulf %17, %18 : vector<1x4x1x1xf32>
    %cst_10 = arith.constant 9.99999974E-6 : f32
    %20 = vector.broadcast %cst_10 : f32 to vector<1x4x1x1xf32>
    %21 = arith.addf %19, %20 : vector<1x4x1x1xf32>
    %22 = math.rsqrt %21 : vector<1x4x1x1xf32>
    %23 = vector.broadcast %22 : vector<1x4x1x1xf32> to vector<2x4x8x64xf32>
    %24 = arith.mulf %10, %23 : vector<2x4x8x64xf32>
    %c0_11 = arith.constant 0 : index
    %c0_12 = arith.constant 0 : index
    %c0_13 = arith.constant 0 : index
    %c0_14 = arith.constant 0 : index
    %25 = vector.load %arg2[%c0_11, %c0_12, %c0_13, %c0_14] : memref<1x4x1x1xf32, #tpu.memory_space<vmem>>, vector<1x4x1x1xf32>
    %26 = vector.broadcast %25 : vector<1x4x1x1xf32> to vector<2x4x8x64xf32>
    %27 = arith.mulf %24, %26 : vector<2x4x8x64xf32>
    %c0_15 = arith.constant 0 : index
    %c0_16 = arith.constant 0 : index
    %c0_17 = arith.constant 0 : index
    %c0_18 = arith.constant 0 : index
    %28 = vector.load %arg3[%c0_15, %c0_16, %c0_17, %c0_18] : memref<1x4x1x1xf32, #tpu.memory_space<vmem>>, vector<1x4x1x1xf32>
    %29 = vector.broadcast %28 : vector<1x4x1x1xf32> to vector<2x4x8x64xf32>
    %30 = arith.addf %27, %29 : vector<2x4x8x64xf32>
    %c0_19 = arith.constant 0 : index
    %c0_20 = arith.constant 0 : index
    %c0_21 = arith.constant 0 : index
    %c0_22 = arith.constant 0 : index
    %31 = vector.load %arg4[%c0_19, %c0_20, %c0_21, %c0_22] : memref<2x4x8x64xf32, #tpu.memory_space<vmem>>, vector<2x4x8x64xf32>
    tpu.vector_store %arg4[%c0_19, %c0_20, %c0_21, %c0_22], %30 {strides = array<i32>} : memref<2x4x8x64xf32, #tpu.memory_space<vmem>>, vector<2x4x8x64xf32>,
    return
  }
  func.func @transform_0(%arg0: i32) -> (i32, i32, i32, i32) {
    %c0_i32 = arith.constant 0 : i32
    %c0_i32_0 = arith.constant 0 : i32
    %c0_i32_1 = arith.constant 0 : i32
    %c0_i32_2 = arith.constant 0 : i32
    return %c0_i32, %arg0, %c0_i32_0, %c0_i32_1 : i32, i32, i32, i32
  }
  func.func @transform_1(%arg0: i32) -> (i32, i32, i32, i32) {
    %c0_i32 = arith.constant 0 : i32
    %c0_i32_0 = arith.constant 0 : i32
    %c0_i32_1 = arith.constant 0 : i32
    %c0_i32_2 = arith.constant 0 : i32
    return %c0_i32, %arg0, %c0_i32_0, %c0_i32_1 : i32, i32, i32, i32
  }
  func.func @transform_2(%arg0: i32) -> (i32, i32, i32, i32) {
    %c0_i32 = arith.constant 0 : i32
    %c0_i32_0 = arith.constant 0 : i32
    %c0_i32_1 = arith.constant 0 : i32
    %c0_i32_2 = arith.constant 0 : i32
    return %c0_i32, %arg0, %c0_i32_0, %c0_i32_1 : i32, i32, i32, i32
  }
  func.func @transform_3(%arg0: i32) -> (i32, i32, i32, i32) {
    %c0_i32 = arith.constant 0 : i32
    %c0_i32_0 = arith.constant 0 : i32
    %c0_i32_1 = arith.constant 0 : i32
    %c0_i32_2 = arith.constant 0 : i32
    return %c0_i32, %arg0, %c0_i32_0, %c0_i32_1 : i32, i32, i32, i32
  }
}

module attributes {stable_mosaic.version = 11 : i64} {
  func.func @_timeblock_kernel(%arg0: i32, %arg1: memref<8x8x64xf32, #tpu.memory_space<vmem>>, %arg2: memref<3x64x192xbf16, #tpu.memory_space<vmem>>, %arg3: memref<1x192xf32, #tpu.memory_space<vmem>>, %arg4: memref<64x16xbf16, #tpu.memory_space<vmem>>, %arg5: memref<8x8x16xf32, #tpu.memory_space<vmem>>, %arg6: memref<8x10x64xf32, #tpu.memory_space<vmem>>) attributes {dimension_semantics = [#tpu.dimension_semantics<parallel>], iteration_bounds = array<i64: 1>, scalar_prefetch = 0 : i64, scratch_operands = 1 : i64, tpu.core_type = #tpu.core_type<tc>, window_params = [{transform_indices = @transform_0, window_bounds = array<i64: 8, 8, 64>}, {pipeline_mode = #tpu.pipeline_mode<synchronous>, transform_indices = @transform_1, window_bounds = array<i64: 3, 64, 192>}, {pipeline_mode = #tpu.pipeline_mode<synchronous>, transform_indices = @transform_2, window_bounds = array<i64: 1, 192>}, {pipeline_mode = #tpu.pipeline_mode<synchronous>, transform_indices = @transform_3, window_bounds = array<i64: 64, 16>}, {transform_indices = @transform_4, window_bounds = array<i64: 8, 8, 16>}]} {
    %c0 = arith.constant 0 : index
    %c0_0 = arith.constant 0 : index
    %c0_1 = arith.constant 0 : index
    %0 = vector.load %arg1[%c0, %c0_0, %c0_1] : memref<8x8x64xf32, #tpu.memory_space<vmem>>, vector<8x8x64xf32>
    %c0_2 = arith.constant 0 : index
    %c1 = arith.constant 1 : index
    %c0_3 = arith.constant 0 : index
    %1 = vector.load %arg6[%c0_2, %c1, %c0_3] : memref<8x10x64xf32, #tpu.memory_space<vmem>>, vector<8x8x64xf32>
    tpu.vector_store %arg6[%c0_2, %c1, %c0_3], %0 {strides = array<i32>} : memref<8x10x64xf32, #tpu.memory_space<vmem>>, vector<8x8x64xf32>,
    %cst = arith.constant 0.000000e+00 : f32
    %2 = vector.broadcast %cst : f32 to vector<8x1x64xf32>
    %c0_4 = arith.constant 0 : index
    %c0_5 = arith.constant 0 : index
    %c0_6 = arith.constant 0 : index
    %3 = vector.load %arg6[%c0_4, %c0_5, %c0_6] : memref<8x10x64xf32, #tpu.memory_space<vmem>>, vector<8x1x64xf32>
    tpu.vector_store %arg6[%c0_4, %c0_5, %c0_6], %2 {strides = array<i32>} : memref<8x10x64xf32, #tpu.memory_space<vmem>>, vector<8x1x64xf32>,
    %c0_7 = arith.constant 0 : index
    %c9 = arith.constant 9 : index
    %c0_8 = arith.constant 0 : index
    %4 = vector.load %arg6[%c0_7, %c9, %c0_8] : memref<8x10x64xf32, #tpu.memory_space<vmem>>, vector<8x1x64xf32>
    tpu.vector_store %arg6[%c0_7, %c9, %c0_8], %2 {strides = array<i32>} : memref<8x10x64xf32, #tpu.memory_space<vmem>>, vector<8x1x64xf32>,
    %c0_9 = arith.constant 0 : index
    %c0_10 = arith.constant 0 : index
    %c0_11 = arith.constant 0 : index
    %5 = vector.load %arg6[%c0_9, %c0_10, %c0_11] : memref<8x10x64xf32, #tpu.memory_space<vmem>>, vector<8x10x64xf32>
    %6 = arith.truncf %5 : vector<8x10x64xf32> to vector<8x10x64xbf16>
    %7 = vector.extract_strided_slice %6 {offsets = [0, 0, 0], sizes = [8, 8, 64], strides = [1, 1, 1]} : vector<8x10x64xbf16> to vector<8x8x64xbf16>
    %8 = vector.shape_cast %7 : vector<8x8x64xbf16> to vector<64x64xbf16>
    %9 = vector.extract_strided_slice %6 {offsets = [0, 1, 0], sizes = [8, 8, 64], strides = [1, 1, 1]} : vector<8x10x64xbf16> to vector<8x8x64xbf16>
    %10 = vector.shape_cast %9 : vector<8x8x64xbf16> to vector<64x64xbf16>
    %11 = vector.extract_strided_slice %6 {offsets = [0, 2, 0], sizes = [8, 8, 64], strides = [1, 1, 1]} : vector<8x10x64xbf16> to vector<8x8x64xbf16>
    %12 = vector.shape_cast %11 : vector<8x8x64xbf16> to vector<64x64xbf16>
    %c0_12 = arith.constant 0 : index
    %c0_13 = arith.constant 0 : index
    %c0_14 = arith.constant 0 : index
    %13 = vector.load %arg2[%c0_12, %c0_13, %c0_14] : memref<3x64x192xbf16, #tpu.memory_space<vmem>>, vector<1x64x192xbf16>
    %14 = vector.shape_cast %13 : vector<1x64x192xbf16> to vector<64x192xbf16>
    %cst_15 = arith.constant dense<0.000000e+00> : vector<64x192xf32>
    %15 = tpu.matmul %8, %14, %cst_15 {dimension_numbers = #tpu.dot_dimension_numbers<[1], [0], [0], [1], [0, 0, 1, 1], [], []>} : vector<64x64xbf16>, vector<64x192xbf16>, vector<64x192xf32> -> vector<64x192xf32>
    %c1_16 = arith.constant 1 : index
    %c0_17 = arith.constant 0 : index
    %c0_18 = arith.constant 0 : index
    %16 = vector.load %arg2[%c1_16, %c0_17, %c0_18] : memref<3x64x192xbf16, #tpu.memory_space<vmem>>, vector<1x64x192xbf16>
    %17 = vector.shape_cast %16 : vector<1x64x192xbf16> to vector<64x192xbf16>
    %cst_19 = arith.constant dense<0.000000e+00> : vector<64x192xf32>
    %18 = tpu.matmul %10, %17, %cst_19 {dimension_numbers = #tpu.dot_dimension_numbers<[1], [0], [0], [1], [0, 0, 1, 1], [], []>} : vector<64x64xbf16>, vector<64x192xbf16>, vector<64x192xf32> -> vector<64x192xf32>
    %19 = arith.addf %15, %18 : vector<64x192xf32>
    %c2 = arith.constant 2 : index
    %c0_20 = arith.constant 0 : index
    %c0_21 = arith.constant 0 : index
    %20 = vector.load %arg2[%c2, %c0_20, %c0_21] : memref<3x64x192xbf16, #tpu.memory_space<vmem>>, vector<1x64x192xbf16>
    %21 = vector.shape_cast %20 : vector<1x64x192xbf16> to vector<64x192xbf16>
    %cst_22 = arith.constant dense<0.000000e+00> : vector<64x192xf32>
    %22 = tpu.matmul %12, %21, %cst_22 {dimension_numbers = #tpu.dot_dimension_numbers<[1], [0], [0], [1], [0, 0, 1, 1], [], []>} : vector<64x64xbf16>, vector<64x192xbf16>, vector<64x192xf32> -> vector<64x192xf32>
    %23 = arith.addf %19, %22 : vector<64x192xf32>
    %c0_23 = arith.constant 0 : index
    %c0_24 = arith.constant 0 : index
    %24 = vector.load %arg3[%c0_23, %c0_24] : memref<1x192xf32, #tpu.memory_space<vmem>>, vector<1x192xf32>
    %25 = vector.broadcast %24 : vector<1x192xf32> to vector<64x192xf32>
    %26 = arith.addf %23, %25 : vector<64x192xf32>
    %27 = vector.extract_strided_slice %26 {offsets = [0, 0], sizes = [64, 64], strides = [1, 1]} : vector<64x192xf32> to vector<64x64xf32>
    %28 = vector.extract_strided_slice %26 {offsets = [0, 64], sizes = [64, 64], strides = [1, 1]} : vector<64x192xf32> to vector<64x64xf32>
    %29 = arith.negf %28 : vector<64x64xf32>
    %30 = math.exp %29 : vector<64x64xf32>
    %cst_25 = arith.constant 1.000000e+00 : f32
    %31 = vector.broadcast %cst_25 : f32 to vector<64x64xf32>
    %32 = arith.addf %31, %30 : vector<64x64xf32>
    %33 = arith.divf %31, %32 : vector<64x64xf32>
    %34 = arith.addf %27, %33 : vector<64x64xf32>
    %35 = vector.extract_strided_slice %26 {offsets = [0, 128], sizes = [64, 64], strides = [1, 1]} : vector<64x192xf32> to vector<64x64xf32>
    %36 = arith.addf %34, %35 : vector<64x64xf32>
    %cst_26 = arith.constant 0.000000e+00 : f32
    %37 = vector.broadcast %cst_26 : f32 to vector<64x64xf32>
    %38 = arith.maximumf %36, %37 : vector<64x64xf32>
    %39 = arith.truncf %38 : vector<64x64xf32> to vector<64x64xbf16>
    %c0_27 = arith.constant 0 : index
    %c0_28 = arith.constant 0 : index
    %40 = vector.load %arg4[%c0_27, %c0_28] : memref<64x16xbf16, #tpu.memory_space<vmem>>, vector<64x16xbf16>
    %cst_29 = arith.constant dense<0.000000e+00> : vector<64x16xf32>
    %41 = tpu.matmul %39, %40, %cst_29 {dimension_numbers = #tpu.dot_dimension_numbers<[1], [0], [0], [1], [0, 0, 1, 1], [], []>} : vector<64x64xbf16>, vector<64x16xbf16>, vector<64x16xf32> -> vector<64x16xf32>
    %42 = vector.shape_cast %41 : vector<64x16xf32> to vector<8x8x16xf32>
    %c0_30 = arith.constant 0 : index
    %c0_31 = arith.constant 0 : index
    %c0_32 = arith.constant 0 : index
    %43 = vector.load %arg5[%c0_30, %c0_31, %c0_32] : memref<8x8x16xf32, #tpu.memory_space<vmem>>, vector<8x8x16xf32>
    tpu.vector_store %arg5[%c0_30, %c0_31, %c0_32], %42 {strides = array<i32>} : memref<8x8x16xf32, #tpu.memory_space<vmem>>, vector<8x8x16xf32>,
    return
  }
  func.func @transform_0(%arg0: i32) -> (i32, i32, i32) {
    %c0_i32 = arith.constant 0 : i32
    %c0_i32_0 = arith.constant 0 : i32
    %c0_i32_1 = arith.constant 0 : i32
    return %arg0, %c0_i32, %c0_i32_0 : i32, i32, i32
  }
  func.func @transform_1(%arg0: i32) -> (i32, i32, i32) {
    %c0_i32 = arith.constant 0 : i32
    %c0_i32_0 = arith.constant 0 : i32
    %c0_i32_1 = arith.constant 0 : i32
    %c0_i32_2 = arith.constant 0 : i32
    return %c0_i32, %c0_i32_0, %c0_i32_1 : i32, i32, i32
  }
  func.func @transform_2(%arg0: i32) -> (i32, i32) {
    %c0_i32 = arith.constant 0 : i32
    %c0_i32_0 = arith.constant 0 : i32
    %c0_i32_1 = arith.constant 0 : i32
    return %c0_i32, %c0_i32_0 : i32, i32
  }
  func.func @transform_3(%arg0: i32) -> (i32, i32) {
    %c0_i32 = arith.constant 0 : i32
    %c0_i32_0 = arith.constant 0 : i32
    %c0_i32_1 = arith.constant 0 : i32
    return %c0_i32, %c0_i32_0 : i32, i32
  }
  func.func @transform_4(%arg0: i32) -> (i32, i32, i32) {
    %c0_i32 = arith.constant 0 : i32
    %c0_i32_0 = arith.constant 0 : i32
    %c0_i32_1 = arith.constant 0 : i32
    return %arg0, %c0_i32, %c0_i32_0 : i32, i32, i32
  }
}

module attributes {stable_mosaic.version = 11 : i64} {
  func.func @_timeblock_kernel(%arg0: i32, %arg1: memref<8x8x64xf32, #tpu.memory_space<vmem>>, %arg2: memref<3x64x192xbf16, #tpu.memory_space<vmem>>, %arg3: memref<1x192xf32, #tpu.memory_space<vmem>>, %arg4: memref<8x8x64xf32, #tpu.memory_space<vmem>>, %arg5: memref<8x10x64xf32, #tpu.memory_space<vmem>>) attributes {dimension_semantics = [#tpu.dimension_semantics<parallel>], iteration_bounds = array<i64: 1>, scalar_prefetch = 0 : i64, scratch_operands = 1 : i64, tpu.core_type = #tpu.core_type<tc>, window_params = [{transform_indices = @transform_0, window_bounds = array<i64: 8, 8, 64>}, {pipeline_mode = #tpu.pipeline_mode<synchronous>, transform_indices = @transform_1, window_bounds = array<i64: 3, 64, 192>}, {pipeline_mode = #tpu.pipeline_mode<synchronous>, transform_indices = @transform_2, window_bounds = array<i64: 1, 192>}, {transform_indices = @transform_3, window_bounds = array<i64: 8, 8, 64>}]} {
    %c0 = arith.constant 0 : index
    %c0_0 = arith.constant 0 : index
    %c0_1 = arith.constant 0 : index
    %0 = vector.load %arg1[%c0, %c0_0, %c0_1] : memref<8x8x64xf32, #tpu.memory_space<vmem>>, vector<8x8x64xf32>
    %c0_2 = arith.constant 0 : index
    %c1 = arith.constant 1 : index
    %c0_3 = arith.constant 0 : index
    %1 = vector.load %arg5[%c0_2, %c1, %c0_3] : memref<8x10x64xf32, #tpu.memory_space<vmem>>, vector<8x8x64xf32>
    tpu.vector_store %arg5[%c0_2, %c1, %c0_3], %0 {strides = array<i32>} : memref<8x10x64xf32, #tpu.memory_space<vmem>>, vector<8x8x64xf32>,
    %cst = arith.constant 0.000000e+00 : f32
    %2 = vector.broadcast %cst : f32 to vector<8x1x64xf32>
    %c0_4 = arith.constant 0 : index
    %c0_5 = arith.constant 0 : index
    %c0_6 = arith.constant 0 : index
    %3 = vector.load %arg5[%c0_4, %c0_5, %c0_6] : memref<8x10x64xf32, #tpu.memory_space<vmem>>, vector<8x1x64xf32>
    tpu.vector_store %arg5[%c0_4, %c0_5, %c0_6], %2 {strides = array<i32>} : memref<8x10x64xf32, #tpu.memory_space<vmem>>, vector<8x1x64xf32>,
    %c0_7 = arith.constant 0 : index
    %c9 = arith.constant 9 : index
    %c0_8 = arith.constant 0 : index
    %4 = vector.load %arg5[%c0_7, %c9, %c0_8] : memref<8x10x64xf32, #tpu.memory_space<vmem>>, vector<8x1x64xf32>
    tpu.vector_store %arg5[%c0_7, %c9, %c0_8], %2 {strides = array<i32>} : memref<8x10x64xf32, #tpu.memory_space<vmem>>, vector<8x1x64xf32>,
    %c0_9 = arith.constant 0 : index
    %c0_10 = arith.constant 0 : index
    %c0_11 = arith.constant 0 : index
    %5 = vector.load %arg5[%c0_9, %c0_10, %c0_11] : memref<8x10x64xf32, #tpu.memory_space<vmem>>, vector<8x10x64xf32>
    %6 = arith.truncf %5 : vector<8x10x64xf32> to vector<8x10x64xbf16>
    %7 = vector.extract_strided_slice %6 {offsets = [0, 0, 0], sizes = [8, 8, 64], strides = [1, 1, 1]} : vector<8x10x64xbf16> to vector<8x8x64xbf16>
    %8 = vector.shape_cast %7 : vector<8x8x64xbf16> to vector<64x64xbf16>
    %9 = vector.extract_strided_slice %6 {offsets = [0, 1, 0], sizes = [8, 8, 64], strides = [1, 1, 1]} : vector<8x10x64xbf16> to vector<8x8x64xbf16>
    %10 = vector.shape_cast %9 : vector<8x8x64xbf16> to vector<64x64xbf16>
    %11 = vector.extract_strided_slice %6 {offsets = [0, 2, 0], sizes = [8, 8, 64], strides = [1, 1, 1]} : vector<8x10x64xbf16> to vector<8x8x64xbf16>
    %12 = vector.shape_cast %11 : vector<8x8x64xbf16> to vector<64x64xbf16>
    %c0_12 = arith.constant 0 : index
    %c0_13 = arith.constant 0 : index
    %c0_14 = arith.constant 0 : index
    %13 = vector.load %arg2[%c0_12, %c0_13, %c0_14] : memref<3x64x192xbf16, #tpu.memory_space<vmem>>, vector<1x64x192xbf16>
    %14 = vector.shape_cast %13 : vector<1x64x192xbf16> to vector<64x192xbf16>
    %cst_15 = arith.constant dense<0.000000e+00> : vector<64x192xf32>
    %15 = tpu.matmul %8, %14, %cst_15 {dimension_numbers = #tpu.dot_dimension_numbers<[1], [0], [0], [1], [0, 0, 1, 1], [], []>} : vector<64x64xbf16>, vector<64x192xbf16>, vector<64x192xf32> -> vector<64x192xf32>
    %c1_16 = arith.constant 1 : index
    %c0_17 = arith.constant 0 : index
    %c0_18 = arith.constant 0 : index
    %16 = vector.load %arg2[%c1_16, %c0_17, %c0_18] : memref<3x64x192xbf16, #tpu.memory_space<vmem>>, vector<1x64x192xbf16>
    %17 = vector.shape_cast %16 : vector<1x64x192xbf16> to vector<64x192xbf16>
    %cst_19 = arith.constant dense<0.000000e+00> : vector<64x192xf32>
    %18 = tpu.matmul %10, %17, %cst_19 {dimension_numbers = #tpu.dot_dimension_numbers<[1], [0], [0], [1], [0, 0, 1, 1], [], []>} : vector<64x64xbf16>, vector<64x192xbf16>, vector<64x192xf32> -> vector<64x192xf32>
    %19 = arith.addf %15, %18 : vector<64x192xf32>
    %c2 = arith.constant 2 : index
    %c0_20 = arith.constant 0 : index
    %c0_21 = arith.constant 0 : index
    %20 = vector.load %arg2[%c2, %c0_20, %c0_21] : memref<3x64x192xbf16, #tpu.memory_space<vmem>>, vector<1x64x192xbf16>
    %21 = vector.shape_cast %20 : vector<1x64x192xbf16> to vector<64x192xbf16>
    %cst_22 = arith.constant dense<0.000000e+00> : vector<64x192xf32>
    %22 = tpu.matmul %12, %21, %cst_22 {dimension_numbers = #tpu.dot_dimension_numbers<[1], [0], [0], [1], [0, 0, 1, 1], [], []>} : vector<64x64xbf16>, vector<64x192xbf16>, vector<64x192xf32> -> vector<64x192xf32>
    %23 = arith.addf %19, %22 : vector<64x192xf32>
    %c0_23 = arith.constant 0 : index
    %c0_24 = arith.constant 0 : index
    %24 = vector.load %arg3[%c0_23, %c0_24] : memref<1x192xf32, #tpu.memory_space<vmem>>, vector<1x192xf32>
    %25 = vector.broadcast %24 : vector<1x192xf32> to vector<64x192xf32>
    %26 = arith.addf %23, %25 : vector<64x192xf32>
    %27 = vector.extract_strided_slice %26 {offsets = [0, 0], sizes = [64, 64], strides = [1, 1]} : vector<64x192xf32> to vector<64x64xf32>
    %28 = vector.extract_strided_slice %26 {offsets = [0, 64], sizes = [64, 64], strides = [1, 1]} : vector<64x192xf32> to vector<64x64xf32>
    %29 = arith.negf %28 : vector<64x64xf32>
    %30 = math.exp %29 : vector<64x64xf32>
    %cst_25 = arith.constant 1.000000e+00 : f32
    %31 = vector.broadcast %cst_25 : f32 to vector<64x64xf32>
    %32 = arith.addf %31, %30 : vector<64x64xf32>
    %33 = arith.divf %31, %32 : vector<64x64xf32>
    %34 = arith.addf %27, %33 : vector<64x64xf32>
    %35 = vector.extract_strided_slice %26 {offsets = [0, 128], sizes = [64, 64], strides = [1, 1]} : vector<64x192xf32> to vector<64x64xf32>
    %36 = arith.addf %34, %35 : vector<64x64xf32>
    %cst_26 = arith.constant 0.000000e+00 : f32
    %37 = vector.broadcast %cst_26 : f32 to vector<64x64xf32>
    %38 = arith.maximumf %36, %37 : vector<64x64xf32>
    %39 = vector.shape_cast %38 : vector<64x64xf32> to vector<8x8x64xf32>
    %c0_27 = arith.constant 0 : index
    %c0_28 = arith.constant 0 : index
    %c0_29 = arith.constant 0 : index
    %40 = vector.load %arg4[%c0_27, %c0_28, %c0_29] : memref<8x8x64xf32, #tpu.memory_space<vmem>>, vector<8x8x64xf32>
    tpu.vector_store %arg4[%c0_27, %c0_28, %c0_29], %39 {strides = array<i32>} : memref<8x8x64xf32, #tpu.memory_space<vmem>>, vector<8x8x64xf32>,
    return
  }
  func.func @transform_0(%arg0: i32) -> (i32, i32, i32) {
    %c0_i32 = arith.constant 0 : i32
    %c0_i32_0 = arith.constant 0 : i32
    %c0_i32_1 = arith.constant 0 : i32
    return %arg0, %c0_i32, %c0_i32_0 : i32, i32, i32
  }
  func.func @transform_1(%arg0: i32) -> (i32, i32, i32) {
    %c0_i32 = arith.constant 0 : i32
    %c0_i32_0 = arith.constant 0 : i32
    %c0_i32_1 = arith.constant 0 : i32
    %c0_i32_2 = arith.constant 0 : i32
    return %c0_i32, %c0_i32_0, %c0_i32_1 : i32, i32, i32
  }
  func.func @transform_2(%arg0: i32) -> (i32, i32) {
    %c0_i32 = arith.constant 0 : i32
    %c0_i32_0 = arith.constant 0 : i32
    %c0_i32_1 = arith.constant 0 : i32
    return %c0_i32, %c0_i32_0 : i32, i32
  }
  func.func @transform_3(%arg0: i32) -> (i32, i32, i32) {
    %c0_i32 = arith.constant 0 : i32
    %c0_i32_0 = arith.constant 0 : i32
    %c0_i32_1 = arith.constant 0 : i32
    return %arg0, %c0_i32, %c0_i32_0 : i32, i32, i32
  }
}

module attributes {stable_mosaic.version = 11 : i64} {
  func.func @_matmul_kernel(%arg0: i32, %arg1: memref<64x64xf32, #tpu.memory_space<vmem>>, %arg2: memref<64x256xbf16, #tpu.memory_space<vmem>>, %arg3: memref<1x256xf32, #tpu.memory_space<vmem>>, %arg4: memref<64x256xf32, #tpu.memory_space<vmem>>) attributes {dimension_semantics = [#tpu.dimension_semantics<parallel>], iteration_bounds = array<i64: 1>, scalar_prefetch = 0 : i64, scratch_operands = 0 : i64, tpu.core_type = #tpu.core_type<tc>, window_params = [{transform_indices = @transform_0, window_bounds = array<i64: 64, 64>}, {pipeline_mode = #tpu.pipeline_mode<synchronous>, transform_indices = @transform_1, window_bounds = array<i64: 64, 256>}, {pipeline_mode = #tpu.pipeline_mode<synchronous>, transform_indices = @transform_2, window_bounds = array<i64: 1, 256>}, {transform_indices = @transform_3, window_bounds = array<i64: 64, 256>}]} {
    %c0 = arith.constant 0 : index
    %c0_0 = arith.constant 0 : index
    %0 = vector.load %arg1[%c0, %c0_0] : memref<64x64xf32, #tpu.memory_space<vmem>>, vector<64x64xf32>
    %1 = arith.truncf %0 : vector<64x64xf32> to vector<64x64xbf16>
    %c0_1 = arith.constant 0 : index
    %c0_2 = arith.constant 0 : index
    %2 = vector.load %arg2[%c0_1, %c0_2] : memref<64x256xbf16, #tpu.memory_space<vmem>>, vector<64x256xbf16>
    %cst = arith.constant dense<0.000000e+00> : vector<64x256xf32>
    %3 = tpu.matmul %1, %2, %cst {dimension_numbers = #tpu.dot_dimension_numbers<[1], [0], [0], [1], [0, 0, 1, 1], [], []>} : vector<64x64xbf16>, vector<64x256xbf16>, vector<64x256xf32> -> vector<64x256xf32>
    %c0_3 = arith.constant 0 : index
    %c0_4 = arith.constant 0 : index
    %4 = vector.load %arg3[%c0_3, %c0_4] : memref<1x256xf32, #tpu.memory_space<vmem>>, vector<1x256xf32>
    %5 = vector.broadcast %4 : vector<1x256xf32> to vector<64x256xf32>
    %6 = arith.addf %3, %5 : vector<64x256xf32>
    %c0_5 = arith.constant 0 : index
    %c0_6 = arith.constant 0 : index
    %7 = vector.load %arg4[%c0_5, %c0_6] : memref<64x256xf32, #tpu.memory_space<vmem>>, vector<64x256xf32>
    tpu.vector_store %arg4[%c0_5, %c0_6], %6 {strides = array<i32>} : memref<64x256xf32, #tpu.memory_space<vmem>>, vector<64x256xf32>,
    return
  }
  func.func @transform_0(%arg0: i32) -> (i32, i32) {
    %c0_i32 = arith.constant 0 : i32
    %c0_i32_0 = arith.constant 0 : i32
    return %arg0, %c0_i32 : i32, i32
  }
  func.func @transform_1(%arg0: i32) -> (i32, i32) {
    %c0_i32 = arith.constant 0 : i32
    %c0_i32_0 = arith.constant 0 : i32
    %c0_i32_1 = arith.constant 0 : i32
    return %c0_i32, %c0_i32_0 : i32, i32
  }
  func.func @transform_2(%arg0: i32) -> (i32, i32) {
    %c0_i32 = arith.constant 0 : i32
    %c0_i32_0 = arith.constant 0 : i32
    %c0_i32_1 = arith.constant 0 : i32
    return %c0_i32, %c0_i32_0 : i32, i32
  }
  func.func @transform_3(%arg0: i32) -> (i32, i32) {
    %c0_i32 = arith.constant 0 : i32
    %c0_i32_0 = arith.constant 0 : i32
    return %arg0, %c0_i32 : i32, i32
  }
}

module attributes {stable_mosaic.version = 11 : i64} {
  func.func @_lstm_kernel(%arg0: i32, %arg1: memref<8x8x256xf32, #tpu.memory_space<vmem>>, %arg2: memref<64x256xbf16, #tpu.memory_space<vmem>>, %arg3: memref<8x8x64xf32, #tpu.memory_space<vmem>>, %arg4: memref<8x64xf32, #tpu.memory_space<vmem>>, %arg5: memref<8x64xf32, #tpu.memory_space<vmem>>) attributes {dimension_semantics = [#tpu.dimension_semantics<arbitrary>], iteration_bounds = array<i64: 1>, scalar_prefetch = 0 : i64, scratch_operands = 2 : i64, tpu.core_type = #tpu.core_type<tc>, window_params = [{transform_indices = @transform_0, window_bounds = array<i64: 8, 8, 256>}, {pipeline_mode = #tpu.pipeline_mode<synchronous>, transform_indices = @transform_1, window_bounds = array<i64: 64, 256>}, {transform_indices = @transform_2, window_bounds = array<i64: 8, 8, 64>}]} {
    %c0_i32 = arith.constant 0 : i32
    %0 = arith.cmpi eq, %arg0, %c0_i32 : i32
    %1 = arith.extui %0 : i1 to i32
    %c0_i32_0 = arith.constant 0 : i32
    %2 = arith.cmpi ne, %1, %c0_i32_0 : i32
    scf.if %2 {
      %cst_74 = arith.constant 0.000000e+00 : f32
      %288 = vector.broadcast %cst_74 : f32 to vector<8x64xf32>
      %c0_75 = arith.constant 0 : index
      %c0_76 = arith.constant 0 : index
      %289 = vector.load %arg4[%c0_75, %c0_76] : memref<8x64xf32, #tpu.memory_space<vmem>>, vector<8x64xf32>
      tpu.vector_store %arg4[%c0_75, %c0_76], %288 {strides = array<i32>} : memref<8x64xf32, #tpu.memory_space<vmem>>, vector<8x64xf32>,
      %cst_77 = arith.constant 0.000000e+00 : f32
      %290 = vector.broadcast %cst_77 : f32 to vector<8x64xf32>
      %c0_78 = arith.constant 0 : index
      %c0_79 = arith.constant 0 : index
      %291 = vector.load %arg5[%c0_78, %c0_79] : memref<8x64xf32, #tpu.memory_space<vmem>>, vector<8x64xf32>
      tpu.vector_store %arg5[%c0_78, %c0_79], %290 {strides = array<i32>} : memref<8x64xf32, #tpu.memory_space<vmem>>, vector<8x64xf32>,
    } else {
    }
    %c0 = arith.constant 0 : index
    %c0_1 = arith.constant 0 : index
    %3 = vector.load %arg2[%c0, %c0_1] : memref<64x256xbf16, #tpu.memory_space<vmem>>, vector<64x256xbf16>
    %c0_2 = arith.constant 0 : index
    %c0_3 = arith.constant 0 : index
    %4 = vector.load %arg4[%c0_2, %c0_3] : memref<8x64xf32, #tpu.memory_space<vmem>>, vector<8x64xf32>
    %c0_4 = arith.constant 0 : index
    %c0_5 = arith.constant 0 : index
    %5 = vector.load %arg5[%c0_4, %c0_5] : memref<8x64xf32, #tpu.memory_space<vmem>>, vector<8x64xf32>
    %c0_i32_6 = arith.constant 0 : i32
    %6 = arith.index_cast %c0_i32_6 : i32 to index
    %c0_7 = arith.constant 0 : index
    %c0_8 = arith.constant 0 : index
    %7 = vector.load %arg1[%6, %c0_7, %c0_8] : memref<8x8x256xf32, #tpu.memory_space<vmem>>, vector<1x8x256xf32>
    %8 = vector.shape_cast %7 : vector<1x8x256xf32> to vector<8x256xf32>
    %9 = arith.truncf %4 : vector<8x64xf32> to vector<8x64xbf16>
    %cst = arith.constant dense<0.000000e+00> : vector<8x256xf32>
    %10 = tpu.matmul %9, %3, %cst {dimension_numbers = #tpu.dot_dimension_numbers<[1], [0], [0], [1], [0, 0, 1, 1], [], []>} : vector<8x64xbf16>, vector<64x256xbf16>, vector<8x256xf32> -> vector<8x256xf32>
    %11 = arith.addf %8, %10 : vector<8x256xf32>
    %12 = vector.extract_strided_slice %11 {offsets = [0, 0], sizes = [8, 64], strides = [1, 1]} : vector<8x256xf32> to vector<8x64xf32>
    %13 = arith.negf %12 : vector<8x64xf32>
    %14 = math.exp %13 : vector<8x64xf32>
    %cst_9 = arith.constant 1.000000e+00 : f32
    %15 = vector.broadcast %cst_9 : f32 to vector<8x64xf32>
    %16 = arith.addf %15, %14 : vector<8x64xf32>
    %17 = arith.divf %15, %16 : vector<8x64xf32>
    %18 = vector.extract_strided_slice %11 {offsets = [0, 64], sizes = [8, 64], strides = [1, 1]} : vector<8x256xf32> to vector<8x64xf32>
    %19 = arith.negf %18 : vector<8x64xf32>
    %20 = math.exp %19 : vector<8x64xf32>
    %cst_10 = arith.constant 1.000000e+00 : f32
    %21 = vector.broadcast %cst_10 : f32 to vector<8x64xf32>
    %22 = arith.addf %21, %20 : vector<8x64xf32>
    %23 = arith.divf %21, %22 : vector<8x64xf32>
    %24 = vector.extract_strided_slice %11 {offsets = [0, 128], sizes = [8, 64], strides = [1, 1]} : vector<8x256xf32> to vector<8x64xf32>
    %25 = math.tanh %24 : vector<8x64xf32>
    %26 = vector.extract_strided_slice %11 {offsets = [0, 192], sizes = [8, 64], strides = [1, 1]} : vector<8x256xf32> to vector<8x64xf32>
    %27 = arith.negf %26 : vector<8x64xf32>
    %28 = math.exp %27 : vector<8x64xf32>
    %cst_11 = arith.constant 1.000000e+00 : f32
    %29 = vector.broadcast %cst_11 : f32 to vector<8x64xf32>
    %30 = arith.addf %29, %28 : vector<8x64xf32>
    %31 = arith.divf %29, %30 : vector<8x64xf32>
    %32 = arith.mulf %23, %5 : vector<8x64xf32>
    %33 = arith.mulf %17, %25 : vector<8x64xf32>
    %34 = arith.addf %32, %33 : vector<8x64xf32>
    %35 = math.tanh %34 : vector<8x64xf32>
    %36 = arith.mulf %31, %35 : vector<8x64xf32>
    %37 = arith.index_cast %c0_i32_6 : i32 to index
    %c0_12 = arith.constant 0 : index
    %c0_13 = arith.constant 0 : index
    %38 = vector.load %arg3[%37, %c0_12, %c0_13] : memref<8x8x64xf32, #tpu.memory_space<vmem>>, vector<1x8x64xf32>
    %39 = vector.shape_cast %38 : vector<1x8x64xf32> to vector<8x64xf32>
    %40 = vector.shape_cast %36 : vector<8x64xf32> to vector<1x8x64xf32>
    tpu.vector_store %arg3[%37, %c0_12, %c0_13], %40 {strides = array<i32>} : memref<8x8x64xf32, #tpu.memory_space<vmem>>, vector<1x8x64xf32>,
    %c1_i32 = arith.constant 1 : i32
    %41 = arith.index_cast %c1_i32 : i32 to index
    %c0_14 = arith.constant 0 : index
    %c0_15 = arith.constant 0 : index
    %42 = vector.load %arg1[%41, %c0_14, %c0_15] : memref<8x8x256xf32, #tpu.memory_space<vmem>>, vector<1x8x256xf32>
    %43 = vector.shape_cast %42 : vector<1x8x256xf32> to vector<8x256xf32>
    %44 = arith.truncf %36 : vector<8x64xf32> to vector<8x64xbf16>
    %cst_16 = arith.constant dense<0.000000e+00> : vector<8x256xf32>
    %45 = tpu.matmul %44, %3, %cst_16 {dimension_numbers = #tpu.dot_dimension_numbers<[1], [0], [0], [1], [0, 0, 1, 1], [], []>} : vector<8x64xbf16>, vector<64x256xbf16>, vector<8x256xf32> -> vector<8x256xf32>
    %46 = arith.addf %43, %45 : vector<8x256xf32>
    %47 = vector.extract_strided_slice %46 {offsets = [0, 0], sizes = [8, 64], strides = [1, 1]} : vector<8x256xf32> to vector<8x64xf32>
    %48 = arith.negf %47 : vector<8x64xf32>
    %49 = math.exp %48 : vector<8x64xf32>
    %cst_17 = arith.constant 1.000000e+00 : f32
    %50 = vector.broadcast %cst_17 : f32 to vector<8x64xf32>
    %51 = arith.addf %50, %49 : vector<8x64xf32>
    %52 = arith.divf %50, %51 : vector<8x64xf32>
    %53 = vector.extract_strided_slice %46 {offsets = [0, 64], sizes = [8, 64], strides = [1, 1]} : vector<8x256xf32> to vector<8x64xf32>
    %54 = arith.negf %53 : vector<8x64xf32>
    %55 = math.exp %54 : vector<8x64xf32>
    %cst_18 = arith.constant 1.000000e+00 : f32
    %56 = vector.broadcast %cst_18 : f32 to vector<8x64xf32>
    %57 = arith.addf %56, %55 : vector<8x64xf32>
    %58 = arith.divf %56, %57 : vector<8x64xf32>
    %59 = vector.extract_strided_slice %46 {offsets = [0, 128], sizes = [8, 64], strides = [1, 1]} : vector<8x256xf32> to vector<8x64xf32>
    %60 = math.tanh %59 : vector<8x64xf32>
    %61 = vector.extract_strided_slice %46 {offsets = [0, 192], sizes = [8, 64], strides = [1, 1]} : vector<8x256xf32> to vector<8x64xf32>
    %62 = arith.negf %61 : vector<8x64xf32>
    %63 = math.exp %62 : vector<8x64xf32>
    %cst_19 = arith.constant 1.000000e+00 : f32
    %64 = vector.broadcast %cst_19 : f32 to vector<8x64xf32>
    %65 = arith.addf %64, %63 : vector<8x64xf32>
    %66 = arith.divf %64, %65 : vector<8x64xf32>
    %67 = arith.mulf %58, %34 : vector<8x64xf32>
    %68 = arith.mulf %52, %60 : vector<8x64xf32>
    %69 = arith.addf %67, %68 : vector<8x64xf32>
    %70 = math.tanh %69 : vector<8x64xf32>
    %71 = arith.mulf %66, %70 : vector<8x64xf32>
    %72 = arith.index_cast %c1_i32 : i32 to index
    %c0_20 = arith.constant 0 : index
    %c0_21 = arith.constant 0 : index
    %73 = vector.load %arg3[%72, %c0_20, %c0_21] : memref<8x8x64xf32, #tpu.memory_space<vmem>>, vector<1x8x64xf32>
    %74 = vector.shape_cast %73 : vector<1x8x64xf32> to vector<8x64xf32>
    %75 = vector.shape_cast %71 : vector<8x64xf32> to vector<1x8x64xf32>
    tpu.vector_store %arg3[%72, %c0_20, %c0_21], %75 {strides = array<i32>} : memref<8x8x64xf32, #tpu.memory_space<vmem>>, vector<1x8x64xf32>,
    %c2_i32 = arith.constant 2 : i32
    %76 = arith.index_cast %c2_i32 : i32 to index
    %c0_22 = arith.constant 0 : index
    %c0_23 = arith.constant 0 : index
    %77 = vector.load %arg1[%76, %c0_22, %c0_23] : memref<8x8x256xf32, #tpu.memory_space<vmem>>, vector<1x8x256xf32>
    %78 = vector.shape_cast %77 : vector<1x8x256xf32> to vector<8x256xf32>
    %79 = arith.truncf %71 : vector<8x64xf32> to vector<8x64xbf16>
    %cst_24 = arith.constant dense<0.000000e+00> : vector<8x256xf32>
    %80 = tpu.matmul %79, %3, %cst_24 {dimension_numbers = #tpu.dot_dimension_numbers<[1], [0], [0], [1], [0, 0, 1, 1], [], []>} : vector<8x64xbf16>, vector<64x256xbf16>, vector<8x256xf32> -> vector<8x256xf32>
    %81 = arith.addf %78, %80 : vector<8x256xf32>
    %82 = vector.extract_strided_slice %81 {offsets = [0, 0], sizes = [8, 64], strides = [1, 1]} : vector<8x256xf32> to vector<8x64xf32>
    %83 = arith.negf %82 : vector<8x64xf32>
    %84 = math.exp %83 : vector<8x64xf32>
    %cst_25 = arith.constant 1.000000e+00 : f32
    %85 = vector.broadcast %cst_25 : f32 to vector<8x64xf32>
    %86 = arith.addf %85, %84 : vector<8x64xf32>
    %87 = arith.divf %85, %86 : vector<8x64xf32>
    %88 = vector.extract_strided_slice %81 {offsets = [0, 64], sizes = [8, 64], strides = [1, 1]} : vector<8x256xf32> to vector<8x64xf32>
    %89 = arith.negf %88 : vector<8x64xf32>
    %90 = math.exp %89 : vector<8x64xf32>
    %cst_26 = arith.constant 1.000000e+00 : f32
    %91 = vector.broadcast %cst_26 : f32 to vector<8x64xf32>
    %92 = arith.addf %91, %90 : vector<8x64xf32>
    %93 = arith.divf %91, %92 : vector<8x64xf32>
    %94 = vector.extract_strided_slice %81 {offsets = [0, 128], sizes = [8, 64], strides = [1, 1]} : vector<8x256xf32> to vector<8x64xf32>
    %95 = math.tanh %94 : vector<8x64xf32>
    %96 = vector.extract_strided_slice %81 {offsets = [0, 192], sizes = [8, 64], strides = [1, 1]} : vector<8x256xf32> to vector<8x64xf32>
    %97 = arith.negf %96 : vector<8x64xf32>
    %98 = math.exp %97 : vector<8x64xf32>
    %cst_27 = arith.constant 1.000000e+00 : f32
    %99 = vector.broadcast %cst_27 : f32 to vector<8x64xf32>
    %100 = arith.addf %99, %98 : vector<8x64xf32>
    %101 = arith.divf %99, %100 : vector<8x64xf32>
    %102 = arith.mulf %93, %69 : vector<8x64xf32>
    %103 = arith.mulf %87, %95 : vector<8x64xf32>
    %104 = arith.addf %102, %103 : vector<8x64xf32>
    %105 = math.tanh %104 : vector<8x64xf32>
    %106 = arith.mulf %101, %105 : vector<8x64xf32>
    %107 = arith.index_cast %c2_i32 : i32 to index
    %c0_28 = arith.constant 0 : index
    %c0_29 = arith.constant 0 : index
    %108 = vector.load %arg3[%107, %c0_28, %c0_29] : memref<8x8x64xf32, #tpu.memory_space<vmem>>, vector<1x8x64xf32>
    %109 = vector.shape_cast %108 : vector<1x8x64xf32> to vector<8x64xf32>
    %110 = vector.shape_cast %106 : vector<8x64xf32> to vector<1x8x64xf32>
    tpu.vector_store %arg3[%107, %c0_28, %c0_29], %110 {strides = array<i32>} : memref<8x8x64xf32, #tpu.memory_space<vmem>>, vector<1x8x64xf32>,
    %c3_i32 = arith.constant 3 : i32
    %111 = arith.index_cast %c3_i32 : i32 to index
    %c0_30 = arith.constant 0 : index
    %c0_31 = arith.constant 0 : index
    %112 = vector.load %arg1[%111, %c0_30, %c0_31] : memref<8x8x256xf32, #tpu.memory_space<vmem>>, vector<1x8x256xf32>
    %113 = vector.shape_cast %112 : vector<1x8x256xf32> to vector<8x256xf32>
    %114 = arith.truncf %106 : vector<8x64xf32> to vector<8x64xbf16>
    %cst_32 = arith.constant dense<0.000000e+00> : vector<8x256xf32>
    %115 = tpu.matmul %114, %3, %cst_32 {dimension_numbers = #tpu.dot_dimension_numbers<[1], [0], [0], [1], [0, 0, 1, 1], [], []>} : vector<8x64xbf16>, vector<64x256xbf16>, vector<8x256xf32> -> vector<8x256xf32>
    %116 = arith.addf %113, %115 : vector<8x256xf32>
    %117 = vector.extract_strided_slice %116 {offsets = [0, 0], sizes = [8, 64], strides = [1, 1]} : vector<8x256xf32> to vector<8x64xf32>
    %118 = arith.negf %117 : vector<8x64xf32>
    %119 = math.exp %118 : vector<8x64xf32>
    %cst_33 = arith.constant 1.000000e+00 : f32
    %120 = vector.broadcast %cst_33 : f32 to vector<8x64xf32>
    %121 = arith.addf %120, %119 : vector<8x64xf32>
    %122 = arith.divf %120, %121 : vector<8x64xf32>
    %123 = vector.extract_strided_slice %116 {offsets = [0, 64], sizes = [8, 64], strides = [1, 1]} : vector<8x256xf32> to vector<8x64xf32>
    %124 = arith.negf %123 : vector<8x64xf32>
    %125 = math.exp %124 : vector<8x64xf32>
    %cst_34 = arith.constant 1.000000e+00 : f32
    %126 = vector.broadcast %cst_34 : f32 to vector<8x64xf32>
    %127 = arith.addf %126, %125 : vector<8x64xf32>
    %128 = arith.divf %126, %127 : vector<8x64xf32>
    %129 = vector.extract_strided_slice %116 {offsets = [0, 128], sizes = [8, 64], strides = [1, 1]} : vector<8x256xf32> to vector<8x64xf32>
    %130 = math.tanh %129 : vector<8x64xf32>
    %131 = vector.extract_strided_slice %116 {offsets = [0, 192], sizes = [8, 64], strides = [1, 1]} : vector<8x256xf32> to vector<8x64xf32>
    %132 = arith.negf %131 : vector<8x64xf32>
    %133 = math.exp %132 : vector<8x64xf32>
    %cst_35 = arith.constant 1.000000e+00 : f32
    %134 = vector.broadcast %cst_35 : f32 to vector<8x64xf32>
    %135 = arith.addf %134, %133 : vector<8x64xf32>
    %136 = arith.divf %134, %135 : vector<8x64xf32>
    %137 = arith.mulf %128, %104 : vector<8x64xf32>
    %138 = arith.mulf %122, %130 : vector<8x64xf32>
    %139 = arith.addf %137, %138 : vector<8x64xf32>
    %140 = math.tanh %139 : vector<8x64xf32>
    %141 = arith.mulf %136, %140 : vector<8x64xf32>
    %142 = arith.index_cast %c3_i32 : i32 to index
    %c0_36 = arith.constant 0 : index
    %c0_37 = arith.constant 0 : index
    %143 = vector.load %arg3[%142, %c0_36, %c0_37] : memref<8x8x64xf32, #tpu.memory_space<vmem>>, vector<1x8x64xf32>
    %144 = vector.shape_cast %143 : vector<1x8x64xf32> to vector<8x64xf32>
    %145 = vector.shape_cast %141 : vector<8x64xf32> to vector<1x8x64xf32>
    tpu.vector_store %arg3[%142, %c0_36, %c0_37], %145 {strides = array<i32>} : memref<8x8x64xf32, #tpu.memory_space<vmem>>, vector<1x8x64xf32>,
    %c4_i32 = arith.constant 4 : i32
    %146 = arith.index_cast %c4_i32 : i32 to index
    %c0_38 = arith.constant 0 : index
    %c0_39 = arith.constant 0 : index
    %147 = vector.load %arg1[%146, %c0_38, %c0_39] : memref<8x8x256xf32, #tpu.memory_space<vmem>>, vector<1x8x256xf32>
    %148 = vector.shape_cast %147 : vector<1x8x256xf32> to vector<8x256xf32>
    %149 = arith.truncf %141 : vector<8x64xf32> to vector<8x64xbf16>
    %cst_40 = arith.constant dense<0.000000e+00> : vector<8x256xf32>
    %150 = tpu.matmul %149, %3, %cst_40 {dimension_numbers = #tpu.dot_dimension_numbers<[1], [0], [0], [1], [0, 0, 1, 1], [], []>} : vector<8x64xbf16>, vector<64x256xbf16>, vector<8x256xf32> -> vector<8x256xf32>
    %151 = arith.addf %148, %150 : vector<8x256xf32>
    %152 = vector.extract_strided_slice %151 {offsets = [0, 0], sizes = [8, 64], strides = [1, 1]} : vector<8x256xf32> to vector<8x64xf32>
    %153 = arith.negf %152 : vector<8x64xf32>
    %154 = math.exp %153 : vector<8x64xf32>
    %cst_41 = arith.constant 1.000000e+00 : f32
    %155 = vector.broadcast %cst_41 : f32 to vector<8x64xf32>
    %156 = arith.addf %155, %154 : vector<8x64xf32>
    %157 = arith.divf %155, %156 : vector<8x64xf32>
    %158 = vector.extract_strided_slice %151 {offsets = [0, 64], sizes = [8, 64], strides = [1, 1]} : vector<8x256xf32> to vector<8x64xf32>
    %159 = arith.negf %158 : vector<8x64xf32>
    %160 = math.exp %159 : vector<8x64xf32>
    %cst_42 = arith.constant 1.000000e+00 : f32
    %161 = vector.broadcast %cst_42 : f32 to vector<8x64xf32>
    %162 = arith.addf %161, %160 : vector<8x64xf32>
    %163 = arith.divf %161, %162 : vector<8x64xf32>
    %164 = vector.extract_strided_slice %151 {offsets = [0, 128], sizes = [8, 64], strides = [1, 1]} : vector<8x256xf32> to vector<8x64xf32>
    %165 = math.tanh %164 : vector<8x64xf32>
    %166 = vector.extract_strided_slice %151 {offsets = [0, 192], sizes = [8, 64], strides = [1, 1]} : vector<8x256xf32> to vector<8x64xf32>
    %167 = arith.negf %166 : vector<8x64xf32>
    %168 = math.exp %167 : vector<8x64xf32>
    %cst_43 = arith.constant 1.000000e+00 : f32
    %169 = vector.broadcast %cst_43 : f32 to vector<8x64xf32>
    %170 = arith.addf %169, %168 : vector<8x64xf32>
    %171 = arith.divf %169, %170 : vector<8x64xf32>
    %172 = arith.mulf %163, %139 : vector<8x64xf32>
    %173 = arith.mulf %157, %165 : vector<8x64xf32>
    %174 = arith.addf %172, %173 : vector<8x64xf32>
    %175 = math.tanh %174 : vector<8x64xf32>
    %176 = arith.mulf %171, %175 : vector<8x64xf32>
    %177 = arith.index_cast %c4_i32 : i32 to index
    %c0_44 = arith.constant 0 : index
    %c0_45 = arith.constant 0 : index
    %178 = vector.load %arg3[%177, %c0_44, %c0_45] : memref<8x8x64xf32, #tpu.memory_space<vmem>>, vector<1x8x64xf32>
    %179 = vector.shape_cast %178 : vector<1x8x64xf32> to vector<8x64xf32>
    %180 = vector.shape_cast %176 : vector<8x64xf32> to vector<1x8x64xf32>
    tpu.vector_store %arg3[%177, %c0_44, %c0_45], %180 {strides = array<i32>} : memref<8x8x64xf32, #tpu.memory_space<vmem>>, vector<1x8x64xf32>,
    %c5_i32 = arith.constant 5 : i32
    %181 = arith.index_cast %c5_i32 : i32 to index
    %c0_46 = arith.constant 0 : index
    %c0_47 = arith.constant 0 : index
    %182 = vector.load %arg1[%181, %c0_46, %c0_47] : memref<8x8x256xf32, #tpu.memory_space<vmem>>, vector<1x8x256xf32>
    %183 = vector.shape_cast %182 : vector<1x8x256xf32> to vector<8x256xf32>
    %184 = arith.truncf %176 : vector<8x64xf32> to vector<8x64xbf16>
    %cst_48 = arith.constant dense<0.000000e+00> : vector<8x256xf32>
    %185 = tpu.matmul %184, %3, %cst_48 {dimension_numbers = #tpu.dot_dimension_numbers<[1], [0], [0], [1], [0, 0, 1, 1], [], []>} : vector<8x64xbf16>, vector<64x256xbf16>, vector<8x256xf32> -> vector<8x256xf32>
    %186 = arith.addf %183, %185 : vector<8x256xf32>
    %187 = vector.extract_strided_slice %186 {offsets = [0, 0], sizes = [8, 64], strides = [1, 1]} : vector<8x256xf32> to vector<8x64xf32>
    %188 = arith.negf %187 : vector<8x64xf32>
    %189 = math.exp %188 : vector<8x64xf32>
    %cst_49 = arith.constant 1.000000e+00 : f32
    %190 = vector.broadcast %cst_49 : f32 to vector<8x64xf32>
    %191 = arith.addf %190, %189 : vector<8x64xf32>
    %192 = arith.divf %190, %191 : vector<8x64xf32>
    %193 = vector.extract_strided_slice %186 {offsets = [0, 64], sizes = [8, 64], strides = [1, 1]} : vector<8x256xf32> to vector<8x64xf32>
    %194 = arith.negf %193 : vector<8x64xf32>
    %195 = math.exp %194 : vector<8x64xf32>
    %cst_50 = arith.constant 1.000000e+00 : f32
    %196 = vector.broadcast %cst_50 : f32 to vector<8x64xf32>
    %197 = arith.addf %196, %195 : vector<8x64xf32>
    %198 = arith.divf %196, %197 : vector<8x64xf32>
    %199 = vector.extract_strided_slice %186 {offsets = [0, 128], sizes = [8, 64], strides = [1, 1]} : vector<8x256xf32> to vector<8x64xf32>
    %200 = math.tanh %199 : vector<8x64xf32>
    %201 = vector.extract_strided_slice %186 {offsets = [0, 192], sizes = [8, 64], strides = [1, 1]} : vector<8x256xf32> to vector<8x64xf32>
    %202 = arith.negf %201 : vector<8x64xf32>
    %203 = math.exp %202 : vector<8x64xf32>
    %cst_51 = arith.constant 1.000000e+00 : f32
    %204 = vector.broadcast %cst_51 : f32 to vector<8x64xf32>
    %205 = arith.addf %204, %203 : vector<8x64xf32>
    %206 = arith.divf %204, %205 : vector<8x64xf32>
    %207 = arith.mulf %198, %174 : vector<8x64xf32>
    %208 = arith.mulf %192, %200 : vector<8x64xf32>
    %209 = arith.addf %207, %208 : vector<8x64xf32>
    %210 = math.tanh %209 : vector<8x64xf32>
    %211 = arith.mulf %206, %210 : vector<8x64xf32>
    %212 = arith.index_cast %c5_i32 : i32 to index
    %c0_52 = arith.constant 0 : index
    %c0_53 = arith.constant 0 : index
    %213 = vector.load %arg3[%212, %c0_52, %c0_53] : memref<8x8x64xf32, #tpu.memory_space<vmem>>, vector<1x8x64xf32>
    %214 = vector.shape_cast %213 : vector<1x8x64xf32> to vector<8x64xf32>
    %215 = vector.shape_cast %211 : vector<8x64xf32> to vector<1x8x64xf32>
    tpu.vector_store %arg3[%212, %c0_52, %c0_53], %215 {strides = array<i32>} : memref<8x8x64xf32, #tpu.memory_space<vmem>>, vector<1x8x64xf32>,
    %c6_i32 = arith.constant 6 : i32
    %216 = arith.index_cast %c6_i32 : i32 to index
    %c0_54 = arith.constant 0 : index
    %c0_55 = arith.constant 0 : index
    %217 = vector.load %arg1[%216, %c0_54, %c0_55] : memref<8x8x256xf32, #tpu.memory_space<vmem>>, vector<1x8x256xf32>
    %218 = vector.shape_cast %217 : vector<1x8x256xf32> to vector<8x256xf32>
    %219 = arith.truncf %211 : vector<8x64xf32> to vector<8x64xbf16>
    %cst_56 = arith.constant dense<0.000000e+00> : vector<8x256xf32>
    %220 = tpu.matmul %219, %3, %cst_56 {dimension_numbers = #tpu.dot_dimension_numbers<[1], [0], [0], [1], [0, 0, 1, 1], [], []>} : vector<8x64xbf16>, vector<64x256xbf16>, vector<8x256xf32> -> vector<8x256xf32>
    %221 = arith.addf %218, %220 : vector<8x256xf32>
    %222 = vector.extract_strided_slice %221 {offsets = [0, 0], sizes = [8, 64], strides = [1, 1]} : vector<8x256xf32> to vector<8x64xf32>
    %223 = arith.negf %222 : vector<8x64xf32>
    %224 = math.exp %223 : vector<8x64xf32>
    %cst_57 = arith.constant 1.000000e+00 : f32
    %225 = vector.broadcast %cst_57 : f32 to vector<8x64xf32>
    %226 = arith.addf %225, %224 : vector<8x64xf32>
    %227 = arith.divf %225, %226 : vector<8x64xf32>
    %228 = vector.extract_strided_slice %221 {offsets = [0, 64], sizes = [8, 64], strides = [1, 1]} : vector<8x256xf32> to vector<8x64xf32>
    %229 = arith.negf %228 : vector<8x64xf32>
    %230 = math.exp %229 : vector<8x64xf32>
    %cst_58 = arith.constant 1.000000e+00 : f32
    %231 = vector.broadcast %cst_58 : f32 to vector<8x64xf32>
    %232 = arith.addf %231, %230 : vector<8x64xf32>
    %233 = arith.divf %231, %232 : vector<8x64xf32>
    %234 = vector.extract_strided_slice %221 {offsets = [0, 128], sizes = [8, 64], strides = [1, 1]} : vector<8x256xf32> to vector<8x64xf32>
    %235 = math.tanh %234 : vector<8x64xf32>
    %236 = vector.extract_strided_slice %221 {offsets = [0, 192], sizes = [8, 64], strides = [1, 1]} : vector<8x256xf32> to vector<8x64xf32>
    %237 = arith.negf %236 : vector<8x64xf32>
    %238 = math.exp %237 : vector<8x64xf32>
    %cst_59 = arith.constant 1.000000e+00 : f32
    %239 = vector.broadcast %cst_59 : f32 to vector<8x64xf32>
    %240 = arith.addf %239, %238 : vector<8x64xf32>
    %241 = arith.divf %239, %240 : vector<8x64xf32>
    %242 = arith.mulf %233, %209 : vector<8x64xf32>
    %243 = arith.mulf %227, %235 : vector<8x64xf32>
    %244 = arith.addf %242, %243 : vector<8x64xf32>
    %245 = math.tanh %244 : vector<8x64xf32>
    %246 = arith.mulf %241, %245 : vector<8x64xf32>
    %247 = arith.index_cast %c6_i32 : i32 to index
    %c0_60 = arith.constant 0 : index
    %c0_61 = arith.constant 0 : index
    %248 = vector.load %arg3[%247, %c0_60, %c0_61] : memref<8x8x64xf32, #tpu.memory_space<vmem>>, vector<1x8x64xf32>
    %249 = vector.shape_cast %248 : vector<1x8x64xf32> to vector<8x64xf32>
    %250 = vector.shape_cast %246 : vector<8x64xf32> to vector<1x8x64xf32>
    tpu.vector_store %arg3[%247, %c0_60, %c0_61], %250 {strides = array<i32>} : memref<8x8x64xf32, #tpu.memory_space<vmem>>, vector<1x8x64xf32>,
    %c7_i32 = arith.constant 7 : i32
    %251 = arith.index_cast %c7_i32 : i32 to index
    %c0_62 = arith.constant 0 : index
    %c0_63 = arith.constant 0 : index
    %252 = vector.load %arg1[%251, %c0_62, %c0_63] : memref<8x8x256xf32, #tpu.memory_space<vmem>>, vector<1x8x256xf32>
    %253 = vector.shape_cast %252 : vector<1x8x256xf32> to vector<8x256xf32>
    %254 = arith.truncf %246 : vector<8x64xf32> to vector<8x64xbf16>
    %cst_64 = arith.constant dense<0.000000e+00> : vector<8x256xf32>
    %255 = tpu.matmul %254, %3, %cst_64 {dimension_numbers = #tpu.dot_dimension_numbers<[1], [0], [0], [1], [0, 0, 1, 1], [], []>} : vector<8x64xbf16>, vector<64x256xbf16>, vector<8x256xf32> -> vector<8x256xf32>
    %256 = arith.addf %253, %255 : vector<8x256xf32>
    %257 = vector.extract_strided_slice %256 {offsets = [0, 0], sizes = [8, 64], strides = [1, 1]} : vector<8x256xf32> to vector<8x64xf32>
    %258 = arith.negf %257 : vector<8x64xf32>
    %259 = math.exp %258 : vector<8x64xf32>
    %cst_65 = arith.constant 1.000000e+00 : f32
    %260 = vector.broadcast %cst_65 : f32 to vector<8x64xf32>
    %261 = arith.addf %260, %259 : vector<8x64xf32>
    %262 = arith.divf %260, %261 : vector<8x64xf32>
    %263 = vector.extract_strided_slice %256 {offsets = [0, 64], sizes = [8, 64], strides = [1, 1]} : vector<8x256xf32> to vector<8x64xf32>
    %264 = arith.negf %263 : vector<8x64xf32>
    %265 = math.exp %264 : vector<8x64xf32>
    %cst_66 = arith.constant 1.000000e+00 : f32
    %266 = vector.broadcast %cst_66 : f32 to vector<8x64xf32>
    %267 = arith.addf %266, %265 : vector<8x64xf32>
    %268 = arith.divf %266, %267 : vector<8x64xf32>
    %269 = vector.extract_strided_slice %256 {offsets = [0, 128], sizes = [8, 64], strides = [1, 1]} : vector<8x256xf32> to vector<8x64xf32>
    %270 = math.tanh %269 : vector<8x64xf32>
    %271 = vector.extract_strided_slice %256 {offsets = [0, 192], sizes = [8, 64], strides = [1, 1]} : vector<8x256xf32> to vector<8x64xf32>
    %272 = arith.negf %271 : vector<8x64xf32>
    %273 = math.exp %272 : vector<8x64xf32>
    %cst_67 = arith.constant 1.000000e+00 : f32
    %274 = vector.broadcast %cst_67 : f32 to vector<8x64xf32>
    %275 = arith.addf %274, %273 : vector<8x64xf32>
    %276 = arith.divf %274, %275 : vector<8x64xf32>
    %277 = arith.mulf %268, %244 : vector<8x64xf32>
    %278 = arith.mulf %262, %270 : vector<8x64xf32>
    %279 = arith.addf %277, %278 : vector<8x64xf32>
    %280 = math.tanh %279 : vector<8x64xf32>
    %281 = arith.mulf %276, %280 : vector<8x64xf32>
    %282 = arith.index_cast %c7_i32 : i32 to index
    %c0_68 = arith.constant 0 : index
    %c0_69 = arith.constant 0 : index
    %283 = vector.load %arg3[%282, %c0_68, %c0_69] : memref<8x8x64xf32, #tpu.memory_space<vmem>>, vector<1x8x64xf32>
    %284 = vector.shape_cast %283 : vector<1x8x64xf32> to vector<8x64xf32>
    %285 = vector.shape_cast %281 : vector<8x64xf32> to vector<1x8x64xf32>
    tpu.vector_store %arg3[%282, %c0_68, %c0_69], %285 {strides = array<i32>} : memref<8x8x64xf32, #tpu.memory_space<vmem>>, vector<1x8x64xf32>,
    %c8_i32 = arith.constant 8 : i32
    %c0_70 = arith.constant 0 : index
    %c0_71 = arith.constant 0 : index
    %286 = vector.load %arg4[%c0_70, %c0_71] : memref<8x64xf32, #tpu.memory_space<vmem>>, vector<8x64xf32>
    tpu.vector_store %arg4[%c0_70, %c0_71], %281 {strides = array<i32>} : memref<8x64xf32, #tpu.memory_space<vmem>>, vector<8x64xf32>,
    %c0_72 = arith.constant 0 : index
    %c0_73 = arith.constant 0 : index
    %287 = vector.load %arg5[%c0_72, %c0_73] : memref<8x64xf32, #tpu.memory_space<vmem>>, vector<8x64xf32>
    tpu.vector_store %arg5[%c0_72, %c0_73], %279 {strides = array<i32>} : memref<8x64xf32, #tpu.memory_space<vmem>>, vector<8x64xf32>,
    return
  }
  func.func @transform_0(%arg0: i32) -> (i32, i32, i32) {
    %c0_i32 = arith.constant 0 : i32
    %c0_i32_0 = arith.constant 0 : i32
    %c0_i32_1 = arith.constant 0 : i32
    return %arg0, %c0_i32, %c0_i32_0 : i32, i32, i32
  }
  func.func @transform_1(%arg0: i32) -> (i32, i32) {
    %c0_i32 = arith.constant 0 : i32
    %c0_i32_0 = arith.constant 0 : i32
    %c0_i32_1 = arith.constant 0 : i32
    return %c0_i32, %c0_i32_0 : i32, i32
  }
  func.func @transform_2(%arg0: i32) -> (i32, i32, i32) {
    %c0_i32 = arith.constant 0 : i32
    %c0_i32_0 = arith.constant 0 : i32
    %c0_i32_1 = arith.constant 0 : i32
    return %arg0, %c0_i32, %c0_i32_0 : i32, i32, i32
  }
}

module attributes {stable_mosaic.version = 11 : i64} {
  func.func @_matmul_kernel(%arg0: i32, %arg1: memref<8x512xf32, #tpu.memory_space<vmem>>, %arg2: memref<512x3xbf16, #tpu.memory_space<vmem>>, %arg3: memref<1x3xf32, #tpu.memory_space<vmem>>, %arg4: memref<8x3xf32, #tpu.memory_space<vmem>>) attributes {dimension_semantics = [#tpu.dimension_semantics<parallel>], iteration_bounds = array<i64: 1>, scalar_prefetch = 0 : i64, scratch_operands = 0 : i64, tpu.core_type = #tpu.core_type<tc>, window_params = [{transform_indices = @transform_0, window_bounds = array<i64: 8, 512>}, {pipeline_mode = #tpu.pipeline_mode<synchronous>, transform_indices = @transform_1, window_bounds = array<i64: 512, 3>}, {pipeline_mode = #tpu.pipeline_mode<synchronous>, transform_indices = @transform_2, window_bounds = array<i64: 1, 3>}, {transform_indices = @transform_3, window_bounds = array<i64: 8, 3>}]} {
    %c0 = arith.constant 0 : index
    %c0_0 = arith.constant 0 : index
    %0 = vector.load %arg1[%c0, %c0_0] : memref<8x512xf32, #tpu.memory_space<vmem>>, vector<8x512xf32>
    %1 = arith.truncf %0 : vector<8x512xf32> to vector<8x512xbf16>
    %c0_1 = arith.constant 0 : index
    %c0_2 = arith.constant 0 : index
    %2 = vector.load %arg2[%c0_1, %c0_2] : memref<512x3xbf16, #tpu.memory_space<vmem>>, vector<512x3xbf16>
    %cst = arith.constant dense<0.000000e+00> : vector<8x3xf32>
    %3 = tpu.matmul %1, %2, %cst {dimension_numbers = #tpu.dot_dimension_numbers<[1], [0], [0], [1], [0, 0, 1, 1], [], []>} : vector<8x512xbf16>, vector<512x3xbf16>, vector<8x3xf32> -> vector<8x3xf32>
    %c0_3 = arith.constant 0 : index
    %c0_4 = arith.constant 0 : index
    %4 = vector.load %arg3[%c0_3, %c0_4] : memref<1x3xf32, #tpu.memory_space<vmem>>, vector<1x3xf32>
    %5 = vector.broadcast %4 : vector<1x3xf32> to vector<8x3xf32>
    %6 = arith.addf %3, %5 : vector<8x3xf32>
    %c0_5 = arith.constant 0 : index
    %c0_6 = arith.constant 0 : index
    %7 = vector.load %arg4[%c0_5, %c0_6] : memref<8x3xf32, #tpu.memory_space<vmem>>, vector<8x3xf32>
    tpu.vector_store %arg4[%c0_5, %c0_6], %6 {strides = array<i32>} : memref<8x3xf32, #tpu.memory_space<vmem>>, vector<8x3xf32>,
    return
  }
  func.func @transform_0(%arg0: i32) -> (i32, i32) {
    %c0_i32 = arith.constant 0 : i32
    %c0_i32_0 = arith.constant 0 : i32
    return %arg0, %c0_i32 : i32, i32
  }
  func.func @transform_1(%arg0: i32) -> (i32, i32) {
    %c0_i32 = arith.constant 0 : i32
    %c0_i32_0 = arith.constant 0 : i32
    %c0_i32_1 = arith.constant 0 : i32
    return %c0_i32, %c0_i32_0 : i32, i32
  }
  func.func @transform_2(%arg0: i32) -> (i32, i32) {
    %c0_i32 = arith.constant 0 : i32
    %c0_i32_0 = arith.constant 0 : i32
    %c0_i32_1 = arith.constant 0 : i32
    return %c0_i32, %c0_i32_0 : i32, i32
  }
  func.func @transform_3(%arg0: i32) -> (i32, i32) {
    %c0_i32 = arith.constant 0 : i32
    %c0_i32_0 = arith.constant 0 : i32
    return %arg0, %c0_i32 : i32, i32
  }
}

</mosaic_0001>

<bundles_post_ra>
// kernel: stgcn_forward.21
= control target key start
LH: loop header
LB: loop body
LE: loop exit
PB: predicated region body
PF: predicated region fallthrough
CT: control target
= control target key end

     0   :  { %s299_s9 = smov 0   ;;  %s319_s0 = inlined_call_operand.vmem [shape: bf16[4,4], index: 0, kind: input, shape index: {}]   ;;  %s320_s1 = inlined_call_operand.vmem [shape: f32[2,4,128], index: 1, kind: input, shape index: {}]   ;;  %s321_s2 = inlined_call_operand.vmem [shape: f32[2,4,128], index: 2, kind: output, shape index: {}]  }
   0x1 LB: > { %s246_s10 = sadd.s32 4294967295, %s280_s9   ;;  %p250_p0 = scmp.ge.s32.totalorder %s280_s9, 1  ;;  %s280_s9 = sphi %s299_s9, %s12_s9  }
   0x2   : > { %p111_p1 = scmp.lt.s32.totalorder %s280_s9, 3 }
   0x4   : > { %p112_p2 = pnand %p250_p0, %p111_p1 }
   0x5   : > { %p131_p3 = scmp.lt.s32.totalorder (!%p112_p2), %s246_s10, 1 }
   0x6   : > { %115 = sbr.rel (%p112_p2) target bundleno = 220 (0xdc), region = 28 }
   0xb   : > { %v282_v0 = vmov 0.0   ;;  %vm283_vm0 = vmmov 0   ;;  %s323_s10 = smov (!%p131_p3, %s246_s10), 1  ;;  %vm147_vm1 = vcmask 1041408   ;;  %v140_v4 = vld [vmem:[%s319_s0] sm:$0x3] }
   0xc   : > { %258 = vmatprep.subr.bf16.mxu0 %v282_v0  ;;  %260 = vmatprep.mubr.msk.bf16.mxu0 %vm283_vm0, %v282_v0  ;;  %s251_s11 = sshll.u32 %s323_s10, 2  ;;  %vm143_vm2 = vcmask 31744  }
   0xd   : > { %s134_s14 = scalar_lea.vmem %s320_s1, %s251_s11  ;;  %s138_s19 = scalar_lea.vmem %s321_s2, %s251_s11 }
   0xe   : > { %v141_v1 = vld [vmem:[%s134_s14] sm:$0xf] }
   0xf   : > { %v142_v2 = vpack.c.bf16 %v141_v1, %v141_v1 }
  0x11   : > { %v149_v3 = vsel %vm147_vm1, %v142_v2, 0 }
  0x12   : > { %259 = vmatpush3.bf16.msra.mxu0 %v149_v3 }
  0x15   : > { %261 = vmatmul.mubr.msk.bf16.vlgmr.msra.gmra.mxu0 %vm143_vm2, %v140_v4 }
  0xd5   : > { %v185_v5 = vpop.f32.mrf.mxu0 }
  0xd6   : > { %v191_v6 = vmax.f32 %v185_v5, 0.0 }
  0xd7   : > { %v262_v7 = vpop.f32.mrf.mxu0 }
  0xd8   : > { %192 = vst [vmem:[%s138_s19] sm:$0xf] %v191_v6 }
  0xd9   : > { %v188_v8 = vpop.f32.mrf.mxu0 }
  0xdb   : > { %v263_v9 = vpop.f32.mrf.mxu0 }
  0xdc PF: > { %s12_s9 = sadd.s32 1, %s280_s9  }
  0xdd   : > { %p9_p4 = scmp.ge.s32.totalorder %s12_s9, 4  }
  0xdf   :  { %11 = sbr.rel (!%p9_p4) target bundleno = 1 (0x1), region = 58 }

// kernel: stgcn_forward.23
= control target key start
LH: loop header
LB: loop body
LE: loop exit
PB: predicated region body
PF: predicated region fallthrough
CT: control target
= control target key end

     0   :  { %vm22_vm0 = vcmask 523264   ;;  %v342_v16 = vmov 0   ;;  %s539_s0 = inlined_call_operand.vmem [shape: f32[2,4,8,64], index: 0, kind: input, shape index: {}]   ;;  %s540_s1 = inlined_call_operand.vmem [shape: f32[1,4,1,1], index: 1, kind: input, shape index: {}]   ;;  %s541_s2 = inlined_call_operand.vmem [shape: f32[1,4,1,1], index: 2, kind: input, shape index: {}]   ;;  %s542_s3 = inlined_call_operand.vmem [shape: f32[2,4,8,64], index: 3, kind: output, shape index: {}]  }
   0x1   :  { %v366_v0 = vld [vmem:[%s539_s0 + $0x10] sm:$0xff]  ;;  %v371_v1 = vld [vmem:[%s539_s0] sm:$0xff]  ;;  %v376_v2 = vld [vmem:[%s539_s0 + $0x18] sm:$0xff]  ;;  %333 = vset.pattern.permute.xlu1 %v342_v16  ;;  %332 = vset.pattern.permute.xlu0 %v342_v16 }
   0x2   :  { %v29_v3 = vsel %vm22_vm0, %v366_v0, 0.0  ;;  %v23_v4 = vsel %vm22_vm0, %v371_v1, 0.0  ;;  %v385_v5 = vld [vmem:[%s539_s0 + $0x8] sm:$0xff]  ;;  %v32_v6 = vsel %vm22_vm0, %v376_v2, 0.0  ;;  %v399_v9 = vld [vmem:[%s539_s0 + $0x20] sm:$0xff]  ;;  %v408_v12 = vld [vmem:[%s539_s0 + $0x38] sm:$0xff] }
   0x3   :  { %30 = vadd.xlane.f32.xlu1 %v29_v3  ;;  %24 = vadd.xlane.f32.xlu0 %v23_v4  ;;  %v26_v7 = vsel %vm22_vm0, %v385_v5, 0.0  ;;  %v394_v8 = vld [vmem:[%s539_s0 + $0x28] sm:$0xff]  ;;  %v35_v11 = vsel %vm22_vm0, %v399_v9, 0.0  ;;  %v413_v13 = vld [vmem:[%s539_s0 + $0x30] sm:$0xff]  ;;  %v44_v14 = vsel %vm22_vm0, %v408_v12, 0.0 }
   0x4   :  { %v38_v10 = vsel %vm22_vm0, %v394_v8, 0.0  ;;  %v41_v15 = vsel %vm22_vm0, %v413_v13, 0.0 }
   0x7   :  { %33 = vadd.xlane.f32.xlu1 %v32_v6  ;;  %27 = vadd.xlane.f32.xlu0 %v26_v7 }
   0xb   :  { %39 = vadd.xlane.f32.xlu1 %v38_v10  ;;  %36 = vadd.xlane.f32.xlu0 %v35_v11 }
   0xf   :  { %45 = vadd.xlane.f32.xlu1 %v44_v14  ;;  %42 = vadd.xlane.f32.xlu0 %v41_v15 }
  0x8c   :  { %v31_v17 = vpop.xlane.xlu1 %30  ;;  %v25_v18 = vpop.xlane.xlu0 %24 }
  0x8d   :  { %v47_v19 = vrot.slane %v25_v18, 4  ;;  %v59_v20 = vrot.slane %v31_v17, 4 }
  0x8f   :  { %v48_v21 = vadd.f32 %v47_v19, %v25_v18  ;;  %v60_v26 = vadd.f32 %v59_v20, %v31_v17 }
  0x90   :  { %v34_v22 = vpop.xlane.xlu1 %33  ;;  %v28_v23 = vpop.xlane.xlu0 %27 }
  0x91   :  { %v65_v24 = vrot.slane %v34_v22, 4  ;;  %v53_v25 = vrot.slane %v28_v23, 4  ;;  %v49_v29 = vrot.slane %v48_v21, 2  ;;  %v61_v35 = vrot.slane %v60_v26, 2 }
  0x93   :  { %v66_v27 = vadd.f32 %v65_v24, %v34_v22  ;;  %v54_v28 = vadd.f32 %v53_v25, %v28_v23  ;;  %v50_v37 = vadd.f32 %v49_v29, %v48_v21  ;;  %v62_v47 = vadd.f32 %v61_v35, %v60_v26 }
  0x94   :  { %v40_v30 = vpop.xlane.xlu1 %39  ;;  %v37_v31 = vpop.xlane.xlu0 %36 }
  0x95   :  { %v55_v32 = vrot.slane %v54_v28, 2  ;;  %v77_v33 = vrot.slane %v40_v30, 4  ;;  %v71_v34 = vrot.slane %v37_v31, 4  ;;  %v67_v36 = vrot.slane %v66_v27, 2 }
  0x96   :  { %v51_v51 = vrot.slane %v50_v37, 1  ;;  %v63_v59 = vrot.slane %v62_v47, 1 }
  0x97   :  { %v56_v38 = vadd.f32 %v55_v32, %v54_v28  ;;  %v78_v39 = vadd.f32 %v77_v33, %v40_v30  ;;  %v72_v40 = vadd.f32 %v71_v34, %v37_v31  ;;  %v68_v48 = vadd.f32 %v67_v36, %v66_v27 }
  0x98   :  { %v46_v41 = vpop.xlane.xlu1 %45  ;;  %v43_v42 = vpop.xlane.xlu0 %42  ;;  %v52_v63 = vadd.f32 %v51_v51, %v50_v37  ;;  %v64_v15 = vadd.f32 %v63_v59, %v62_v47  ;;  %v328_v47 = vld [vmem:[%s541_s2 + $0x1] ss:$0 sm:$0xff] }
  0x99   :  { %v89_v43 = vrot.slane %v46_v41, 4  ;;  %v83_v44 = vrot.slane %v43_v42, 4  ;;  %v79_v45 = vrot.slane %v78_v39, 2  ;;  %v73_v46 = vrot.slane %v72_v40, 2 }
  0x9a   :  { %v57_v52 = vrot.slane %v56_v38, 1  ;;  %v69_v60 = vrot.slane %v68_v48, 1 }
  0x9b   :  { %v90_v49 = vadd.f32 %v89_v43, %v46_v41  ;;  %v84_v50 = vadd.f32 %v83_v44, %v43_v42  ;;  %v80_v53 = vadd.f32 %v79_v45, %v78_v39  ;;  %v74_v54 = vadd.f32 %v73_v46, %v72_v40  ;;  %v324_v40 = vld [vmem:[%s540_s1 + $0x1] ss:$0 sm:$0xff]  ;;  %v326_v41 = vld [vmem:[%s540_s1 + $0x3] ss:$0 sm:$0xff]  ;;  %v323_v42 = vld [vmem:[%s540_s1] ss:$0 sm:$0xff] }
  0x9c   :  { %v58_v3 = vadd.f32 %v57_v52, %v56_v38  ;;  %v70_v16 = vadd.f32 %v69_v60, %v68_v48  ;;  %v327_v43 = vld [vmem:[%s541_s2] ss:$0 sm:$0xff]  ;;  %v329_v48 = vld [vmem:[%s541_s2 + $0x2] ss:$0 sm:$0xff] }
  0x9d   :  { %v91_v55 = vrot.slane %v90_v49, 2  ;;  %v85_v56 = vrot.slane %v84_v50, 2  ;;  %v81_v57 = vrot.slane %v80_v53, 1  ;;  %v75_v58 = vrot.slane %v74_v54, 1 }
  0x9f   :  { %v92_v61 = vadd.f32 %v91_v55, %v90_v49  ;;  %v86_v62 = vadd.f32 %v85_v56, %v84_v50  ;;  %v82_v4 = vadd.f32 %v81_v57, %v80_v53  ;;  %v76_v6 = vadd.f32 %v75_v58, %v74_v54 }
  0xa1   :  { %v93_v7 = vrot.slane %v92_v61, 1  ;;  %v87_v10 = vrot.slane %v86_v62, 1  ;;  %v96_v11 = vadd.f32 %v82_v4, %v58_v3  ;;  %v95_v14 = vadd.f32 %v76_v6, %v52_v63 }
  0xa3   :  { %v94_v17 = vadd.f32 %v93_v7, %v92_v61  ;;  %v88_v18 = vadd.f32 %v87_v10, %v86_v62  ;;  %v100_v19 = vmul.f32 0.0009765625, %v96_v11  ;;  %v99_v20 = vmul.f32 0.0009765625, %v95_v14 }
  0xa5   :  { %v98_v21 = vadd.f32 %v94_v17, %v70_v16  ;;  %v97_v22 = vadd.f32 %v88_v18, %v64_v15  ;;  %v420_v23 = vsub.f32 %v385_v5, %v100_v19  ;;  %v423_v24 = vsub.f32 %v371_v1, %v99_v20 }
  0xa6   :  { %v438_v1 = vsub.f32 %v394_v8, %v100_v19  ;;  %v441_v32 = vsub.f32 %v399_v9, %v99_v20 }
  0xa7   :  { %v102_v25 = vmul.f32 0.0009765625, %v98_v21  ;;  %v101_v26 = vmul.f32 0.0009765625, %v97_v22  ;;  %v112_v27 = vmul.f32 %v420_v23, %v420_v23  ;;  %v111_v28 = vmul.f32 %v423_v24, %v423_v24 }
  0xa8   :  { %v116_v35 = vmul.f32 %v438_v1, %v438_v1  ;;  %v115_v8 = vmul.f32 %v441_v32, %v441_v32 }
  0xa9   :  { %v430_v29 = vsub.f32 %v376_v2, %v102_v25  ;;  %v433_v30 = vsub.f32 %v366_v0, %v101_v26  ;;  %v122_v5 = vsel %vm22_vm0, %v112_v27, 0.0  ;;  %v119_v31 = vsel %vm22_vm0, %v111_v28, 0.0 }
  0xaa   :  { %123 = vadd.xlane.f32.xlu1 %v122_v5  ;;  %120 = vadd.xlane.f32.xlu0 %v119_v31  ;;  %v454_v9 = vsub.f32 %v413_v13, %v101_v26  ;;  %v134_v36 = vsel %vm22_vm0, %v116_v35, 0.0  ;;  %v131_v37 = vsel %vm22_vm0, %v115_v8, 0.0  ;;  %v325_v13 = vld [vmem:[%s540_s1 + $0x2] ss:$0 sm:$0xff]  ;;  %v477_v44 = vsub.f32 %v408_v12, %v102_v25  ;;  %v330_v12 = vld [vmem:[%s541_s2 + $0x3] ss:$0 sm:$0xff] }
  0xab   :  { %v114_v33 = vmul.f32 %v430_v29, %v430_v29  ;;  %v113_v2 = vmul.f32 %v433_v30, %v433_v30 }
  0xac   :  { %v117_v38 = vmul.f32 %v454_v9, %v454_v9  ;;  %v118_v45 = vmul.f32 %v477_v44, %v477_v44 }
  0xad   :  { %v128_v0 = vsel %vm22_vm0, %v114_v33, 0.0  ;;  %v125_v34 = vsel %vm22_vm0, %v113_v2, 0.0 }
  0xae   :  { %129 = vadd.xlane.f32.xlu1 %v128_v0  ;;  %126 = vadd.xlane.f32.xlu0 %v125_v34  ;;  %v137_v39 = vsel %vm22_vm0, %v117_v38, 0.0  ;;  %v140_v46 = vsel %vm22_vm0, %v118_v45, 0.0 }
  0xb2   :  { %135 = vadd.xlane.f32.xlu1 %v134_v36  ;;  %132 = vadd.xlane.f32.xlu0 %v131_v37 }
  0xb6   :  { %138 = vadd.xlane.f32.xlu0 %v137_v39 }
  0xc3   :  { %244 = vperm.xlu1 %333, %v324_v40  }
  0xc7   :  { %248 = vperm.xlu1 %333, %v325_v13  }
  0xcb   :  { %252 = vperm.xlu1 %333, %v326_v41  }
  0xcc   :  { %240 = vperm.xlu0 %332, %v323_v42  }
  0xcf   :  { %288 = vperm.xlu1 %333, %v327_v43  }
  0xf3   :  { %141 = vadd.xlane.f32.xlu1 %v140_v46 }
 0x104   :  { %292 = vperm.xlu1 %333, %v328_v47  }
 0x108   :  { %296 = vperm.xlu1 %333, %v329_v48  }
 0x10c   :  { %300 = vperm.xlu1 %333, %v330_v12  }
 0x133   :  { %v121_v49 = vpop.xlane.xlu0 %120  ;;  %v124_v51 = vpop.xlane.xlu1 %123 }
 0x134   :  { %v143_v50 = vrot.slane %v121_v49, 4  ;;  %v149_v10 = vrot.slane %v124_v51, 4 }
 0x136   :  { %v144_v52 = vadd.f32 %v143_v50, %v121_v49  ;;  %v150_v18 = vadd.f32 %v149_v10, %v124_v51 }
 0x137   :  { %v127_v53 = vpop.xlane.xlu0 %126  ;;  %v491_v56 = vpop.xlane.xlu1 %129 }
 0x138   :  { %v145_v54 = vrot.slane %v144_v52, 2  ;;  %v155_v19 = vrot.slane %v127_v53, 4  ;;  %v151_v26 = vrot.slane %v150_v18, 2 }
 0x13a   :  { %v146_v58 = vadd.f32 %v145_v54, %v144_v52  ;;  %v156_v27 = vadd.f32 %v155_v19, %v127_v53  ;;  %v152_v31 = vadd.f32 %v151_v26, %v150_v18 }
 0x13b   :  { %v133_v55 = vpop.xlane.xlu0 %132  ;;  %v136_v62 = vpop.xlane.xlu1 %135 }
 0x13c   :  { %v167_v57 = vrot.slane %v133_v55, 4  ;;  %v147_v61 = vrot.slane %v146_v58, 1  ;;  %v173_v4 = vrot.slane %v136_v62, 4  ;;  %v157_v33 = vrot.slane %v156_v27, 2 }
 0x13d   :  { %v153_v35 = vrot.slane %v152_v31, 1 }
 0x13e   :  { %v168_v59 = vadd.f32 %v167_v57, %v133_v55  ;;  %v148_v6 = vadd.f32 %v147_v61, %v146_v58  ;;  %v174_v15 = vadd.f32 %v173_v4, %v136_v62  ;;  %v158_v8 = vadd.f32 %v157_v33, %v156_v27 }
 0x13f   :  { %v139_v11 = vpop.xlane.xlu0 %138  ;;  %v245_v22 = vpop.permute.xlu1 %244  ;;  %v154_v39 = vadd.f32 %v153_v35, %v152_v31  ;;  %v161_v55 = vrot.slane %v491_v56, 4 }
 0x140   :  { %v169_v60 = vrot.slane %v168_v59, 2  ;;  %v179_v17 = vrot.slane %v139_v11, 4  ;;  %v175_v21 = vrot.slane %v174_v15, 2  ;;  %v159_v13 = vrot.slane %v158_v8, 1 }
 0x141   :  { %v162_v57 = vadd.f32 %v161_v55, %v491_v56 }
 0x142   :  { %v170_v63 = vadd.f32 %v169_v60, %v168_v59  ;;  %v180_v25 = vadd.f32 %v179_v17, %v139_v11  ;;  %v176_v28 = vadd.f32 %v175_v21, %v174_v15  ;;  %v160_v12 = vadd.f32 %v159_v13, %v158_v8 }
 0x143   :  { %v249_v2 = vpop.permute.xlu1 %248  ;;  %v163_v59 = vrot.slane %v162_v57, 2 }
 0x144   :  { %v171_v3 = vrot.slane %v170_v63, 1  ;;  %v181_v5 = vrot.slane %v180_v25, 2  ;;  %v177_v0 = vrot.slane %v176_v28, 1 }
 0x145   :  { %v164_v4 = vadd.f32 %v163_v59, %v162_v57 }
 0x146   :  { %v172_v7 = vadd.f32 %v171_v3, %v170_v63  ;;  %v182_v34 = vadd.f32 %v181_v5, %v180_v25  ;;  %v178_v36 = vadd.f32 %v177_v0, %v176_v28 }
 0x147   :  { %v493_v38 = vpop.permute.xlu1 %252  ;;  %v241_v41 = vpop.permute.xlu0 %240  ;;  %v165_v18 = vrot.slane %v164_v4, 1 }
 0x148   :  { %v191_v14 = vadd.f32 %v172_v7, %v148_v6  ;;  %v183_v37 = vrot.slane %v182_v34, 1  ;;  %v192_v42 = vadd.f32 %v178_v36, %v154_v39 }
 0x14a   :  { %v195_v16 = vmul.f32 0.0009765625, %v191_v14  ;;  %v184_v46 = vadd.f32 %v183_v37, %v182_v34  ;;  %v196_v50 = vmul.f32 0.0009765625, %v192_v42 }
 0x14b   :  { %v289_v49 = vpop.permute.xlu1 %288 }
 0x14c   :  { %v199_v20 = vadd.f32 1e-05, %v195_v16  ;;  %v193_v53 = vadd.f32 %v184_v46, %v160_v12 }
 0x14e   :  { %334 = vrsqrt.f32 %v199_v20 }
 0x15b   :  { %v335_v40 = vpop.eup %334 }
 0x15c   :  { %v207_v43 = vmul.f32 %v335_v40, %v423_v24  ;;  %v211_v45 = vmul.f32 %v335_v40, %v441_v32  ;;  %v200_v24 = vadd.f32 1e-05, %v196_v50  ;;  %v197_v32 = vmul.f32 0.0009765625, %v193_v53 }
 0x15e   :  { %v255_v47 = vmul.f32 %v241_v41, %v207_v43  ;;  %v259_v48 = vmul.f32 %v241_v41, %v211_v45  ;;  %336 = vrsqrt.f32 %v200_v24  ;;  %v201_v54 = vadd.f32 1e-05, %v197_v32 }
 0x160   :  { %v303_v51 = vadd.f32 %v289_v49, %v255_v47  ;;  %v307_v52 = vadd.f32 %v289_v49, %v259_v48  ;;  %338 = vrsqrt.f32 %v201_v54 }
 0x162   :  { %311 = vst.msk [vmem:[%s542_s3] sm:$0xff] %vm22_vm0, %v303_v51  ;;  %315 = vst.msk [vmem:[%s542_s3 + $0x20] sm:$0xff] %vm22_vm0, %v307_v52 }
 0x16b   :  { %v337_v58 = vpop.eup %336 }
 0x16c   :  { %v208_v60 = vmul.f32 %v337_v58, %v420_v23  ;;  %v212_v61 = vmul.f32 %v337_v58, %v438_v1 }
 0x16d   :  { %v339_v62 = vpop.eup %338 }
 0x16e   :  { %v256_v6 = vmul.f32 %v245_v22, %v208_v60  ;;  %v260_v7 = vmul.f32 %v245_v22, %v212_v61  ;;  %v209_v10 = vmul.f32 %v339_v62, %v433_v30  ;;  %v213_v11 = vmul.f32 %v339_v62, %v454_v9 }
 0x16f   :  { %v166_v22 = vadd.f32 %v165_v18, %v164_v4 }
 0x170   :  { %v257_v19 = vmul.f32 %v249_v2, %v209_v10  ;;  %v261_v23 = vmul.f32 %v249_v2, %v213_v11 }
 0x17c   :  { %v142_v63 = vpop.xlane.xlu1 %141 }
 0x17d   :  { %v185_v3 = vrot.slane %v142_v63, 4 }
 0x17f   :  { %v186_v14 = vadd.f32 %v185_v3, %v142_v63 }
 0x180   :  { %v293_v15 = vpop.permute.xlu1 %292 }
 0x181   :  { %v187_v16 = vrot.slane %v186_v14, 2  ;;  %v304_v56 = vadd.f32 %v293_v15, %v256_v6  ;;  %v308_v17 = vadd.f32 %v293_v15, %v260_v7 }
 0x183   :  { %v188_v20 = vadd.f32 %v187_v16, %v186_v14  ;;  %312 = vst.msk [vmem:[%s542_s3 + $0x8] sm:$0xff] %vm22_vm0, %v304_v56  ;;  %316 = vst.msk [vmem:[%s542_s3 + $0x28] sm:$0xff] %vm22_vm0, %v308_v17 }
 0x184   :  { %v297_v30 = vpop.permute.xlu1 %296 }
 0x185   :  { %v189_v1 = vrot.slane %v188_v20, 1  ;;  %v305_v9 = vadd.f32 %v297_v30, %v257_v19  ;;  %v309_v21 = vadd.f32 %v297_v30, %v261_v23 }
 0x187   :  { %v190_v25 = vadd.f32 %v189_v1, %v188_v20  ;;  %313 = vst.msk [vmem:[%s542_s3 + $0x10] sm:$0xff] %vm22_vm0, %v305_v9  ;;  %317 = vst.msk [vmem:[%s542_s3 + $0x30] sm:$0xff] %vm22_vm0, %v309_v21 }
 0x188   :  { %v301_v34 = vpop.permute.xlu1 %300 }
 0x189   :  { %v194_v26 = vadd.f32 %v190_v25, %v166_v22 }
 0x18b   :  { %v198_v27 = vmul.f32 0.0009765625, %v194_v26 }
 0x18d   :  { %v202_v28 = vadd.f32 1e-05, %v198_v27 }
 0x18f   :  { %340 = vrsqrt.f32 %v202_v28 }
 0x19c   :  { %v341_v5 = vpop.eup %340 }
 0x19d   :  { %v210_v31 = vmul.f32 %v341_v5, %v430_v29  ;;  %v214_v33 = vmul.f32 %v341_v5, %v477_v44 }
 0x19f   :  { %v258_v2 = vmul.f32 %v493_v38, %v210_v31  ;;  %v262_v0 = vmul.f32 %v493_v38, %v214_v33 }
 0x1a1   :  { %v306_v35 = vadd.f32 %v301_v34, %v258_v2  ;;  %v310_v8 = vadd.f32 %v301_v34, %v262_v0 }
 0x1a3   :  { %314 = vst.msk [vmem:[%s542_s3 + $0x18] sm:$0xff] %vm22_vm0, %v306_v35  ;;  %318 = vst.msk [vmem:[%s542_s3 + $0x38] sm:$0xff] %vm22_vm0, %v310_v8 }

// kernel: stgcn_forward.22
= control target key start
LH: loop header
LB: loop body
LE: loop exit
PB: predicated region body
PF: predicated region fallthrough
CT: control target
= control target key end

     0   :  { %vm32_vm0 = vcmask 122880   ;;  %v877_v1 = vmov 0   ;;  %vm23_vm1 = vcmask 130048   ;;  %v878_v2 = vmov 0.0   ;;  %s1281_s1 = inlined_call_operand.vmem [shape: bf16[3,16,192], index: 1, kind: input, shape index: {}]   ;;  %s1282_s0 = inlined_call_operand.vmem [shape: f32[8,8,16], index: 0, kind: input, shape index: {}]   ;;  %s1283_s2 = inlined_call_operand.vmem [shape: f32[1,192], index: 2, kind: input, shape index: {}]   ;;  %s1284_s3 = inlined_call_operand.vmem [shape: f32[8,8,64], index: 3, kind: output, shape index: {}]  }
   0x1   :  { %v836_v0 = vld [vmem:[%s1281_s1 + $0x14] ss:$8 sps:$4 sm:$0xff]   ;;  %334 = vmatprep.mubr.bf16.mxu0 %v877_v1  ;;  %354 = vmatprep.mubr.bf16.mxu1 %v877_v1  ;;  %33 = vst.msk [vmem:[#allocation2] sm:$0x1] %vm32_vm0, %v878_v2  ;;  %34 = vst.msk [vmem:[#allocation2 + $0x10] sm:$0x1] %vm32_vm0, %v878_v2 }
   0x2   :  { %41 = vst.msk [vmem:[#allocation2 + $0x9] sm:$0x1] %vm32_vm0, %v878_v2  ;;  %42 = vst.msk [vmem:[#allocation2 + $0x19] sm:$0x1] %vm32_vm0, %v878_v2  ;;  %v838_v3 = vld [vmem:[%s1281_s1 + $0x10] ss:$8 sps:$4 sm:$0xff]   ;;  %831 = vmatprep.subr.bf16.mxu1 %v836_v0  ;;  %316 = vmatprep.subr.bf16.mxu0 %v836_v0 }
   0x3   :  { %35 = vst.msk [vmem:[#allocation2 + $0x20] sm:$0x1] %vm32_vm0, %v878_v2  ;;  %36 = vst.msk [vmem:[#allocation2 + $0x30] sm:$0x1] %vm32_vm0, %v878_v2  ;;  %v841_v4 = vld [vmem:[%s1281_s1 + $0x4] ss:$8 sps:$4 sm:$0xff]   ;;  %832 = vmatpush1.bf16.msra.mxu1 %v838_v3  ;;  %317 = vmatpush1.bf16.msra.mxu0 %v838_v3 }
   0x4   :  { %37 = vst.msk [vmem:[#allocation2 + $0x40] sm:$0x1] %vm32_vm0, %v878_v2  ;;  %38 = vst.msk [vmem:[#allocation2 + $0x50] sm:$0x1] %vm32_vm0, %v878_v2  ;;  %v15_v5 = vld [vmem:[%s1282_s0] sm:$0xff]  ;;  %v16_v6 = vld [vmem:[%s1282_s0 + $0x8] sm:$0xff]  ;;  %415 = vmatprep.subr.bf16.mxu1 %v841_v4 }
   0x5   :  { %39 = vst.msk [vmem:[#allocation2 + $0x60] sm:$0x1] %vm32_vm0, %v878_v2  ;;  %40 = vst.msk [vmem:[#allocation2 + $0x70] sm:$0x1] %vm32_vm0, %v878_v2  ;;  %v19_v7 = vld [vmem:[%s1282_s0 + $0x20] sm:$0xff]  ;;  %v20_v8 = vld [vmem:[%s1282_s0 + $0x28] sm:$0xff] }
   0x6   :  { %43 = vst.msk [vmem:[#allocation2 + $0x29] sm:$0x1] %vm32_vm0, %v878_v2  ;;  %44 = vst.msk [vmem:[#allocation2 + $0x39] sm:$0x1] %vm32_vm0, %v878_v2  ;;  %v844_v9 = vld [vmem:[%s1281_s1 + $0x24] ss:$8 sps:$4 sm:$0xff]  }
   0x7   :  { %45 = vst.msk [vmem:[#allocation2 + $0x49] sm:$0x1] %vm32_vm0, %v878_v2  ;;  %46 = vst.msk [vmem:[#allocation2 + $0x59] sm:$0x1] %vm32_vm0, %v878_v2  ;;  %v17_v10 = vld [vmem:[%s1282_s0 + $0x10] sm:$0xff]  ;;  %v18_v11 = vld [vmem:[%s1282_s0 + $0x18] sm:$0xff]  ;;  %525 = vmatprep.subr.bf16.mxu0 %v844_v9 }
   0x8   :  { %47 = vst.msk [vmem:[#allocation2 + $0x69] sm:$0x1] %vm32_vm0, %v878_v2  ;;  %48 = vst.msk [vmem:[#allocation2 + $0x79] sm:$0x1] %vm32_vm0, %v878_v2  ;;  %v21_v12 = vld [vmem:[%s1282_s0 + $0x30] sm:$0xff]  ;;  %v22_v13 = vld [vmem:[%s1282_s0 + $0x38] sm:$0xff] }
   0x9   :  { %24 = vst.msk [vmem:[#allocation2 + $0x1] sm:$0xff] %vm23_vm1, %v15_v5  ;;  %25 = vst.msk [vmem:[#allocation2 + $0x11] sm:$0xff] %vm23_vm1, %v16_v6  ;;  %vm113_vm2 = vsmask.f32 3328  ;;  %vm114_vm3 = vsmask.f32 7440 }
   0xa   :  { %28 = vst.msk [vmem:[#allocation2 + $0x41] sm:$0xff] %vm23_vm1, %v19_v7  ;;  %29 = vst.msk [vmem:[#allocation2 + $0x51] sm:$0xff] %vm23_vm1, %v20_v8  ;;  %v842_v5 = vld [vmem:[%s1281_s1 + $0x20] ss:$8 sps:$4 sm:$0xff]   ;;  %vm228_vm5 = vcmask 1042432   ;;  %vm229_vm6 = vcmask 1046532  }
   0xb   :  { %26 = vst.msk [vmem:[#allocation2 + $0x21] sm:$0xff] %vm23_vm1, %v17_v10  ;;  %27 = vst.msk [vmem:[#allocation2 + $0x31] sm:$0xff] %vm23_vm1, %v18_v11  ;;  %vm732_vm8 = vcmask 523264  }
   0xc   :  { %30 = vst.msk [vmem:[#allocation2 + $0x61] sm:$0xff] %vm23_vm1, %v21_v12  ;;  %31 = vst.msk [vmem:[#allocation2 + $0x71] sm:$0xff] %vm23_vm1, %v22_v13 }
   0xd   :  { %vm1004_vm4 = vmor %vm113_vm2, %vm114_vm3 }
   0xe   :  { %vm1083_vm7 = vmor %vm228_vm5, %vm229_vm6 }
  0x10   :  { %v962_v14 = vld [vmem:[#allocation2] sm:$0xff]  ;;  %v50_v15 = vld [vmem:[#allocation2 + $0x8] sm:$0x3]  ;;  %v964_v16 = vld [vmem:[#allocation2 + $0x10] sm:$0xff] }
  0x11   :  { %v52_v17 = vld [vmem:[#allocation2 + $0x18] sm:$0x3]  ;;  %v968_v18 = vpack.c.bf16 %v962_v14, %v962_v14  ;;  %v970_v19 = vpack.c.bf16 %v50_v15, %v50_v15  ;;  %v972_v20 = vld [vmem:[#allocation2 + $0x40] sm:$0xff]  ;;  %v976_v21 = vpack.c.bf16 %v964_v16, %v964_v16  ;;  %v58_v23 = vld [vmem:[#allocation2 + $0x48] sm:$0x3]  ;;  %v827_v45 = vpack.c.bf16 %v964_v16, %v962_v14 }
  0x12   :  { %v978_v22 = vpack.c.bf16 %v52_v17, %v52_v17  ;;  %v983_v27 = vld [vmem:[#allocation2 + $0x50] sm:$0xff]  ;;  %v987_v28 = vpack.c.bf16 %v972_v20, %v972_v20  ;;  %v60_v32 = vld [vmem:[#allocation2 + $0x58] sm:$0x3]  ;;  %v992_v36 = vpack.c.bf16 %v58_v23, %v58_v23  ;;  %v1011_v50 = vld [vmem:[#allocation2 + $0x20] sm:$0xff] }
  0x13   :  { %v117_v24 = vshrl.u32 %v968_v18, 16  ;;  %v120_v25 = vshll.u32 %v968_v18, 16  ;;  %v126_v26 = vshll.u32 %v970_v19, 16  ;;  %v131_v29 = vshrl.u32 %v976_v21, 16  ;;  %v54_v51 = vld [vmem:[#allocation2 + $0x28] sm:$0x3] }
  0x14   :  { %v134_v30 = vshll.u32 %v976_v21, 16  ;;  %v140_v31 = vshll.u32 %v978_v22, 16  ;;  %v996_v40 = vpack.c.bf16 %v983_v27, %v983_v27  ;;  %v998_v42 = vpack.c.bf16 %v60_v32, %v60_v32  ;;  %v1014_v56 = vld [vmem:[#allocation2 + $0x30] sm:$0xff]  ;;  %v56_v61 = vld [vmem:[#allocation2 + $0x38] sm:$0x3]  ;;  %v1036_v12 = vld [vmem:[#allocation2 + $0x60] sm:$0xff] }
  0x15   :  { %v119_v33 = vrot.slane %v117_v24, 4  ;;  %v122_v34 = vrot.slane %v120_v25, 5  ;;  %v128_v35 = vrot.slane %v126_v26, 5  ;;  %v133_v37 = vrot.slane %v131_v29, 4  ;;  %v62_v24 = vld [vmem:[#allocation2 + $0x68] sm:$0x3] }
  0x16   :  { %v136_v38 = vrot.slane %v134_v30, 5  ;;  %v142_v39 = vrot.slane %v140_v31, 5  ;;  %v173_v43 = vshrl.u32 %v987_v28, 16  ;;  %v176_v44 = vshll.u32 %v987_v28, 16  ;;  %v1046_v31 = vld [vmem:[#allocation2 + $0x70] sm:$0xff] }
  0x17   :  { %v123_v41 = vor.u32 %v122_v34, %v119_v33  ;;  %v182_v47 = vshll.u32 %v992_v36, 16  ;;  %v187_v48 = vshrl.u32 %v996_v40, 16  ;;  %v190_v49 = vshll.u32 %v996_v40, 16  ;;  %v64_v32 = vld [vmem:[#allocation2 + $0x78] sm:$0x3] }
  0x18   :  { %v137_v46 = vor.u32 %v136_v38, %v133_v37  ;;  %v175_v53 = vrot.slane %v173_v43, 4  ;;  %v178_v54 = vrot.slane %v176_v44, 5  ;;  %v196_v55 = vshll.u32 %v998_v42, 16  ;;  %v839_v33 = vld [vmem:[%s1281_s1] ss:$8 sps:$4 sm:$0xff]  }
  0x19   :  { %v124_v52 = vrot.slane %v123_v41, 4  ;;  %v184_v58 = vrot.slane %v182_v47, 5  ;;  %v189_v59 = vrot.slane %v187_v48, 4  ;;  %v192_v60 = vrot.slane %v190_v49, 5 }
  0x1a   :  { %v138_v57 = vrot.slane %v137_v46, 4  ;;  %v179_v63 = vor.u32 %v178_v54, %v175_v53  ;;  %v198_v0 = vrot.slane %v196_v55, 5  ;;  %v1020_v2 = vpack.c.bf16 %v1011_v50, %v1011_v50 }
  0x1b   :  { %v129_v62 = vsel %vm1004_vm4, %v124_v52, %v128_v35  ;;  %v193_v4 = vor.u32 %v192_v60, %v189_v59  ;;  %v1027_v6 = vpack.c.bf16 %v54_v51, %v54_v51  ;;  %v1031_v7 = vpack.c.bf16 %v1014_v56, %v1014_v56 }
  0x1c   :  { %v143_v3 = vsel %vm1004_vm4, %v138_v57, %v142_v39  ;;  %v180_v9 = vrot.slane %v179_v63, 4  ;;  %v1033_v10 = vpack.c.bf16 %v56_v61, %v56_v61  ;;  %v145_v11 = vshrl.u32 %v1020_v2, 16 }
  0x1d   :  { %v771_v8 = vcombine.low %v129_v62, %v143_v3  ;;  %v194_v13 = vrot.slane %v193_v4, 4  ;;  %v148_v15 = vshll.u32 %v1020_v2, 16  ;;  %v154_v17 = vshll.u32 %v1027_v6, 16 }
  0x1e   :  { %v159_v23 = vshrl.u32 %v1031_v7, 16  ;;  %v185_v25 = vsel %vm1004_vm4, %v180_v9, %v184_v58  ;;  %v147_v26 = vrot.slane %v145_v11, 4  ;;  %v162_v29 = vshll.u32 %v1031_v7, 16 }
  0x1f   :  { %777 = vmatmul.mubr.msk.bf16.vlgmr.msra.gmra.mxu0 %vm23_vm1, %v771_v8  ;;  %v168_v30 = vshll.u32 %v1033_v10, 16  ;;  %v233_v34 = vrot.slane %v970_v19, 5  ;;  %v199_v35 = vsel %vm1004_vm4, %v194_v13, %v198_v0  ;;  %v150_v37 = vrot.slane %v148_v15, 5 }
  0x20   :  { %526 = vmatpush1.bf16.msra.mxu0 %v842_v5  ;;  %344 = vmatprep.mubr.bf16.mxu0 %v877_v1  ;;  %v161_v38 = vrot.slane %v159_v23, 4  ;;  %v773_v39 = vcombine.low %v185_v25, %v199_v35  ;;  %v156_v41 = vrot.slane %v154_v17, 5  ;;  %v164_v43 = vrot.slane %v162_v29, 5 }
  0x21   :  { %v1057_v44 = vpack.c.bf16 %v1036_v12, %v1036_v12  ;;  %v151_v46 = vor.u32 %v150_v37, %v147_v26  ;;  %v1059_v47 = vpack.c.bf16 %v62_v24, %v62_v24  ;;  %v1063_v19 = vpack.c.bf16 %v1046_v31, %v1046_v31 }
  0x22   :  { %v1065_v48 = vpack.c.bf16 %v64_v32, %v64_v32  ;;  %779 = vmatmul.mubr.msk.bf16.vlgmr.msra.gmra.mxu1 %vm23_vm1, %v773_v39  ;;  %v165_v49 = vor.u32 %v164_v43, %v161_v38  ;;  %v170_v51 = vrot.slane %v168_v30, 5  ;;  %v237_v63 = vrot.slane %v978_v22, 5 }
  0x23   :  { %v201_v52 = vshrl.u32 %v1057_v44, 16  ;;  %v204_v53 = vshll.u32 %v1057_v44, 16  ;;  %416 = vmatpush1.bf16.msra.mxu1 %v839_v33  ;;  %364 = vmatprep.mubr.bf16.mxu1 %v877_v1  ;;  %v152_v54 = vrot.slane %v151_v46, 4  ;;  %v210_v55 = vshll.u32 %v1059_v47, 16 }
  0x24   :  { %v215_v57 = vshrl.u32 %v1063_v19, 16  ;;  %v218_v58 = vshll.u32 %v1063_v19, 16  ;;  %v166_v59 = vrot.slane %v165_v49, 4  ;;  %v224_v62 = vshll.u32 %v1065_v48, 16  ;;  %v600_v49 = vld [vmem:[%s1283_s2] sm:$0x3] }
  0x25   :  { %v203_v60 = vrot.slane %v201_v52, 4  ;;  %v206_v61 = vrot.slane %v204_v53, 5  ;;  %v157_v0 = vsel %vm1004_vm4, %v152_v54, %v156_v41  ;;  %v212_v9 = vrot.slane %v210_v55, 5  ;;  %s879_s2 = smov 64  }
  0x26   :  { %v217_v3 = vrot.slane %v215_v57, 4  ;;  %v220_v4 = vrot.slane %v218_v58, 5  ;;  %v171_v5 = vsel %vm1004_vm4, %v166_v59, %v170_v51  ;;  %v761_v11 = vrot.slane %v968_v18, 9 }
  0x27   :  { %v207_v8 = vor.u32 %v206_v61, %v203_v60  ;;  %v772_v13 = vcombine.low %v157_v0, %v171_v5  ;;  %v226_v17 = vrot.slane %v224_v62, 5  ;;  %v762_v22 = vrot.slane %v976_v21, 9 }
  0x28   :  { %v221_v15 = vor.u32 %v220_v4, %v217_v3  ;;  %v234_v18 = vsel %vm1083_vm7, %v761_v11, %v233_v34  ;;  %v763_v33 = vrot.slane %v1020_v2, 9  ;;  %v241_v35 = vrot.slane %v1027_v6, 5 }
  0x29   :  { %v208_v24 = vrot.slane %v207_v8, 4  ;;  %778 = vmatmul.mubr.msk.bf16.gmra.mxu0 %vm23_vm1, %v772_v13  ;;  %v238_v29 = vsel %vm1083_vm7, %v762_v22, %v237_v63  ;;  %v764_v37 = vrot.slane %v1031_v7, 9  ;;  %v245_v38 = vrot.slane %v1033_v10, 5 }
  0x2a   :  { %v222_v25 = vrot.slane %v221_v15, 4  ;;  %543 = vmatprep.mubr.bf16.mxu0 %v877_v1  ;;  %v793_v21 = vcombine.low %v234_v18, %v238_v29  ;;  %v242_v34 = vsel %vm1083_vm7, %v763_v33, %v241_v35  ;;  %v765_v7 = vrot.slane %v987_v28, 9 }
  0x2b   :  { %v213_v26 = vsel %vm1004_vm4, %v208_v24, %v212_v9  ;;  %v246_v2 = vsel %vm1083_vm7, %v764_v37, %v245_v38  ;;  %v249_v10 = vrot.slane %v992_v36, 5  ;;  %v766_v39 = vrot.slane %v996_v40, 9 }
  0x2c   :  { %v227_v30 = vsel %vm1004_vm4, %v222_v25, %v226_v17  ;;  %v794_v6 = vcombine.low %v242_v34, %v246_v2  ;;  %v253_v41 = vrot.slane %v998_v42, 5  ;;  %v828_v14 = vpack.c.bf16 %v1014_v56, %v1011_v50 }
  0x2d   :  { %v774_v32 = vcombine.low %v213_v26, %v227_v30  ;;  %v250_v16 = vsel %vm1083_vm7, %v765_v7, %v249_v10  ;;  %v767_v40 = vrot.slane %v1057_v44, 9  ;;  %v257_v42 = vrot.slane %v1059_v47, 5 }
  0x2e   :  { %v254_v28 = vsel %vm1083_vm7, %v766_v39, %v253_v41  ;;  %v768_v43 = vrot.slane %v1063_v19, 9  ;;  %v261_v46 = vrot.slane %v1065_v48, 5  ;;  %v829_v50 = vpack.c.bf16 %v983_v27, %v972_v20 }
  0x2f   :  { %780 = vmatmul.mubr.msk.bf16.gmra.mxu1 %vm23_vm1, %v774_v32  ;;  %v795_v36 = vcombine.low %v250_v16, %v254_v28  ;;  %v258_v56 = vsel %vm1083_vm7, %v767_v40, %v257_v42  ;;  %v830_v19 = vpack.c.bf16 %v1046_v31, %v1036_v12  ;;  %v602_v20 = vlaneseq }
  0x30   :  { %433 = vmatprep.mubr.bf16.mxu1 %v877_v1  ;;  %v262_v44 = vsel %vm1083_vm7, %v768_v43, %v261_v46 }
  0x31   :  { %799 = vmatmul.mubr.msk.bf16.vlgmr.msra.gmra.mxu0 %vm23_vm1, %v793_v21  ;;  %v796_v47 = vcombine.low %v258_v56, %v262_v44  ;;  %v603_v27 = vshrl.u32 %v602_v20, 7 }
  0x32   :  { %553 = vmatprep.mubr.bf16.mxu0 %v877_v1 }
  0x33   :  { %v608_v48 = vsub.s32 1, %v603_v27  ;;  %v604_v4 = vsub.s32 0, %v603_v27 }
  0x35   :  { %v1149_v51 = vrot.slane %v600_v49, %v608_v48  ;;  %v1167_v15 = vrot.slane %v600_v49, %v604_v4 }
  0x37   :  { %787 = vmatmul.mubr.msk.bf16.vlgmr.msra.gmra.mxu1 %vm23_vm1, %v827_v45 }
  0x38   :  { %443 = vmatprep.mubr.bf16.mxu1 %v877_v1 }
  0x39   :  { %800 = vmatmul.mubr.msk.bf16.gmra.mxu0 %vm23_vm1, %v794_v6 }
  0x3a   :  { %563 = vmatprep.mubr.bf16.mxu0 %v877_v1 }
  0x3f   :  { %788 = vmatmul.mubr.msk.bf16.gmra.mxu1 %vm23_vm1, %v828_v14 }
  0x40   :  { %453 = vmatprep.mubr.bf16.mxu1 %v877_v1 }
  0x41   :  { %801 = vmatmul.mubr.msk.bf16.gmra.mxu0 %vm23_vm1, %v795_v36 }
  0x42   :  { %573 = vmatprep.mubr.bf16.mxu0 %v877_v1 }
  0x47   :  { %789 = vmatmul.mubr.msk.bf16.gmra.mxu1 %vm23_vm1, %v829_v50 }
  0x48   :  { %463 = vmatprep.mubr.bf16.mxu1 %v877_v1 }
  0x49   :  { %802 = vmatmul.mubr.msk.bf16.gmra.mxu0 %vm23_vm1, %v796_v47 }
  0x4f   :  { %790 = vmatmul.mubr.msk.bf16.gmra.mxu1 %vm23_vm1, %v830_v19 }
  0xdf   :  { %v336_v52 = vpop.f32.mrf.mxu0 }
  0xe1   :  { %v338_v53 = vpop.f32.mrf.mxu0 }
  0xe2   :  { %v1151_v54 = vpop.f32.mrf.mxu1 }
  0xe3   :  { %v340_v1 = vpop.f32.mrf.mxu0 }
  0xe4   :  { %v1153_v55 = vpop.f32.mrf.mxu1 }
  0xe5   :  { %v342_v57 = vpop.f32.mrf.mxu0 }
  0xe6   :  { %v1155_v12 = vpop.f32.mrf.mxu1 }
  0xe8   :  { %v1157_v58 = vpop.f32.mrf.mxu1 }
  0xe9   :  { %v346_v31 = vpop.f32.mrf.mxu0 }
  0xeb   :  { %v348_v59 = vpop.f32.mrf.mxu0 }
  0xed   :  { %v350_v60 = vpop.f32.mrf.mxu0 }
  0xef   :  { %v1159_v61 = vpop.f32.mrf.mxu1  ;;  %v352_v62 = vpop.f32.mrf.mxu0 }
  0xf1   :  { %v1161_v63 = vpop.f32.mrf.mxu1  ;;  %v545_v0 = vpop.f32.mrf.mxu0 }
  0xf3   :  { %v1163_v3 = vpop.f32.mrf.mxu1  ;;  %v547_v5 = vpop.f32.mrf.mxu0 }
  0xf5   :  { %v1165_v8 = vpop.f32.mrf.mxu1  ;;  %v549_v9 = vpop.f32.mrf.mxu0 }
  0xf7   :  { %v435_v11 = vpop.f32.mrf.mxu1  ;;  %v551_v17 = vpop.f32.mrf.mxu0 }
  0xf8   :  { %v436_v13 = vadd.f32 %v435_v11, %v336_v52 }
  0xf9   :  { %v437_v23 = vpop.f32.mrf.mxu1  ;;  %v555_v25 = vpop.f32.mrf.mxu0 }
  0xfa   :  { %v584_v22 = vadd.f32 %v545_v0, %v436_v13  ;;  %v438_v24 = vadd.f32 %v437_v23, %v338_v53 }
  0xfb   :  { %v439_v26 = vpop.f32.mrf.mxu1  ;;  %v557_v32 = vpop.f32.mrf.mxu0 }
  0xfc   :  { %v1170_v18 = vadd.f32 %v1167_v15, %v584_v22  ;;  %v585_v29 = vadd.f32 %v547_v5, %v438_v24  ;;  %v440_v30 = vadd.f32 %v439_v26, %v340_v1 }
  0xfd   :  { %v441_v21 = vpop.f32.mrf.mxu1  ;;  %v559_v45 = vpop.f32.mrf.mxu0 }
  0xfe   :  { %v803_v33 = vmul.f32 -1.442695, %v1170_v18  ;;  %v1174_v35 = vadd.f32 %v1149_v51, %v585_v29  ;;  %v586_v37 = vadd.f32 %v549_v9, %v440_v30  ;;  %v442_v38 = vadd.f32 %v441_v21, %v342_v57 }
  0xff   :  { %v445_v34 = vpop.f32.mrf.mxu1  ;;  %v561_v10 = vpop.f32.mrf.mxu0 }
 0x100   :  { %845 = vpow2.f32 %v803_v33  ;;  %v1177_v2 = vadd.f32 %v1167_v15, %v586_v37  ;;  %v587_v6 = vadd.f32 %v551_v17, %v442_v38  ;;  %v446_v7 = vadd.f32 %v445_v34, %v346_v31 }
 0x101   :  { %v447_v39 = vpop.f32.mrf.mxu1  ;;  %v565_v36 = vpop.f32.mrf.mxu0 }
 0x102   :  { %v804_v41 = vmul.f32 -1.442695, %v1177_v2  ;;  %v1181_v14 = vadd.f32 %v1149_v51, %v587_v6  ;;  %v588_v16 = vadd.f32 %v555_v25, %v446_v7  ;;  %v448_v28 = vadd.f32 %v447_v39, %v348_v59 }
 0x103   :  { %v449_v40 = vpop.f32.mrf.mxu1  ;;  %v567_v50 = vpop.f32.mrf.mxu0 }
 0x104   :  { %847 = vpow2.f32 %v804_v41  ;;  %v1184_v42 = vadd.f32 %v1167_v15, %v588_v16  ;;  %v589_v43 = vadd.f32 %v557_v32, %v448_v28  ;;  %v450_v46 = vadd.f32 %v449_v40, %v350_v60 }
 0x105   :  { %v451_v56 = vpop.f32.mrf.mxu1  ;;  %v569_v27 = vpop.f32.mrf.mxu0 }
 0x106   :  { %v805_v44 = vmul.f32 -1.442695, %v1184_v42  ;;  %v1188_v47 = vadd.f32 %v1149_v51, %v589_v43  ;;  %v590_v19 = vadd.f32 %v559_v45, %v450_v46  ;;  %v452_v20 = vadd.f32 %v451_v56, %v352_v62 }
 0x107   :  { %v455_v48 = vpop.f32.mrf.mxu1  ;;  %v571_v1 = vpop.f32.mrf.mxu0 }
 0x108   :  { %849 = vpow2.f32 %v805_v44  ;;  %v1191_v49 = vadd.f32 %v1167_v15, %v590_v19  ;;  %v591_v52 = vadd.f32 %v561_v10, %v452_v20  ;;  %v456_v53 = vadd.f32 %v455_v48, %v1151_v54 }
 0x109   :  { %v457_v57 = vpop.f32.mrf.mxu1  ;;  %v575_v11 = vpop.f32.mrf.mxu0 }
 0x10a   :  { %v806_v31 = vmul.f32 -1.442695, %v1191_v49  ;;  %v1196_v59 = vadd.f32 %v1149_v51, %v591_v52  ;;  %v592_v60 = vadd.f32 %v565_v36, %v456_v53  ;;  %v458_v0 = vadd.f32 %v457_v57, %v1153_v55 }
 0x10b   :  { %v459_v62 = vpop.f32.mrf.mxu1 }
 0x10c   :  { %851 = vpow2.f32 %v806_v31  ;;  %v1200_v4 = vadd.f32 %v1167_v15, %v592_v60  ;;  %v593_v5 = vadd.f32 %v567_v50, %v458_v0  ;;  %v460_v9 = vadd.f32 %v459_v62, %v1155_v12  ;;  %v577_v12 = vpop.f32.mrf.mxu0 }
 0x10d   :  { %v846_v54 = vpop.eup %845  ;;  %v461_v13 = vpop.f32.mrf.mxu1 }
 0x10e   :  { %v652_v17 = vadd.f32 1.0, %v846_v54  ;;  %v807_v23 = vmul.f32 -1.442695, %v1200_v4  ;;  %v1205_v22 = vadd.f32 %v1149_v51, %v593_v5  ;;  %v594_v24 = vadd.f32 %v569_v27, %v460_v9  ;;  %v579_v10 = vpop.f32.mrf.mxu0 }
 0x10f   :  { %v462_v55 = vadd.f32 %v461_v13, %v1157_v58  ;;  %v465_v25 = vpop.f32.mrf.mxu1 }
 0x110   :  { %853 = vrcp.f32 %v652_v17  ;;  %v1209_v26 = vadd.f32 %v1167_v15, %v594_v24  ;;  %v466_v29 = vadd.f32 %v465_v25, %v1159_v61  ;;  %v581_v46 = vpop.f32.mrf.mxu0 }
 0x111   :  { %v848_v30 = vpop.eup %847  ;;  %855 = vpow2.f32 %v807_v23  ;;  %v595_v32 = vadd.f32 %v571_v1, %v462_v55  ;;  %v467_v21 = vpop.f32.mrf.mxu1 }
 0x112   :  { %v653_v33 = vadd.f32 1.0, %v848_v30  ;;  %v808_v37 = vmul.f32 -1.442695, %v1209_v26  ;;  %v596_v38 = vadd.f32 %v575_v11, %v466_v29  ;;  %v468_v45 = vadd.f32 %v467_v21, %v1161_v63 }
 0x113   :  { %v1215_v58 = vadd.f32 %v1149_v51, %v595_v32  ;;  %v469_v34 = vpop.f32.mrf.mxu1 }
 0x114   :  { %857 = vrcp.f32 %v653_v33  ;;  %v1218_v6 = vadd.f32 %v1167_v15, %v596_v38  ;;  %v597_v61 = vadd.f32 %v577_v12, %v468_v45  ;;  %v470_v7 = vadd.f32 %v469_v34, %v1163_v3 }
 0x115   :  { %v850_v39 = vpop.eup %849  ;;  %859 = vpow2.f32 %v808_v37  ;;  %v471_v41 = vpop.f32.mrf.mxu1 }
 0x116   :  { %v654_v16 = vadd.f32 1.0, %v850_v39  ;;  %v809_v28 = vmul.f32 -1.442695, %v1218_v6  ;;  %v1223_v63 = vadd.f32 %v1149_v51, %v597_v61  ;;  %v598_v36 = vadd.f32 %v579_v10, %v470_v7 }
 0x117   :  { %v472_v40 = vadd.f32 %v471_v41, %v1165_v8 }
 0x118   :  { %861 = vrcp.f32 %v654_v16  ;;  %v1227_v43 = vadd.f32 %v1167_v15, %v598_v36 }
 0x119   :  { %v852_v50 = vpop.eup %851  ;;  %863 = vpow2.f32 %v809_v28  ;;  %v599_v3 = vadd.f32 %v581_v46, %v472_v40 }
 0x11a   :  { %v655_v56 = vadd.f32 1.0, %v852_v50  ;;  %v810_v44 = vmul.f32 -1.442695, %v1227_v43 }
 0x11b   :  { %v1231_v19 = vadd.f32 %v1149_v51, %v599_v3 }
 0x11c   :  { %865 = vrcp.f32 %v655_v56 }
 0x11d   :  { %v854_v20 = vpop.eup %853  ;;  %867 = vpow2.f32 %v810_v44 }
 0x11e   :  { %v856_v27 = vpop.eup %855  ;;  %684 = vrot.lane.b32.xlu0 %v854_v20, %s879_s2 }
 0x11f   :  { %v656_v8 = vadd.f32 1.0, %v856_v27 }
 0x121   :  { %v858_v48 = vpop.eup %857  ;;  %869 = vrcp.f32 %v656_v8 }
 0x122   :  { %v860_v15 = vpop.eup %859  ;;  %686 = vrot.lane.b32.xlu0 %v858_v48, %s879_s2 }
 0x123   :  { %v657_v52 = vadd.f32 1.0, %v860_v15 }
 0x125   :  { %v862_v53 = vpop.eup %861  ;;  %871 = vrcp.f32 %v657_v52 }
 0x126   :  { %v864_v1 = vpop.eup %863  ;;  %688 = vrot.lane.b32.xlu1 %v862_v53, %s879_s2 }
 0x127   :  { %v658_v57 = vadd.f32 1.0, %v864_v1 }
 0x129   :  { %v866_v31 = vpop.eup %865  ;;  %873 = vrcp.f32 %v658_v57 }
 0x12a   :  { %v868_v51 = vpop.eup %867  ;;  %690 = vrot.lane.b32.xlu1 %v866_v31, %s879_s2 }
 0x12b   :  { %v659_v60 = vadd.f32 1.0, %v868_v51 }
 0x12d   :  { %875 = vrcp.f32 %v659_v60 }
 0x12e   :  { %v870_v0 = vpop.eup %869 }
 0x12f   :  { %692 = vrot.lane.b32.xlu0 %v870_v0, %s879_s2 }
 0x132   :  { %v872_v62 = vpop.eup %871 }
 0x133   :  { %694 = vrot.lane.b32.xlu1 %v872_v62, %s879_s2 }
 0x136   :  { %v874_v5 = vpop.eup %873 }
 0x137   :  { %696 = vrot.lane.b32.xlu0 %v874_v5, %s879_s2 }
 0x13a   :  { %v876_v9 = vpop.eup %875 }
 0x13b   :  { %698 = vrot.lane.b32.xlu1 %v876_v9, %s879_s2 }
 0x190   :  { %v685_v11 = vpop.permute.xlu0 %684 }
 0x191   :  { %v708_v54 = vadd.f32 %v685_v11, %v1170_v18 }
 0x193   :  { %v716_v13 = vadd.f32 %v708_v54, %v1174_v35 }
 0x194   :  { %v687_v17 = vpop.permute.xlu0 %686 }
 0x195   :  { %v724_v23 = vmax.f32 %v716_v13, 0.0  ;;  %v709_v24 = vadd.f32 %v687_v17, %v1177_v2 }
 0x197   :  { %733 = vst.msk [vmem:[%s1284_s3] sm:$0xff] %vm732_vm8, %v724_v23  ;;  %v717_v55 = vadd.f32 %v709_v24, %v1181_v14 }
 0x198   :  { %v689_v25 = vpop.permute.xlu1 %688 }
 0x199   :  { %v725_v29 = vmax.f32 %v717_v55, 0.0  ;;  %v710_v12 = vadd.f32 %v689_v25, %v1184_v42 }
 0x19b   :  { %734 = vst.msk [vmem:[%s1284_s3 + $0x8] sm:$0xff] %vm732_vm8, %v725_v29  ;;  %v718_v18 = vadd.f32 %v710_v12, %v1188_v47 }
 0x19c   :  { %v691_v35 = vpop.permute.xlu1 %690 }
 0x19d   :  { %v726_v2 = vmax.f32 %v718_v18, 0.0  ;;  %v711_v30 = vadd.f32 %v691_v35, %v1191_v49 }
 0x19f   :  { %735 = vst.msk [vmem:[%s1284_s3 + $0x10] sm:$0xff] %vm732_vm8, %v726_v2  ;;  %v719_v14 = vadd.f32 %v711_v30, %v1196_v59 }
 0x1a1   :  { %v727_v32 = vmax.f32 %v719_v14, 0.0  ;;  %v693_v42 = vpop.permute.xlu0 %692 }
 0x1a2   :  { %v712_v21 = vadd.f32 %v693_v42, %v1200_v4 }
 0x1a3   :  { %736 = vst.msk [vmem:[%s1284_s3 + $0x18] sm:$0xff] %vm732_vm8, %v727_v32 }
 0x1a4   :  { %v720_v47 = vadd.f32 %v712_v21, %v1205_v22 }
 0x1a5   :  { %v695_v33 = vpop.permute.xlu1 %694 }
 0x1a6   :  { %v728_v49 = vmax.f32 %v720_v47, 0.0  ;;  %v713_v37 = vadd.f32 %v695_v33, %v1209_v26 }
 0x1a8   :  { %737 = vst.msk [vmem:[%s1284_s3 + $0x20] sm:$0xff] %vm732_vm8, %v728_v49  ;;  %v721_v59 = vadd.f32 %v713_v37, %v1215_v58 }
 0x1a9   :  { %v697_v38 = vpop.permute.xlu0 %696 }
 0x1aa   :  { %v729_v4 = vmax.f32 %v721_v59, 0.0  ;;  %v714_v45 = vadd.f32 %v697_v38, %v1218_v6 }
 0x1ac   :  { %738 = vst.msk [vmem:[%s1284_s3 + $0x28] sm:$0xff] %vm732_vm8, %v729_v4  ;;  %v722_v22 = vadd.f32 %v714_v45, %v1223_v63 }
 0x1ad   :  { %v699_v34 = vpop.permute.xlu1 %698 }
 0x1ae   :  { %v730_v26 = vmax.f32 %v722_v22, 0.0  ;;  %v715_v61 = vadd.f32 %v699_v34, %v1227_v43 }
 0x1b0   :  { %739 = vst.msk [vmem:[%s1284_s3 + $0x30] sm:$0xff] %vm732_vm8, %v730_v26  ;;  %v723_v58 = vadd.f32 %v715_v61, %v1231_v19 }
 0x1b2   :  { %v731_v7 = vmax.f32 %v723_v58, 0.0 }
 0x1b4   :  { %740 = vst.msk [vmem:[%s1284_s3 + $0x38] sm:$0xff] %vm732_vm8, %v731_v7 }

// kernel: stgcn_forward.20
= control target key start
LH: loop header
LB: loop body
LE: loop exit
PB: predicated region body
PF: predicated region fallthrough
CT: control target
= control target key end

     0   :  { %vm302_vm0 = vcmask 1041408   ;;  %vm26_vm1 = vcmask 31744   ;;  %vm35_vm2 = vcmask 24576   ;;  %v1032_v1 = vmov 0   ;;  %s1034_s16 = smov 64   ;;  %s1454_s1 = inlined_call_operand.vmem [shape: bf16[3,4,192], index: 1, kind: input, shape index: {}]   ;;  %s1455_s0 = inlined_call_operand.vmem [shape: f32[8,8,4], index: 0, kind: input, shape index: {}]   ;;  %s1456_s2 = inlined_call_operand.vmem [shape: f32[1,192], index: 2, kind: input, shape index: {}]   ;;  %s1457_s3 = inlined_call_operand.vmem [shape: bf16[64,16], index: 3, kind: input, shape index: {}]   ;;  %s1458_s4 = inlined_call_operand.vmem [shape: f32[8,8,16], index: 4, kind: output, shape index: {}]  }
   0x1   :  { %v1063_v0 = vld.sshfl [vmem:[%s1454_s1] sm:$0x33 pattern:$0x76325410]  ;;  %341 = vmatprep.mubr.bf16.mxu0 %v1032_v1  ;;  %371 = vmatprep.mubr.bf16.mxu1 %v1032_v1  ;;  %v19_v3 = vld [vmem:[%s1455_s0 + $0x8] sm:$0xff]  ;;  %v24_v5 = vld [vmem:[%s1455_s0 + $0x30] sm:$0xff] }
   0x2   :  { %v18_v2 = vld [vmem:[%s1455_s0] sm:$0xff]  ;;  %28 = vst.msk [vmem:[#allocation2 + $0x11] sm:$0xff] %vm26_vm1, %v19_v3  ;;  %v925_v7 = vld.sshfl [vmem:[%s1454_s1 + $0x8] sm:$0x33 pattern:$0x76325410]  ;;  %v394_v11 = vcombine.high %v1063_v0, %v1063_v0 }
   0x3   :  { %v904_v4 = vld.sshfl [vmem:[%s1454_s1 + $0x4] sm:$0x33 pattern:$0x76325410]  ;;  %27 = vst.msk [vmem:[#allocation2 + $0x1] sm:$0xff] %vm26_vm1, %v18_v2  ;;  %v1033_v9 = vmov 0.0   ;;  %v508_v12 = vcombine.high %v925_v7, %v925_v7 }
   0x4   :  { %v289_v6 = vcombine.high %v904_v4, %v904_v4  ;;  %v304_v8 = vsel %vm302_vm0, %v904_v4, 0  ;;  %36 = vst.msk [vmem:[#allocation2] sm:$0x1] %vm35_vm2, %v1033_v9  ;;  %37 = vst.msk [vmem:[#allocation2 + $0x10] sm:$0x1] %vm35_vm2, %v1033_v9  ;;  %v25_v10 = vld [vmem:[%s1455_s0 + $0x38] sm:$0xff] }
   0x5   :  { %44 = vst.msk [vmem:[#allocation2 + $0x9] sm:$0x1] %vm35_vm2, %v1033_v9  ;;  %45 = vst.msk [vmem:[#allocation2 + $0x19] sm:$0x1] %vm35_vm2, %v1033_v9  ;;  %v20_v13 = vld [vmem:[%s1455_s0 + $0x10] sm:$0xff]  ;;  %v21_v14 = vld [vmem:[%s1455_s0 + $0x18] sm:$0xff] }
   0x6   :  { %38 = vst.msk [vmem:[#allocation2 + $0x20] sm:$0x1] %vm35_vm2, %v1033_v9  ;;  %39 = vst.msk [vmem:[#allocation2 + $0x30] sm:$0x1] %vm35_vm2, %v1033_v9  ;;  %905 = vmatprep.subr.msk.bf16.mxu0 %vm302_vm0, %v289_v6  ;;  %991 = vmatprep.subr.msk.bf16.mxu1 %vm302_vm0, %v289_v6  ;;  %v22_v15 = vld [vmem:[%s1455_s0 + $0x20] sm:$0xff]  ;;  %v23_v16 = vld [vmem:[%s1455_s0 + $0x28] sm:$0xff] }
   0x7   :  { %40 = vst.msk [vmem:[#allocation2 + $0x40] sm:$0x1] %vm35_vm2, %v1033_v9  ;;  %41 = vst.msk [vmem:[#allocation2 + $0x50] sm:$0x1] %vm35_vm2, %v1033_v9  ;;  %324 = vmatpush1.bf16.msra.mxu0 %v304_v8  ;;  %992 = vmatpush1.bf16.msra.mxu1 %v304_v8  ;;  %vm116_vm3 = vsmask.f32 3328 }
   0x8   :  { %42 = vst.msk [vmem:[#allocation2 + $0x60] sm:$0x1] %vm35_vm2, %v1033_v9  ;;  %43 = vst.msk [vmem:[#allocation2 + $0x70] sm:$0x1] %vm35_vm2, %v1033_v9  ;;  %926 = vmatprep.subr.msk.bf16.mxu0 %vm302_vm0, %v508_v12  ;;  %915 = vmatprep.subr.msk.bf16.mxu1 %vm302_vm0, %v394_v11  ;;  %vm117_vm4 = vsmask.f32 7440 }
   0x9   :  { %46 = vst.msk [vmem:[#allocation2 + $0x29] sm:$0x1] %vm35_vm2, %v1033_v9  ;;  %47 = vst.msk [vmem:[#allocation2 + $0x39] sm:$0x1] %vm35_vm2, %v1033_v9  ;;  %v522_v37 = vsel %vm302_vm0, %v925_v7, 0  ;;  %v1163_v38 = vsel %vm302_vm0, %v1063_v0, 0 }
   0xa   :  { %48 = vst.msk [vmem:[#allocation2 + $0x49] sm:$0x1] %vm35_vm2, %v1033_v9  ;;  %49 = vst.msk [vmem:[#allocation2 + $0x59] sm:$0x1] %vm35_vm2, %v1033_v9  ;;  %vm231_vm6 = vcmask 1042432   ;;  %vm232_vm7 = vcmask 1046532  }
   0xb   :  { %50 = vst.msk [vmem:[#allocation2 + $0x69] sm:$0x1] %vm35_vm2, %v1033_v9  ;;  %51 = vst.msk [vmem:[#allocation2 + $0x79] sm:$0x1] %vm35_vm2, %v1033_v9  ;;  %v1128_v17 = vld [vmem:[#allocation2] sm:$0xff]  ;;  %v1130_v19 = vld [vmem:[#allocation2 + $0x10] sm:$0xff] }
   0xc   :  { %33 = vst.msk [vmem:[#allocation2 + $0x61] sm:$0xff] %vm26_vm1, %v24_v5  ;;  %34 = vst.msk [vmem:[#allocation2 + $0x71] sm:$0xff] %vm26_vm1, %v25_v10  ;;  %v53_v18 = vld [vmem:[#allocation2 + $0x8] sm:$0x3]  ;;  %v55_v20 = vld [vmem:[#allocation2 + $0x18] sm:$0x3]  ;;  %v1134_v21 = vpack.c.bf16 %v1128_v17, %v1128_v17  ;;  %v1140_v23 = vpack.c.bf16 %v1130_v19, %v1130_v19 }
   0xd   :  { %29 = vst.msk [vmem:[#allocation2 + $0x21] sm:$0xff] %vm26_vm1, %v20_v13  ;;  %30 = vst.msk [vmem:[#allocation2 + $0x31] sm:$0xff] %vm26_vm1, %v21_v14  ;;  %v1136_v22 = vpack.c.bf16 %v53_v18, %v53_v18  ;;  %v1144_v26 = vpack.c.bf16 %v55_v20, %v55_v20  ;;  %vm784_vm9 = vcmask 523264   ;;  %vm862_vm10 = vcmask 130048  }
   0xe   :  { %31 = vst.msk [vmem:[#allocation2 + $0x41] sm:$0xff] %vm26_vm1, %v22_v15  ;;  %32 = vst.msk [vmem:[#allocation2 + $0x51] sm:$0xff] %vm26_vm1, %v23_v16  ;;  %v120_v30 = vshrl.u32 %v1134_v21, 16  ;;  %v123_v31 = vshll.u32 %v1134_v21, 16  ;;  %v134_v33 = vshrl.u32 %v1140_v23, 16  ;;  %v137_v35 = vshll.u32 %v1140_v23, 16 }
   0xf   :  { %v129_v32 = vshll.u32 %v1136_v22, 16  ;;  %v143_v36 = vshll.u32 %v1144_v26, 16  ;;  %vm1178_vm5 = vmor %vm116_vm3, %vm117_vm4 }
  0x10   :  { %v122_v39 = vrot.slane %v120_v30, 4  ;;  %v125_v40 = vrot.slane %v123_v31, 5  ;;  %v136_v42 = vrot.slane %v134_v33, 4  ;;  %v139_v43 = vrot.slane %v137_v35, 5  ;;  %vm1260_vm8 = vmor %vm231_vm6, %vm232_vm7 }
  0x11   :  { %v131_v41 = vrot.slane %v129_v32, 5  ;;  %v145_v44 = vrot.slane %v143_v36, 5 }
  0x12   :  { %v126_v47 = vor.u32 %v125_v40, %v122_v39  ;;  %v140_v53 = vor.u32 %v139_v43, %v136_v42 }
  0x13   :  { %v1142_v24 = vld [vmem:[#allocation2 + $0x60] sm:$0xff]  ;;  %v65_v25 = vld [vmem:[#allocation2 + $0x68] sm:$0x3]  ;;  %v1146_v27 = vld [vmem:[#allocation2 + $0x70] sm:$0xff] }
  0x14   :  { %v1150_v28 = vpack.c.bf16 %v1142_v24, %v1142_v24  ;;  %v1152_v29 = vpack.c.bf16 %v65_v25, %v65_v25  ;;  %v67_v34 = vld [vmem:[#allocation2 + $0x78] sm:$0x3]  ;;  %v1167_v45 = vpack.c.bf16 %v1146_v27, %v1146_v27  ;;  %v1174_v51 = vld [vmem:[#allocation2 + $0x20] sm:$0xff]  ;;  %v57_v57 = vld [vmem:[#allocation2 + $0x28] sm:$0x3]  ;;  %v127_v59 = vrot.slane %v126_v47, 4 }
  0x15   :  { %v1169_v46 = vpack.c.bf16 %v67_v34, %v67_v34  ;;  %v1185_v58 = vld [vmem:[#allocation2 + $0x30] sm:$0xff]  ;;  %v59_v63 = vld [vmem:[#allocation2 + $0x38] sm:$0x3]  ;;  %v141_v0 = vrot.slane %v140_v53, 4  ;;  %v1191_v7 = vpack.c.bf16 %v1174_v51, %v1174_v51  ;;  %v1193_v8 = vpack.c.bf16 %v57_v57, %v57_v57  ;;  %v1205_v18 = vld [vmem:[#allocation2 + $0x40] sm:$0xff] }
  0x16   :  { %v204_v48 = vshrl.u32 %v1150_v28, 16  ;;  %v207_v49 = vshll.u32 %v1150_v28, 16  ;;  %v213_v50 = vshll.u32 %v1152_v29, 16  ;;  %v218_v54 = vshrl.u32 %v1167_v45, 16  ;;  %v61_v32 = vld [vmem:[#allocation2 + $0x48] sm:$0x3] }
  0x17   :  { %v221_v55 = vshll.u32 %v1167_v45, 16  ;;  %v227_v56 = vshll.u32 %v1169_v46, 16  ;;  %v132_v5 = vsel %vm1178_vm5, %v127_v59, %v131_v41  ;;  %v146_v9 = vsel %vm1178_vm5, %v141_v0, %v145_v44  ;;  %v1214_v39 = vld [vmem:[#allocation2 + $0x50] sm:$0xff]  ;;  %v63_v40 = vld [vmem:[#allocation2 + $0x58] sm:$0x3] }
  0x18   :  { %v206_v60 = vrot.slane %v204_v48, 4  ;;  %v209_v61 = vrot.slane %v207_v49, 5  ;;  %v215_v62 = vrot.slane %v213_v50, 5  ;;  %v220_v2 = vrot.slane %v218_v54, 4 }
  0x19   :  { %v223_v3 = vrot.slane %v221_v55, 5  ;;  %v229_v4 = vrot.slane %v227_v56, 5  ;;  %v1199_v11 = vpack.c.bf16 %v1185_v58, %v1185_v58  ;;  %v1201_v12 = vpack.c.bf16 %v59_v63, %v59_v63 }
  0x1a   :  { %v210_v6 = vor.u32 %v209_v61, %v206_v60  ;;  %v900_v13 = vcombine.low %v132_v5, %v146_v9  ;;  %v148_v15 = vshrl.u32 %v1191_v7, 16  ;;  %v151_v16 = vshll.u32 %v1191_v7, 16 }
  0x1b   :  { %v224_v10 = vor.u32 %v223_v3, %v220_v2  ;;  %v157_v25 = vshll.u32 %v1193_v8, 16  ;;  %v162_v30 = vshrl.u32 %v1199_v11, 16  ;;  %v165_v31 = vshll.u32 %v1199_v11, 16 }
  0x1c   :  { %v211_v14 = vrot.slane %v210_v6, 4  ;;  %906 = vmatmul.mubr.msk.bf16.vlgmr.msra.gmra.mxu0 %vm26_vm1, %v900_v13  ;;  %v150_v34 = vrot.slane %v148_v15, 4  ;;  %v153_v35 = vrot.slane %v151_v16, 5  ;;  %v171_v36 = vshll.u32 %v1201_v12, 16 }
  0x1d   :  { %v225_v20 = vrot.slane %v224_v10, 4  ;;  %542 = vmatpush1.bf16.msra.mxu0 %v522_v37  ;;  %351 = vmatprep.mubr.bf16.mxu0 %v1032_v1  ;;  %v159_v42 = vrot.slane %v157_v25, 5  ;;  %v164_v43 = vrot.slane %v162_v30, 4  ;;  %v167_v44 = vrot.slane %v165_v31, 5 }
  0x1e   :  { %v216_v33 = vsel %vm1178_vm5, %v211_v14, %v215_v62  ;;  %v154_v48 = vor.u32 %v153_v35, %v150_v34  ;;  %v173_v49 = vrot.slane %v171_v36, 5  ;;  %v1221_v50 = vpack.c.bf16 %v1205_v18, %v1205_v18 }
  0x1f   :  { %v230_v41 = vsel %vm1178_vm5, %v225_v20, %v229_v4  ;;  %v168_v53 = vor.u32 %v167_v44, %v164_v43  ;;  %v1223_v54 = vpack.c.bf16 %v61_v32, %v61_v32  ;;  %v1227_v55 = vpack.c.bf16 %v1214_v39, %v1214_v39 }
  0x20   :  { %v903_v47 = vcombine.low %v216_v33, %v230_v41  ;;  %v1229_v37 = vpack.c.bf16 %v63_v40, %v63_v40  ;;  %v155_v56 = vrot.slane %v154_v48, 4  ;;  %v176_v57 = vshrl.u32 %v1221_v50, 16 }
  0x21   :  { %v179_v59 = vshll.u32 %v1221_v50, 16  ;;  %v169_v60 = vrot.slane %v168_v53, 4  ;;  %v185_v61 = vshll.u32 %v1223_v54, 16  ;;  %v190_v62 = vshrl.u32 %v1227_v55, 16 }
  0x22   :  { %909 = vmatmul.mubr.msk.bf16.vlgmr.msra.gmra.mxu1 %vm26_vm1, %v903_v47  ;;  %v193_v63 = vshll.u32 %v1227_v55, 16  ;;  %v160_v0 = vsel %vm1178_vm5, %v155_v56, %v159_v42  ;;  %v178_v2 = vrot.slane %v176_v57, 4  ;;  %v199_v4 = vshll.u32 %v1229_v37, 16 }
  0x23   :  { %428 = vmatpush1.bf16.msra.mxu1 %v1163_v38  ;;  %445 = vmatprep.mubr.bf16.mxu1 %v1032_v1  ;;  %v181_v3 = vrot.slane %v179_v59, 5  ;;  %v174_v5 = vsel %vm1178_vm5, %v169_v60, %v173_v49  ;;  %v192_v38 = vrot.slane %v190_v62, 4  ;;  %v963_v10 = vpack.c.bf16 %v1130_v19, %v1128_v17 }
  0x24   :  { %v195_v6 = vrot.slane %v193_v63, 5  ;;  %v901_v9 = vcombine.low %v160_v0, %v174_v5  ;;  %v187_v14 = vrot.slane %v185_v61, 5  ;;  %v201_v16 = vrot.slane %v199_v4, 5 }
  0x25   :  { %v182_v13 = vor.u32 %v181_v3, %v178_v2  ;;  %v236_v31 = vrot.slane %v1136_v22, 5  ;;  %v240_v32 = vrot.slane %v1144_v26, 5  ;;  %v891_v33 = vrot.slane %v1134_v21, 9 }
  0x26   :  { %v196_v15 = vor.u32 %v195_v6, %v192_v38  ;;  %907 = vmatmul.mubr.msk.bf16.gmra.mxu0 %vm26_vm1, %v901_v9  ;;  %v892_v34 = vrot.slane %v1140_v23, 9  ;;  %v964_v35 = vpack.c.bf16 %v1185_v58, %v1174_v51  ;;  %v893_v23 = vrot.slane %v1191_v7, 9 }
  0x27   :  { %v183_v20 = vrot.slane %v182_v13, 4  ;;  %361 = vmatprep.mubr.bf16.mxu0 %v1032_v1  ;;  %v237_v22 = vsel %vm1260_vm8, %v891_v33, %v236_v31  ;;  %v244_v51 = vrot.slane %v1193_v8, 5  ;;  %v894_v52 = vrot.slane %v1199_v11, 9 }
  0x28   :  { %v197_v25 = vrot.slane %v196_v15, 4  ;;  %v241_v26 = vsel %vm1260_vm8, %v892_v34, %v240_v32  ;;  %v248_v58 = vrot.slane %v1201_v12, 5  ;;  %v965_v40 = vpack.c.bf16 %v1214_v39, %v1205_v18 }
  0x29   :  { %v188_v30 = vsel %vm1178_vm5, %v183_v20, %v187_v14  ;;  %v921_v21 = vcombine.low %v237_v22, %v241_v26  ;;  %v245_v41 = vsel %vm1260_vm8, %v893_v23, %v244_v51  ;;  %v895_v8 = vrot.slane %v1221_v50, 9 }
  0x2a   :  { %916 = vmatmul.mubr.msk.bf16.vlgmr.msra.gmra.mxu1 %vm26_vm1, %v963_v10  ;;  %v202_v17 = vsel %vm1178_vm5, %v197_v25, %v201_v16  ;;  %v249_v42 = vsel %vm1260_vm8, %v894_v52, %v248_v58  ;;  %v252_v11 = vrot.slane %v1223_v54, 5  ;;  %v896_v12 = vrot.slane %v1227_v55, 9 }
  0x2b   :  { %455 = vmatprep.mubr.bf16.mxu1 %v1032_v1  ;;  %v902_v19 = vcombine.low %v188_v30, %v202_v17  ;;  %v922_v7 = vcombine.low %v245_v41, %v249_v42  ;;  %v256_v18 = vrot.slane %v1229_v37, 5  ;;  %v966_v39 = vpack.c.bf16 %v1146_v27, %v1142_v24 }
  0x2c   :  { %v253_v43 = vsel %vm1260_vm8, %v895_v8, %v252_v11  ;;  %v897_v48 = vrot.slane %v1150_v28, 9  ;;  %v260_v49 = vrot.slane %v1152_v29, 5  ;;  %v898_v50 = vrot.slane %v1167_v45, 9  ;;  %v616_v45 = vld [vmem:[%s1456_s2] sm:$0x3] }
  0x2d   :  { %v257_v44 = vsel %vm1260_vm8, %v896_v12, %v256_v18  ;;  %v264_v24 = vrot.slane %v1169_v46, 5  ;;  %v618_v28 = vlaneseq }
  0x2e   :  { %908 = vmatmul.mubr.msk.bf16.gmra.mxu0 %vm26_vm1, %v902_v19  ;;  %v923_v47 = vcombine.low %v253_v43, %v257_v44  ;;  %v261_v27 = vsel %vm1260_vm8, %v897_v48, %v260_v49 }
  0x2f   :  { %559 = vmatprep.mubr.bf16.mxu0 %v1032_v1  ;;  %v265_v53 = vsel %vm1260_vm8, %v898_v50, %v264_v24  ;;  %v619_v55 = vshrl.u32 %v618_v28, 7 }
  0x30   :  { %v924_v54 = vcombine.low %v261_v27, %v265_v53 }
  0x31   :  { %v624_v29 = vsub.s32 1, %v619_v55  ;;  %v620_v20 = vsub.s32 0, %v619_v55 }
  0x32   :  { %917 = vmatmul.mubr.msk.bf16.gmra.mxu1 %vm26_vm1, %v964_v35 }
  0x33   :  { %465 = vmatprep.mubr.bf16.mxu1 %v1032_v1  ;;  %v1313_v46 = vrot.slane %v616_v45, %v624_v29  ;;  %v1324_v33 = vrot.slane %v616_v45, %v620_v20 }
  0x36   :  { %927 = vmatmul.mubr.msk.bf16.vlgmr.msra.gmra.mxu0 %vm26_vm1, %v921_v21 }
  0x37   :  { %569 = vmatprep.mubr.bf16.mxu0 %v1032_v1 }
  0x3a   :  { %918 = vmatmul.mubr.msk.bf16.gmra.mxu1 %vm26_vm1, %v965_v40 }
  0x3b   :  { %475 = vmatprep.mubr.bf16.mxu1 %v1032_v1 }
  0x3e   :  { %928 = vmatmul.mubr.msk.bf16.gmra.mxu0 %vm26_vm1, %v922_v7 }
  0x3f   :  { %579 = vmatprep.mubr.bf16.mxu0 %v1032_v1 }
  0x42   :  { %919 = vmatmul.mubr.msk.bf16.gmra.mxu1 %vm26_vm1, %v966_v39 }
  0x46   :  { %929 = vmatmul.mubr.msk.bf16.gmra.mxu0 %vm26_vm1, %v923_v47 }
  0x47   :  { %589 = vmatprep.mubr.bf16.mxu0 %v1032_v1  ;;  %v996_v1 = vld [vmem:[%s1457_s3 + $0x18] sm:$0xff]  }
  0x48   :  { %975 = vmatprep.subr.bf16.mxu1 %v996_v1 }
  0x49   :  { %976 = vmatpush3.bf16.msra.mxu1 %v996_v1 }
  0x4e   :  { %930 = vmatmul.mubr.msk.bf16.gmra.mxu0 %vm26_vm1, %v924_v54 }
  0xdc   :  { %v343_v37 = vpop.f32.mrf.mxu0 }
  0xde   :  { %v345_v56 = vpop.f32.mrf.mxu0 }
  0xe0   :  { %v347_v59 = vpop.f32.mrf.mxu0 }
  0xe2   :  { %v1318_v57 = vpop.f32.mrf.mxu1  ;;  %v349_v61 = vpop.f32.mrf.mxu0 }
  0xe4   :  { %v375_v60 = vpop.f32.mrf.mxu1 }
  0xe6   :  { %v1320_v62 = vpop.f32.mrf.mxu1  ;;  %v353_v0 = vpop.f32.mrf.mxu0 }
  0xe8   :  { %v1322_v63 = vpop.f32.mrf.mxu1  ;;  %v355_v3 = vpop.f32.mrf.mxu0 }
  0xea   :  { %v447_v2 = vpop.f32.mrf.mxu1  ;;  %v357_v5 = vpop.f32.mrf.mxu0 }
  0xeb   :  { %v448_v32 = vadd.f32 %v447_v2, %v343_v37 }
  0xec   :  { %v449_v4 = vpop.f32.mrf.mxu1  ;;  %v359_v9 = vpop.f32.mrf.mxu0 }
  0xed   :  { %v450_v38 = vadd.f32 %v449_v4, %v345_v56 }
  0xee   :  { %v451_v6 = vpop.f32.mrf.mxu1  ;;  %v363_v13 = vpop.f32.mrf.mxu0 }
  0xef   :  { %v452_v23 = vadd.f32 %v451_v6, %v347_v59 }
  0xf0   :  { %v453_v10 = vpop.f32.mrf.mxu1  ;;  %v365_v16 = vpop.f32.mrf.mxu0 }
  0xf1   :  { %v454_v14 = vadd.f32 %v453_v10, %v349_v61 }
  0xf2   :  { %v457_v15 = vpop.f32.mrf.mxu1  ;;  %v367_v30 = vpop.f32.mrf.mxu0 }
  0xf3   :  { %v458_v18 = vadd.f32 %v457_v15, %v353_v0 }
  0xf4   :  { %v459_v25 = vpop.f32.mrf.mxu1  ;;  %v369_v31 = vpop.f32.mrf.mxu0 }
  0xf5   :  { %v460_v17 = vadd.f32 %v459_v25, %v355_v3 }
  0xf6   :  { %v461_v19 = vpop.f32.mrf.mxu1  ;;  %v561_v35 = vpop.f32.mrf.mxu0 }
  0xf7   :  { %v600_v22 = vadd.f32 %v561_v35, %v448_v32  ;;  %v462_v54 = vadd.f32 %v461_v19, %v357_v5 }
  0xf8   :  { %v463_v34 = vpop.f32.mrf.mxu1  ;;  %v563_v21 = vpop.f32.mrf.mxu0 }
  0xf9   :  { %v464_v36 = vadd.f32 %v463_v34, %v359_v9  ;;  %v1327_v51 = vadd.f32 %v1324_v33, %v600_v22  ;;  %v601_v52 = vadd.f32 %v563_v21, %v450_v38 }
  0xfa   :  { %v467_v26 = vpop.f32.mrf.mxu1  ;;  %v565_v40 = vpop.f32.mrf.mxu0 }
  0xfb   :  { %v931_v41 = vmul.f32 -1.442695, %v1327_v51  ;;  %v1331_v7 = vadd.f32 %v1313_v46, %v601_v52  ;;  %v602_v8 = vadd.f32 %v565_v40, %v452_v23  ;;  %v468_v0 = vadd.f32 %v467_v26, %v363_v13 }
  0xfc   :  { %v469_v58 = vpop.f32.mrf.mxu1  ;;  %v567_v12 = vpop.f32.mrf.mxu0 }
  0xfd   :  { %v470_v42 = vadd.f32 %v469_v58, %v365_v16  ;;  %1000 = vpow2.f32 %v931_v41  ;;  %v1334_v39 = vadd.f32 %v1324_v33, %v602_v8  ;;  %v603_v43 = vadd.f32 %v567_v12, %v454_v14  ;;  %v997_v12 = vld [vmem:[%s1457_s3 + $0x10] sm:$0xff]  }
  0xfe   :  { %v471_v11 = vpop.f32.mrf.mxu1  ;;  %v571_v47 = vpop.f32.mrf.mxu0  ;;  %977 = vmatprep.subr.bf16.mxu1 %v997_v12 }
  0xff   :  { %v932_v48 = vmul.f32 -1.442695, %v1334_v39  ;;  %v1338_v50 = vadd.f32 %v1313_v46, %v603_v43  ;;  %v604_v24 = vadd.f32 %v571_v47, %v458_v18  ;;  %978 = vmatpush3.bf16.msra.mxu1 %v997_v12 }
 0x100   :  { %v473_v44 = vpop.f32.mrf.mxu1  ;;  %v573_v53 = vpop.f32.mrf.mxu0 }
 0x101   :  { %v474_v49 = vadd.f32 %v473_v44, %v369_v31  ;;  %1002 = vpow2.f32 %v932_v48  ;;  %v1341_v28 = vadd.f32 %v1324_v33, %v604_v24  ;;  %v605_v55 = vadd.f32 %v573_v53, %v460_v17 }
 0x102   :  { %v477_v27 = vpop.f32.mrf.mxu1  ;;  %v575_v45 = vpop.f32.mrf.mxu0 }
 0x103   :  { %v933_v1 = vmul.f32 -1.442695, %v1341_v28  ;;  %v1345_v56 = vadd.f32 %v1313_v46, %v605_v55  ;;  %v606_v59 = vadd.f32 %v575_v45, %v462_v54  ;;  %v478_v32 = vadd.f32 %v477_v27, %v1318_v57  ;;  %v998_v55 = vld [vmem:[%s1457_s3 + $0x8] sm:$0xff]  }
 0x104   :  { %v479_v29 = vpop.f32.mrf.mxu1  ;;  %v577_v61 = vpop.f32.mrf.mxu0  ;;  %979 = vmatprep.subr.bf16.mxu1 %v998_v55 }
 0x105   :  { %v480_v37 = vadd.f32 %v479_v29, %v375_v60  ;;  %1004 = vpow2.f32 %v933_v1  ;;  %v1348_v2 = vadd.f32 %v1324_v33, %v606_v59  ;;  %v607_v3 = vadd.f32 %v577_v61, %v464_v36  ;;  %980 = vmatpush3.bf16.msra.mxu1 %v998_v55 }
 0x106   :  { %v581_v4 = vpop.f32.mrf.mxu0  ;;  %v472_v60 = vadd.f32 %v471_v11, %v367_v30  ;;  %v481_v20 = vpop.f32.mrf.mxu1 }
 0x107   :  { %v934_v5 = vmul.f32 -1.442695, %v1348_v2  ;;  %v1352_v38 = vadd.f32 %v1313_v46, %v607_v3  ;;  %v608_v6 = vadd.f32 %v581_v4, %v468_v0  ;;  %v482_v40 = vadd.f32 %v481_v20, %v1320_v62 }
 0x108   :  { %v583_v9 = vpop.f32.mrf.mxu0  ;;  %v483_v26 = vpop.f32.mrf.mxu1 }
 0x109   :  { %1006 = vpow2.f32 %v934_v5  ;;  %v1355_v10 = vadd.f32 %v1324_v33, %v608_v6  ;;  %v609_v14 = vadd.f32 %v583_v9, %v470_v42  ;;  %v484_v8 = vadd.f32 %v483_v26, %v1322_v63 }
 0x10a   :  { %v1001_v13 = vpop.eup %1000  ;;  %v585_v15 = vpop.f32.mrf.mxu0 }
 0x10b   :  { %v668_v16 = vadd.f32 1.0, %v1001_v13  ;;  %v935_v25 = vmul.f32 -1.442695, %v1355_v10  ;;  %v1359_v17 = vadd.f32 %v1313_v46, %v609_v14  ;;  %v610_v19 = vadd.f32 %v585_v15, %v472_v60 }
 0x10c   :  { %v587_v31 = vpop.f32.mrf.mxu0 }
 0x10d   :  { %1008 = vrcp.f32 %v668_v16  ;;  %v1363_v30 = vadd.f32 %v1324_v33, %v610_v19  ;;  %v611_v34 = vadd.f32 %v587_v31, %v474_v49 }
 0x10e   :  { %v1003_v35 = vpop.eup %1002  ;;  %1010 = vpow2.f32 %v935_v25  ;;  %v591_v36 = vpop.f32.mrf.mxu0 }
 0x10f   :  { %v669_v22 = vadd.f32 1.0, %v1003_v35  ;;  %v936_v21 = vmul.f32 -1.442695, %v1363_v30  ;;  %v1367_v23 = vadd.f32 %v1313_v46, %v611_v34  ;;  %v612_v52 = vadd.f32 %v591_v36, %v478_v32 }
 0x110   :  { %v593_v58 = vpop.f32.mrf.mxu0 }
 0x111   :  { %1012 = vrcp.f32 %v669_v22  ;;  %v1371_v57 = vadd.f32 %v1324_v33, %v612_v52  ;;  %v613_v41 = vadd.f32 %v593_v58, %v480_v37 }
 0x112   :  { %v1005_v42 = vpop.eup %1004  ;;  %1014 = vpow2.f32 %v936_v21  ;;  %v595_v11 = vpop.f32.mrf.mxu0 }
 0x113   :  { %v670_v18 = vadd.f32 1.0, %v1005_v42  ;;  %v937_v43 = vmul.f32 -1.442695, %v1371_v57  ;;  %v1379_v44 = vadd.f32 %v1313_v46, %v613_v41  ;;  %v614_v62 = vadd.f32 %v595_v11, %v482_v40 }
 0x114   :  { %v597_v47 = vpop.f32.mrf.mxu0 }
 0x115   :  { %1016 = vrcp.f32 %v670_v18  ;;  %v1382_v48 = vadd.f32 %v1324_v33, %v614_v62  ;;  %v615_v63 = vadd.f32 %v597_v47, %v484_v8 }
 0x116   :  { %v1007_v49 = vpop.eup %1006  ;;  %1018 = vpow2.f32 %v937_v43 }
 0x117   :  { %v671_v24 = vadd.f32 1.0, %v1007_v49  ;;  %v938_v27 = vmul.f32 -1.442695, %v1382_v48  ;;  %v1386_v53 = vadd.f32 %v1313_v46, %v615_v63  ;;  %v999_v46 = vld [vmem:[%s1457_s3] sm:$0xff]  }
 0x118   :  { %981 = vmatprep.subr.bf16.mxu1 %v999_v46 }
 0x119   :  { %1020 = vrcp.f32 %v671_v24  ;;  %982 = vmatpush3.bf16.msra.mxu1 %v999_v46 }
 0x11a   :  { %v1009_v54 = vpop.eup %1008  ;;  %1022 = vpow2.f32 %v938_v27 }
 0x11b   :  { %v1011_v29 = vpop.eup %1010  ;;  %700 = vrot.lane.b32.xlu0 %v1009_v54, %s1034_s16 }
 0x11c   :  { %v672_v33 = vadd.f32 1.0, %v1011_v29 }
 0x11e   :  { %v1013_v45 = vpop.eup %1012  ;;  %1024 = vrcp.f32 %v672_v33 }
 0x11f   :  { %v1015_v1 = vpop.eup %1014  ;;  %702 = vrot.lane.b32.xlu0 %v1013_v45, %s1034_s16 }
 0x120   :  { %v673_v37 = vadd.f32 1.0, %v1015_v1 }
 0x122   :  { %v1017_v59 = vpop.eup %1016  ;;  %1026 = vrcp.f32 %v673_v37 }
 0x123   :  { %v1019_v61 = vpop.eup %1018  ;;  %704 = vrot.lane.b32.xlu1 %v1017_v59, %s1034_s16 }
 0x124   :  { %v674_v0 = vadd.f32 1.0, %v1019_v61 }
 0x126   :  { %v1021_v3 = vpop.eup %1020  ;;  %1028 = vrcp.f32 %v674_v0 }
 0x127   :  { %v1023_v4 = vpop.eup %1022  ;;  %706 = vrot.lane.b32.xlu1 %v1021_v3, %s1034_s16 }
 0x128   :  { %v675_v5 = vadd.f32 1.0, %v1023_v4 }
 0x12a   :  { %1030 = vrcp.f32 %v675_v5 }
 0x12b   :  { %v1025_v6 = vpop.eup %1024 }
 0x12c   :  { %708 = vrot.lane.b32.xlu0 %v1025_v6, %s1034_s16 }
 0x12f   :  { %v1027_v9 = vpop.eup %1026 }
 0x130   :  { %710 = vrot.lane.b32.xlu1 %v1027_v9, %s1034_s16 }
 0x133   :  { %v1029_v60 = vpop.eup %1028 }
 0x134   :  { %712 = vrot.lane.b32.xlu0 %v1029_v60, %s1034_s16 }
 0x137   :  { %v1031_v14 = vpop.eup %1030 }
 0x138   :  { %714 = vrot.lane.b32.xlu1 %v1031_v14, %s1034_s16 }
 0x18d   :  { %v701_v13 = vpop.permute.xlu0 %700 }
 0x18e   :  { %v724_v15 = vadd.f32 %v701_v13, %v1327_v51 }
 0x190   :  { %v732_v20 = vadd.f32 %v724_v15, %v1331_v7 }
 0x191   :  { %v703_v16 = vpop.permute.xlu0 %702 }
 0x192   :  { %v725_v25 = vadd.f32 %v703_v16, %v1334_v39  ;;  %v740_v32 = vmax.f32 %v732_v20, 0.0 }
 0x194   :  { %v733_v19 = vadd.f32 %v725_v25, %v1338_v50 }
 0x195   :  { %v705_v31 = vpop.permute.xlu1 %704 }
 0x196   :  { %v741_v34 = vmax.f32 %v733_v19, 0.0  ;;  %v726_v35 = vadd.f32 %v705_v31, %v1341_v28 }
 0x198   :  { %v748_v36 = vpack.c.bf16 %v741_v34, %v740_v32  ;;  %v734_v26 = vadd.f32 %v726_v35, %v1345_v56 }
 0x199   :  { %v707_v22 = vpop.permute.xlu1 %706 }
 0x19a   :  { %v727_v21 = vadd.f32 %v707_v22, %v1348_v2  ;;  %983 = vmatprep.mubr.msk.bf16.mxu1 %vm784_vm9, %v748_v36  ;;  %v742_v7 = vmax.f32 %v734_v26, 0.0 }
 0x19c   :  { %v735_v51 = vadd.f32 %v727_v21, %v1352_v38 }
 0x19e   :  { %v743_v39 = vmax.f32 %v735_v51, 0.0  ;;  %v709_v52 = vpop.permute.xlu0 %708 }
 0x19f   :  { %v728_v50 = vadd.f32 %v709_v52, %v1355_v10 }
 0x1a0   :  { %v749_v58 = vpack.c.bf16 %v743_v39, %v742_v7 }
 0x1a1   :  { %v736_v28 = vadd.f32 %v728_v50, %v1359_v17 }
 0x1a2   :  { %v711_v40 = vpop.permute.xlu1 %710  ;;  %984 = vmatmul.mubr.msk.bf16.vlgmr.msra.gmra.mxu1 %vm784_vm9, %v749_v58 }
 0x1a3   :  { %v729_v41 = vadd.f32 %v711_v40, %v1363_v30  ;;  %v744_v42 = vmax.f32 %v736_v28, 0.0 }
 0x1a5   :  { %v737_v56 = vadd.f32 %v729_v41, %v1367_v23 }
 0x1a6   :  { %v713_v2 = vpop.permute.xlu0 %712 }
 0x1a7   :  { %v745_v8 = vmax.f32 %v737_v56, 0.0  ;;  %v730_v38 = vadd.f32 %v713_v2, %v1371_v57 }
 0x1a9   :  { %v750_v11 = vpack.c.bf16 %v745_v8, %v744_v42  ;;  %v738_v18 = vadd.f32 %v730_v38, %v1379_v44 }
 0x1aa   :  { %v715_v12 = vpop.permute.xlu1 %714 }
 0x1ab   :  { %v731_v10 = vadd.f32 %v715_v12, %v1382_v48  ;;  %987 = vmatprep.mubr.msk.bf16.mxu1 %vm784_vm9, %v750_v11  ;;  %v746_v17 = vmax.f32 %v738_v18, 0.0 }
 0x1ad   :  { %v739_v43 = vadd.f32 %v731_v10, %v1386_v53 }
 0x1af   :  { %v747_v62 = vmax.f32 %v739_v43, 0.0 }
 0x1b1   :  { %v751_v30 = vpack.c.bf16 %v747_v62, %v746_v17 }
 0x1b3   :  { %988 = vmatmul.mubr.msk.bf16.gmra.mxu1 %vm784_vm9, %v751_v30 }
 0x262   :  { %v985_v23 = vpop.f32.mrf.mxu1 }
 0x263   :  { %865 = vst.msk [vmem:[%s1458_s4 + $0x10] sm:$0xff] %vm862_vm10, %v985_v23 }
 0x264   :  { %v831_v57 = vpop.f32.mrf.mxu1 }
 0x265   :  { %863 = vst.msk [vmem:[%s1458_s4] sm:$0xff] %vm862_vm10, %v831_v57 }
 0x266   :  { %v986_v44 = vpop.f32.mrf.mxu1 }
 0x267   :  { %866 = vst.msk [vmem:[%s1458_s4 + $0x18] sm:$0xff] %vm862_vm10, %v986_v44 }
 0x268   :  { %v834_v47 = vpop.f32.mrf.mxu1 }
 0x269   :  { %864 = vst.msk [vmem:[%s1458_s4 + $0x8] sm:$0xff] %vm862_vm10, %v834_v47 }
 0x273   :  { %v989_v48 = vpop.f32.mrf.mxu1 }
 0x274   :  { %869 = vst.msk [vmem:[%s1458_s4 + $0x30] sm:$0xff] %vm862_vm10, %v989_v48 }
 0x275   :  { %v847_v63 = vpop.f32.mrf.mxu1 }
 0x276   :  { %867 = vst.msk [vmem:[%s1458_s4 + $0x20] sm:$0xff] %vm862_vm10, %v847_v63 }
 0x277   :  { %v990_v49 = vpop.f32.mrf.mxu1 }
 0x278   :  { %870 = vst.msk [vmem:[%s1458_s4 + $0x38] sm:$0xff] %vm862_vm10, %v990_v49 }
 0x279   :  { %v850_v24 = vpop.f32.mrf.mxu1 }
 0x27a   :  { %868 = vst.msk [vmem:[%s1458_s4 + $0x28] sm:$0xff] %vm862_vm10, %v850_v24 }

// kernel: stgcn_forward.33
= control target key start
LH: loop header
LB: loop body
LE: loop exit
PB: predicated region body
PF: predicated region fallthrough
CT: control target
= control target key end

     0   :  { %v226_v1 = vmov 0   ;;  %vm87_vm0 = vcmask 523264   ;;  %v37_v21 = vlaneseq  ;;  %s346_s1 = inlined_call_operand.vmem [shape: bf16[64,256], index: 1, kind: input, shape index: {}]   ;;  %s347_s0 = inlined_call_operand.vmem [shape: f32[64,64], index: 0, kind: input, shape index: {}]   ;;  %s348_s2 = inlined_call_operand.vmem [shape: f32[1,256], index: 2, kind: input, shape index: {}]   ;;  %s349_s3 = inlined_call_operand.vmem [shape: f32[64,256], index: 3, kind: output, shape index: {}]  }
   0x1   :  { %v214_v0 = vld [vmem:[%s346_s1 + $0x34] ss:$8 sps:$4 sm:$0xff]   ;;  %132 = vmatprep.mubr.bf16.mxu0 %v226_v1  ;;  %152 = vmatprep.mubr.bf16.mxu1 %v226_v1  ;;  %v216_v2 = vld [vmem:[%s346_s1 + $0x30] ss:$8 sps:$4 sm:$0xff]   ;;  %v217_v3 = vld [vmem:[%s346_s1 + $0x24] ss:$8 sps:$4 sm:$0xff]  }
   0x2   :  { %108 = vmatprep.subr.bf16.mxu0 %v214_v0  ;;  %205 = vmatprep.subr.bf16.mxu1 %v214_v0  ;;  %v219_v4 = vld [vmem:[%s346_s1 + $0x20] ss:$8 sps:$4 sm:$0xff]   ;;  %v220_v5 = vld [vmem:[%s346_s1 + $0x14] ss:$8 sps:$4 sm:$0xff]   ;;  %v222_v6 = vld [vmem:[%s346_s1 + $0x10] ss:$8 sps:$4 sm:$0xff]  }
   0x3   :  { %109 = vmatpush1.bf16.msra.mxu0 %v216_v2  ;;  %209 = vmatpush1.bf16.msra.mxu1 %v216_v2  ;;  %v223_v7 = vld [vmem:[%s346_s1 + $0x4] ss:$8 sps:$4 sm:$0xff]   ;;  %v225_v8 = vld [vmem:[%s346_s1] ss:$8 sps:$4 sm:$0xff]   ;;  %v17_v15 = vld [vmem:[%s347_s0 + $0x10] sm:$0xff]  ;;  %v38_v22 = vshrl.u32 %v37_v21, 7 }
   0x4   :  { %110 = vmatprep.subr.bf16.mxu0 %v217_v3  ;;  %206 = vmatprep.subr.bf16.mxu1 %v217_v3  ;;  %v15_v9 = vld [vmem:[%s347_s0] sm:$0xff]  ;;  %v16_v10 = vld [vmem:[%s347_s0 + $0x8] sm:$0xff]  ;;  %v18_v16 = vld [vmem:[%s347_s0 + $0x18] sm:$0xff] }
   0x5   :  { %v19_v11 = vld [vmem:[%s347_s0 + $0x20] sm:$0xff]  ;;  %v20_v12 = vld [vmem:[%s347_s0 + $0x28] sm:$0xff]  ;;  %v23_v13 = vpack.c.bf16 %v16_v10, %v15_v9  ;;  %v21_v17 = vld [vmem:[%s347_s0 + $0x30] sm:$0xff]  ;;  %v24_v19 = vpack.c.bf16 %v18_v16, %v17_v15  ;;  %v39_v23 = vsub.s32 0, %v38_v22  ;;  %v43_v25 = vsub.s32 1, %v38_v22 }
   0x6   :  { %v25_v14 = vpack.c.bf16 %v20_v12, %v19_v11  ;;  %v22_v18 = vld [vmem:[%s347_s0 + $0x38] sm:$0xff]  ;;  %v35_v24 = vld [vmem:[%s348_s2] sm:$0x3] }
   0x7   :  { %111 = vmatpush1.bf16.msra.mxu0 %v219_v4  ;;  %210 = vmatpush1.bf16.msra.mxu1 %v219_v4  ;;  %v26_v20 = vpack.c.bf16 %v22_v18, %v21_v17  ;;  %v40_v26 = vrot.slane %v35_v24, %v39_v23  ;;  %v44_v27 = vrot.slane %v35_v24, %v43_v25 }
   0x8   :  { %112 = vmatprep.subr.bf16.mxu0 %v220_v5  ;;  %207 = vmatprep.subr.bf16.mxu1 %v220_v5 }
   0xb   :  { %113 = vmatpush1.bf16.msra.mxu0 %v222_v6  ;;  %211 = vmatpush1.bf16.msra.mxu1 %v222_v6 }
   0xc   :  { %114 = vmatprep.subr.bf16.mxu0 %v223_v7  ;;  %208 = vmatprep.subr.bf16.mxu1 %v223_v7 }
   0xf   :  { %115 = vmatpush1.bf16.msra.mxu0 %v225_v8  ;;  %212 = vmatpush1.bf16.msra.mxu1 %v225_v8 }
  0x12   :  { %201 = vmatmul.mubr.msk.bf16.vlgmr.msra.gmra.mxu0 %vm87_vm0, %v23_v13  ;;  %203 = vmatmul.mubr.msk.bf16.vlgmr.msra.gmra.mxu1 %vm87_vm0, %v25_v14 }
  0x13   :  { %142 = vmatprep.mubr.bf16.mxu0 %v226_v1  ;;  %162 = vmatprep.mubr.bf16.mxu1 %v226_v1 }
  0x1a   :  { %202 = vmatmul.mubr.msk.bf16.gmra.mxu0 %vm87_vm0, %v24_v19  ;;  %204 = vmatmul.mubr.msk.bf16.gmra.mxu1 %vm87_vm0, %v26_v20 }
  0xd2   :  { %v134_v28 = vpop.f32.mrf.mxu0  ;;  %v154_v29 = vpop.f32.mrf.mxu1 }
  0xd3   :  { %v135_v30 = vadd.f32 %v134_v28, %v40_v26  ;;  %v155_v31 = vadd.f32 %v154_v29, %v40_v26 }
  0xd4   :  { %v136_v32 = vpop.f32.mrf.mxu0  ;;  %v156_v33 = vpop.f32.mrf.mxu1 }
  0xd5   :  { %173 = vst [vmem:[%s349_s3] sm:$0xff] %v135_v30  ;;  %181 = vst [vmem:[%s349_s3 + $0x40] sm:$0xff] %v155_v31  ;;  %v137_v34 = vadd.f32 %v136_v32, %v44_v27  ;;  %v157_v35 = vadd.f32 %v156_v33, %v44_v27 }
  0xd6   :  { %v138_v36 = vpop.f32.mrf.mxu0  ;;  %v158_v37 = vpop.f32.mrf.mxu1 }
  0xd7   :  { %174 = vst [vmem:[%s349_s3 + $0x8] sm:$0xff] %v137_v34  ;;  %182 = vst [vmem:[%s349_s3 + $0x48] sm:$0xff] %v157_v35  ;;  %v139_v38 = vadd.f32 %v138_v36, %v40_v26  ;;  %v159_v39 = vadd.f32 %v158_v37, %v40_v26 }
  0xd8   :  { %v140_v40 = vpop.f32.mrf.mxu0  ;;  %v160_v41 = vpop.f32.mrf.mxu1 }
  0xd9   :  { %175 = vst [vmem:[%s349_s3 + $0x10] sm:$0xff] %v139_v38  ;;  %183 = vst [vmem:[%s349_s3 + $0x50] sm:$0xff] %v159_v39  ;;  %v141_v42 = vadd.f32 %v140_v40, %v44_v27  ;;  %v161_v43 = vadd.f32 %v160_v41, %v44_v27 }
  0xda   :  { %v144_v44 = vpop.f32.mrf.mxu0  ;;  %v164_v45 = vpop.f32.mrf.mxu1 }
  0xdb   :  { %176 = vst [vmem:[%s349_s3 + $0x18] sm:$0xff] %v141_v42  ;;  %184 = vst [vmem:[%s349_s3 + $0x58] sm:$0xff] %v161_v43  ;;  %v145_v46 = vadd.f32 %v144_v44, %v40_v26  ;;  %v165_v47 = vadd.f32 %v164_v45, %v40_v26 }
  0xdc   :  { %v146_v48 = vpop.f32.mrf.mxu0  ;;  %v166_v49 = vpop.f32.mrf.mxu1 }
  0xdd   :  { %177 = vst [vmem:[%s349_s3 + $0x20] sm:$0xff] %v145_v46  ;;  %185 = vst [vmem:[%s349_s3 + $0x60] sm:$0xff] %v165_v47  ;;  %v147_v50 = vadd.f32 %v146_v48, %v44_v27  ;;  %v167_v51 = vadd.f32 %v166_v49, %v44_v27 }
  0xde   :  { %v148_v52 = vpop.f32.mrf.mxu0  ;;  %v168_v53 = vpop.f32.mrf.mxu1 }
  0xdf   :  { %178 = vst [vmem:[%s349_s3 + $0x28] sm:$0xff] %v147_v50  ;;  %186 = vst [vmem:[%s349_s3 + $0x68] sm:$0xff] %v167_v51  ;;  %v149_v54 = vadd.f32 %v148_v52, %v40_v26  ;;  %v169_v55 = vadd.f32 %v168_v53, %v40_v26 }
  0xe0   :  { %v150_v56 = vpop.f32.mrf.mxu0  ;;  %v170_v57 = vpop.f32.mrf.mxu1 }
  0xe1   :  { %179 = vst [vmem:[%s349_s3 + $0x30] sm:$0xff] %v149_v54  ;;  %187 = vst [vmem:[%s349_s3 + $0x70] sm:$0xff] %v169_v55  ;;  %v151_v58 = vadd.f32 %v150_v56, %v44_v27  ;;  %v171_v59 = vadd.f32 %v170_v57, %v44_v27 }
  0xe3   :  { %180 = vst [vmem:[%s349_s3 + $0x38] sm:$0xff] %v151_v58  ;;  %188 = vst [vmem:[%s349_s3 + $0x78] sm:$0xff] %v171_v59 }

// kernel: stgcn_forward.24
= control target key start
LH: loop header
LB: loop body
LE: loop exit
PB: predicated region body
PF: predicated region fallthrough
CT: control target
= control target key end

     0   :  { %vm35_vm0 = vcmask 516096   ;;  %v1192_v1 = vmov 0   ;;  %v1193_v2 = vmov 0.0   ;;  %vm26_vm1 = vcmask 523264   ;;  %s1194_s6 = smov 64   ;;  %s1635_s1 = inlined_call_operand.vmem [shape: bf16[3,64,192], index: 1, kind: input, shape index: {}]   ;;  %s1636_s0 = inlined_call_operand.vmem [shape: f32[8,8,64], index: 0, kind: input, shape index: {}]   ;;  %s1637_s2 = inlined_call_operand.vmem [shape: f32[1,192], index: 2, kind: input, shape index: {}]   ;;  %s1638_s3 = inlined_call_operand.vmem [shape: bf16[64,16], index: 3, kind: input, shape index: {}]   ;;  %s1639_s4 = inlined_call_operand.vmem [shape: f32[8,8,16], index: 4, kind: output, shape index: {}]  }
   0x1   :  { %v1120_v0 = vld [vmem:[%s1635_s1 + $0x74] ss:$8 sps:$4 sm:$0xff]   ;;  %379 = vmatprep.mubr.bf16.mxu0 %v1192_v1  ;;  %508 = vmatprep.mubr.bf16.mxu1 %v1192_v1  ;;  %36 = vst.msk [vmem:[#allocation2] sm:$0x1] %vm35_vm0, %v1193_v2  ;;  %37 = vst.msk [vmem:[#allocation2 + $0x10] sm:$0x1] %vm35_vm0, %v1193_v2 }
   0x2   :  { %44 = vst.msk [vmem:[#allocation2 + $0x9] sm:$0x1] %vm35_vm0, %v1193_v2  ;;  %45 = vst.msk [vmem:[#allocation2 + $0x19] sm:$0x1] %vm35_vm0, %v1193_v2  ;;  %v1122_v3 = vld [vmem:[%s1635_s1 + $0x70] ss:$8 sps:$4 sm:$0xff]   ;;  %355 = vmatprep.subr.bf16.mxu0 %v1120_v0 }
   0x3   :  { %38 = vst.msk [vmem:[#allocation2 + $0x20] sm:$0x1] %vm35_vm0, %v1193_v2  ;;  %39 = vst.msk [vmem:[#allocation2 + $0x30] sm:$0x1] %vm35_vm0, %v1193_v2  ;;  %v1123_v4 = vld [vmem:[%s1635_s1 + $0x34] ss:$8 sps:$4 sm:$0xff]   ;;  %356 = vmatpush1.bf16.msra.mxu0 %v1122_v3 }
   0x4   :  { %40 = vst.msk [vmem:[#allocation2 + $0x40] sm:$0x1] %vm35_vm0, %v1193_v2  ;;  %41 = vst.msk [vmem:[#allocation2 + $0x50] sm:$0x1] %vm35_vm0, %v1193_v2  ;;  %v1125_v5 = vld [vmem:[%s1635_s1 + $0x30] ss:$8 sps:$4 sm:$0xff]   ;;  %484 = vmatprep.subr.bf16.mxu1 %v1123_v4 }
   0x5   :  { %42 = vst.msk [vmem:[#allocation2 + $0x60] sm:$0x1] %vm35_vm0, %v1193_v2  ;;  %43 = vst.msk [vmem:[#allocation2 + $0x70] sm:$0x1] %vm35_vm0, %v1193_v2  ;;  %v1126_v6 = vld [vmem:[%s1635_s1 + $0x64] ss:$8 sps:$4 sm:$0xff]   ;;  %485 = vmatpush1.bf16.msra.mxu1 %v1125_v5 }
   0x6   :  { %46 = vst.msk [vmem:[#allocation2 + $0x29] sm:$0x1] %vm35_vm0, %v1193_v2  ;;  %47 = vst.msk [vmem:[#allocation2 + $0x39] sm:$0x1] %vm35_vm0, %v1193_v2  ;;  %v1128_v7 = vld [vmem:[%s1635_s1 + $0x60] ss:$8 sps:$4 sm:$0xff]   ;;  %357 = vmatprep.subr.bf16.mxu0 %v1126_v6 }
   0x7   :  { %48 = vst.msk [vmem:[#allocation2 + $0x49] sm:$0x1] %vm35_vm0, %v1193_v2  ;;  %49 = vst.msk [vmem:[#allocation2 + $0x59] sm:$0x1] %vm35_vm0, %v1193_v2  ;;  %v1129_v8 = vld [vmem:[%s1635_s1 + $0x24] ss:$8 sps:$4 sm:$0xff]   ;;  %358 = vmatpush1.bf16.msra.mxu0 %v1128_v7 }
   0x8   :  { %50 = vst.msk [vmem:[#allocation2 + $0x69] sm:$0x1] %vm35_vm0, %v1193_v2  ;;  %51 = vst.msk [vmem:[#allocation2 + $0x79] sm:$0x1] %vm35_vm0, %v1193_v2  ;;  %v1131_v9 = vld [vmem:[%s1635_s1 + $0x20] ss:$8 sps:$4 sm:$0xff]   ;;  %486 = vmatprep.subr.bf16.mxu1 %v1129_v8 }
   0x9   :  { %v1132_v10 = vld [vmem:[%s1635_s1 + $0x54] ss:$8 sps:$4 sm:$0xff]   ;;  %v1134_v11 = vld [vmem:[%s1635_s1 + $0x50] ss:$8 sps:$4 sm:$0xff]   ;;  %v1138_v13 = vld [vmem:[%s1635_s1 + $0x44] ss:$8 sps:$4 sm:$0xff]   ;;  %487 = vmatpush1.bf16.msra.mxu1 %v1131_v9 }
   0xa   :  { %v1135_v12 = vld [vmem:[%s1635_s1 + $0x14] ss:$8 sps:$4 sm:$0xff]   ;;  %359 = vmatprep.subr.bf16.mxu0 %v1132_v10  ;;  %v1137_v14 = vld [vmem:[%s1635_s1 + $0x10] ss:$8 sps:$4 sm:$0xff]   ;;  %v1141_v15 = vld [vmem:[%s1635_s1 + $0x4] ss:$8 sps:$4 sm:$0xff]  }
   0xb   :  { %488 = vmatprep.subr.bf16.mxu1 %v1135_v12  ;;  %360 = vmatpush1.bf16.msra.mxu0 %v1134_v11  ;;  %v1140_v16 = vld [vmem:[%s1635_s1 + $0x40] ss:$8 sps:$4 sm:$0xff]   ;;  %v1146_v17 = vld [vmem:[%s1635_s1 + $0xb4] ss:$8 sps:$4 sm:$0xff]   ;;  %vm116_vm2 = vsmask.f32 3328 }
   0xc   :  { %361 = vmatprep.subr.bf16.mxu0 %v1138_v13  ;;  %v18_v18 = vld [vmem:[%s1636_s0] sm:$0xff]  ;;  %v19_v19 = vld [vmem:[%s1636_s0 + $0x8] sm:$0xff]  ;;  %v20_v21 = vld [vmem:[%s1636_s0 + $0x10] sm:$0xff]  ;;  %vm117_vm3 = vsmask.f32 7440  ;;  %vm231_vm5 = vcmask 1042432  }
   0xd   :  { %489 = vmatpush1.bf16.msra.mxu1 %v1137_v14  ;;  %v1143_v20 = vld [vmem:[%s1635_s1] ss:$8 sps:$4 sm:$0xff]   ;;  %27 = vst.msk [vmem:[#allocation2 + $0x1] sm:$0xff] %vm26_vm1, %v18_v18  ;;  %28 = vst.msk [vmem:[#allocation2 + $0x11] sm:$0xff] %vm26_vm1, %v19_v19  ;;  %v21_v22 = vld [vmem:[%s1636_s0 + $0x18] sm:$0xff]  ;;  %vm232_vm6 = vcmask 1046532  }
   0xe   :  { %490 = vmatprep.subr.bf16.mxu1 %v1141_v15  ;;  %29 = vst.msk [vmem:[#allocation2 + $0x21] sm:$0xff] %vm26_vm1, %v20_v21  ;;  %30 = vst.msk [vmem:[#allocation2 + $0x31] sm:$0xff] %vm26_vm1, %v21_v22  ;;  %v22_v23 = vld [vmem:[%s1636_s0 + $0x20] sm:$0xff]  ;;  %v23_v24 = vld [vmem:[%s1636_s0 + $0x28] sm:$0xff]  ;;  %vm956_vm8 = vcmask 130048  }
   0xf   :  { %362 = vmatpush1.bf16.msra.mxu0 %v1140_v16  ;;  %31 = vst.msk [vmem:[#allocation2 + $0x41] sm:$0xff] %vm26_vm1, %v22_v23  ;;  %32 = vst.msk [vmem:[#allocation2 + $0x51] sm:$0xff] %vm26_vm1, %v23_v24  ;;  %v24_v25 = vld [vmem:[%s1636_s0 + $0x30] sm:$0xff]  ;;  %v25_v26 = vld [vmem:[%s1636_s0 + $0x38] sm:$0xff] }
  0x10   :  { %630 = vmatprep.subr.bf16.mxu0 %v1146_v17  ;;  %33 = vst.msk [vmem:[#allocation2 + $0x61] sm:$0xff] %vm26_vm1, %v24_v25  ;;  %34 = vst.msk [vmem:[#allocation2 + $0x71] sm:$0xff] %vm26_vm1, %v25_v26  ;;  %v1144_v16 = vld [vmem:[%s1635_s1 + $0xb0] ss:$8 sps:$4 sm:$0xff]   ;;  %v1149_v22 = vld [vmem:[%s1635_s1 + $0xa4] ss:$8 sps:$4 sm:$0xff]  }
  0x11   :  { %491 = vmatpush1.bf16.msra.mxu1 %v1143_v20  ;;  %vm1347_vm4 = vmor %vm116_vm2, %vm117_vm3  ;;  %v1147_v26 = vld [vmem:[%s1635_s1 + $0xa0] ss:$8 sps:$4 sm:$0xff]  }
  0x12   :  { %vm1447_vm7 = vmor %vm231_vm5, %vm232_vm6 }
  0x14   :  { %v52_v27 = vld [vmem:[#allocation2] sm:$0xff]  ;;  %v53_v28 = vld [vmem:[#allocation2 + $0x8] sm:$0x3]  ;;  %v54_v29 = vld [vmem:[#allocation2 + $0x10] sm:$0xff] }
  0x15   :  { %v55_v30 = vld [vmem:[#allocation2 + $0x18] sm:$0x3]  ;;  %v1321_v31 = vpack.c.bf16 %v52_v27, %v52_v27  ;;  %v1323_v32 = vpack.c.bf16 %v53_v28, %v53_v28  ;;  %v1325_v33 = vpack.c.bf16 %v54_v29, %v54_v29  ;;  %v1089_v34 = vpack.c.bf16 %v54_v29, %v52_v27  ;;  %v56_v36 = vld [vmem:[#allocation2 + $0x20] sm:$0xff]  ;;  %v57_v41 = vld [vmem:[#allocation2 + $0x28] sm:$0x3] }
  0x16   :  { %v1327_v35 = vpack.c.bf16 %v55_v30, %v55_v30  ;;  %v58_v44 = vld [vmem:[#allocation2 + $0x30] sm:$0xff]  ;;  %v59_v45 = vld [vmem:[#allocation2 + $0x38] sm:$0x3]  ;;  %v1337_v52 = vpack.c.bf16 %v56_v36, %v56_v36  ;;  %v1339_v53 = vpack.c.bf16 %v57_v41, %v57_v41  ;;  %v1354_v63 = vld [vmem:[#allocation2 + $0x40] sm:$0xff] }
  0x17   :  { %v120_v37 = vshrl.u32 %v1321_v31, 16  ;;  %v123_v38 = vshll.u32 %v1321_v31, 16  ;;  %v129_v39 = vshll.u32 %v1323_v32, 16  ;;  %v134_v40 = vshrl.u32 %v1325_v33, 16  ;;  %1029 = vmatmul.mubr.msk.bf16.vlgmr.msra.gmra.mxu1 %vm26_vm1, %v1089_v34  ;;  %v1356_v0 = vld [vmem:[#allocation2 + $0x50] sm:$0xff] }
  0x18   :  { %v137_v42 = vshll.u32 %v1325_v33, 16  ;;  %v143_v43 = vshll.u32 %v1327_v35, 16  ;;  %518 = vmatprep.mubr.bf16.mxu1 %v1192_v1  ;;  %v1341_v55 = vpack.c.bf16 %v58_v44, %v58_v44  ;;  %v1343_v56 = vpack.c.bf16 %v59_v45, %v59_v45  ;;  %v61_v6 = vld [vmem:[#allocation2 + $0x48] sm:$0x3]  ;;  %v63_v11 = vld [vmem:[#allocation2 + $0x58] sm:$0x3] }
  0x19   :  { %v122_v46 = vrot.slane %v120_v37, 4  ;;  %v125_v47 = vrot.slane %v123_v38, 5  ;;  %v131_v48 = vrot.slane %v129_v39, 5  ;;  %v136_v49 = vrot.slane %v134_v40, 4  ;;  %v64_v40 = vld [vmem:[#allocation2 + $0x60] sm:$0xff]  ;;  %v66_v45 = vld [vmem:[#allocation2 + $0x70] sm:$0xff] }
  0x1a   :  { %v139_v50 = vrot.slane %v137_v42, 5  ;;  %v145_v51 = vrot.slane %v143_v43, 5  ;;  %v1090_v57 = vpack.c.bf16 %v58_v44, %v56_v36  ;;  %v148_v60 = vshrl.u32 %v1337_v52, 16  ;;  %v1152_v36 = vld [vmem:[%s1635_s1 + $0x94] ss:$8 sps:$4 sm:$0xff]  }
  0x1b   :  { %v126_v54 = vor.u32 %v125_v47, %v122_v46  ;;  %v151_v61 = vshll.u32 %v1337_v52, 16  ;;  %v157_v62 = vshll.u32 %v1339_v53, 16  ;;  %v162_v3 = vshrl.u32 %v1341_v55, 16  ;;  %v65_v44 = vld [vmem:[#allocation2 + $0x68] sm:$0x3] }
  0x1c   :  { %v140_v59 = vor.u32 %v139_v50, %v136_v49  ;;  %v165_v4 = vshll.u32 %v1341_v55, 16  ;;  %v171_v5 = vshll.u32 %v1343_v56, 16  ;;  %v150_v8 = vrot.slane %v148_v60, 4  ;;  %v67_v50 = vld [vmem:[#allocation2 + $0x78] sm:$0x3] }
  0x1d   :  { %v127_v2 = vrot.slane %v126_v54, 4  ;;  %v153_v9 = vrot.slane %v151_v61, 5  ;;  %v159_v10 = vrot.slane %v157_v62, 5  ;;  %v164_v13 = vrot.slane %v162_v3, 4  ;;  %v1150_v3 = vld [vmem:[%s1635_s1 + $0x90] ss:$8 sps:$4 sm:$0xff]  }
  0x1e   :  { %v141_v7 = vrot.slane %v140_v59, 4  ;;  %v167_v14 = vrot.slane %v165_v4, 5  ;;  %v173_v15 = vrot.slane %v171_v5, 5  ;;  %v1372_v19 = vpack.c.bf16 %v1354_v63, %v1354_v63 }
  0x1f   :  { %v132_v12 = vsel %vm1347_vm4, %v127_v2, %v131_v48  ;;  %1030 = vmatmul.mubr.msk.bf16.gmra.mxu1 %vm26_vm1, %v1090_v57  ;;  %v154_v18 = vor.u32 %v153_v9, %v150_v8  ;;  %v1374_v20 = vpack.c.bf16 %v61_v6, %v61_v6  ;;  %v1381_v24 = vpack.c.bf16 %v1356_v0, %v1356_v0 }
  0x20   :  { %v146_v17 = vsel %vm1347_vm4, %v141_v7, %v145_v51  ;;  %528 = vmatprep.mubr.bf16.mxu1 %v1192_v1  ;;  %v168_v23 = vor.u32 %v167_v14, %v164_v13  ;;  %v1383_v25 = vpack.c.bf16 %v63_v11, %v63_v11  ;;  %v176_v28 = vshrl.u32 %v1372_v19, 16  ;;  %v1155_v7 = vld [vmem:[%s1635_s1 + $0x84] ss:$8 sps:$4 sm:$0xff]  }
  0x21   :  { %v1001_v21 = vcombine.low %v132_v12, %v146_v17  ;;  %v155_v27 = vrot.slane %v154_v18, 4  ;;  %v179_v29 = vshll.u32 %v1372_v19, 16  ;;  %v185_v30 = vshll.u32 %v1374_v20, 16  ;;  %v1153_v18 = vld [vmem:[%s1635_s1 + $0x80] ss:$8 sps:$4 sm:$0xff]  }
  0x22   :  { %v169_v34 = vrot.slane %v168_v23, 4  ;;  %v190_v37 = vshrl.u32 %v1381_v24, 16  ;;  %v193_v38 = vshll.u32 %v1381_v24, 16  ;;  %v199_v39 = vshll.u32 %v1383_v25, 16 }
  0x23   :  { %1013 = vmatmul.mubr.msk.bf16.vlgmr.msra.gmra.mxu0 %vm26_vm1, %v1001_v21  ;;  %v160_v41 = vsel %vm1347_vm4, %v155_v27, %v159_v10  ;;  %v178_v42 = vrot.slane %v176_v28, 4  ;;  %v181_v43 = vrot.slane %v179_v29, 5  ;;  %v187_v47 = vrot.slane %v185_v30, 5 }
  0x24   :  { %631 = vmatpush1.bf16.msra.mxu0 %v1144_v16  ;;  %389 = vmatprep.mubr.bf16.mxu0 %v1192_v1  ;;  %v174_v46 = vsel %vm1347_vm4, %v169_v34, %v173_v15  ;;  %v192_v48 = vrot.slane %v190_v37, 4  ;;  %v195_v49 = vrot.slane %v193_v38, 5  ;;  %v201_v54 = vrot.slane %v199_v39, 5 }
  0x25   :  { %632 = vmatprep.subr.bf16.mxu0 %v1149_v22  ;;  %v182_v51 = vor.u32 %v181_v43, %v178_v42  ;;  %v1091_v57 = vpack.c.bf16 %v1356_v0, %v1354_v63  ;;  %v1405_v59 = vpack.c.bf16 %v64_v40, %v64_v40  ;;  %v1002_v60 = vcombine.low %v160_v41, %v174_v46 }
  0x26   :  { %v196_v61 = vor.u32 %v195_v49, %v192_v48  ;;  %v1407_v62 = vpack.c.bf16 %v65_v44, %v65_v44  ;;  %v1409_v2 = vpack.c.bf16 %v66_v45, %v66_v45  ;;  %v1415_v5 = vpack.c.bf16 %v67_v50, %v67_v50 }
  0x27   :  { %v183_v4 = vrot.slane %v182_v51, 4  ;;  %1031 = vmatmul.mubr.msk.bf16.gmra.mxu1 %vm26_vm1, %v1091_v57  ;;  %v204_v63 = vshrl.u32 %v1405_v59, 16  ;;  %v207_v0 = vshll.u32 %v1405_v59, 16  ;;  %v1092_v15 = vpack.c.bf16 %v66_v45, %v64_v40 }
  0x28   :  { %633 = vmatpush1.bf16.msra.mxu0 %v1147_v26  ;;  %v197_v6 = vrot.slane %v196_v61, 4  ;;  %538 = vmatprep.mubr.bf16.mxu1 %v1192_v1  ;;  %v218_v8 = vshrl.u32 %v1409_v2, 16  ;;  %v221_v9 = vshll.u32 %v1409_v2, 16  ;;  %v213_v12 = vshll.u32 %v1407_v62, 16 }
  0x29   :  { %634 = vmatprep.subr.bf16.mxu0 %v1152_v36  ;;  %v206_v10 = vrot.slane %v204_v63, 4  ;;  %v209_v11 = vrot.slane %v207_v0, 5  ;;  %v188_v16 = vsel %vm1347_vm4, %v183_v4, %v187_v47  ;;  %v227_v22 = vshll.u32 %v1415_v5, 16 }
  0x2a   :  { %v220_v13 = vrot.slane %v218_v8, 4  ;;  %v223_v14 = vrot.slane %v221_v9, 5  ;;  %v202_v17 = vsel %vm1347_vm4, %v197_v6, %v201_v54  ;;  %v215_v28 = vrot.slane %v213_v12, 5 }
  0x2b   :  { %1014 = vmatmul.mubr.msk.bf16.gmra.mxu0 %vm26_vm1, %v1002_v60  ;;  %v210_v21 = vor.u32 %v209_v11, %v206_v10  ;;  %v1003_v26 = vcombine.low %v188_v16, %v202_v17  ;;  %v229_v30 = vrot.slane %v227_v22, 5  ;;  %v236_v38 = vrot.slane %v1323_v32, 5 }
  0x2c   :  { %399 = vmatprep.mubr.bf16.mxu0 %v1192_v1  ;;  %635 = vmatpush1.bf16.msra.mxu0 %v1150_v3  ;;  %v224_v23 = vor.u32 %v223_v14, %v220_v13  ;;  %v240_v39 = vrot.slane %v1327_v35, 5  ;;  %v985_v40 = vrot.slane %v1321_v31, 9  ;;  %v986_v41 = vrot.slane %v1325_v33, 9 }
  0x2d   :  { %636 = vmatprep.subr.bf16.mxu0 %v1155_v7  ;;  %v211_v27 = vrot.slane %v210_v21, 4  ;;  %v987_v35 = vrot.slane %v1337_v52, 9  ;;  %v244_v31 = vrot.slane %v1339_v53, 5  ;;  %v988_v33 = vrot.slane %v1341_v55, 9 }
  0x2e   :  { %v225_v29 = vrot.slane %v224_v23, 4  ;;  %v237_v58 = vsel %vm1447_vm7, %v985_v40, %v236_v38  ;;  %v241_v32 = vsel %vm1447_vm7, %v986_v41, %v240_v39  ;;  %v248_v44 = vrot.slane %v1343_v56, 5 }
  0x2f   :  { %1032 = vmatmul.mubr.msk.bf16.gmra.mxu1 %vm26_vm1, %v1092_v15  ;;  %v216_v34 = vsel %vm1347_vm4, %v211_v27, %v215_v28  ;;  %v1041_v43 = vcombine.low %v237_v58, %v241_v32  ;;  %v245_v45 = vsel %vm1447_vm7, %v987_v35, %v244_v31  ;;  %v989_v48 = vrot.slane %v1372_v19, 9 }
  0x30   :  { %637 = vmatpush1.bf16.msra.mxu0 %v1153_v18  ;;  %v230_v36 = vsel %vm1347_vm4, %v225_v29, %v229_v30  ;;  %v249_v46 = vsel %vm1447_vm7, %v988_v33, %v248_v44  ;;  %v252_v52 = vrot.slane %v1374_v20, 5  ;;  %v990_v53 = vrot.slane %v1381_v24, 9 }
  0x31   :  { %v1004_v37 = vcombine.low %v216_v34, %v230_v36  ;;  %v1042_v47 = vcombine.low %v245_v45, %v249_v46  ;;  %v256_v55 = vrot.slane %v1383_v25, 5  ;;  %v991_v51 = vrot.slane %v1405_v59, 9 }
  0x32   :  { %v253_v56 = vsel %vm1447_vm7, %v989_v48, %v252_v52  ;;  %v260_v19 = vrot.slane %v1407_v62, 5  ;;  %v992_v20 = vrot.slane %v1409_v2, 9  ;;  %v264_v24 = vrot.slane %v1415_v5, 5  ;;  %v711_v62 = vld [vmem:[%s1637_s2] sm:$0x3] }
  0x33   :  { %1015 = vmatmul.mubr.msk.bf16.gmra.mxu0 %vm26_vm1, %v1003_v26  ;;  %v257_v49 = vsel %vm1447_vm7, %v990_v53, %v256_v55  ;;  %v713_v59 = vlaneseq }
  0x34   :  { %409 = vmatprep.mubr.bf16.mxu0 %v1192_v1  ;;  %v1043_v50 = vcombine.low %v253_v56, %v257_v49  ;;  %v261_v25 = vsel %vm1447_vm7, %v991_v51, %v260_v19  ;;  %v265_v54 = vsel %vm1447_vm7, %v992_v20, %v264_v24 }
  0x35   :  { %v1044_v57 = vcombine.low %v261_v25, %v265_v54  ;;  %v714_v60 = vshrl.u32 %v713_v59, 7 }
  0x37   :  { %v719_v61 = vsub.s32 1, %v714_v60  ;;  %v715_v32 = vsub.s32 0, %v714_v60 }
  0x39   :  { %v1491_v2 = vrot.slane %v711_v62, %v719_v61  ;;  %v1504_v33 = vrot.slane %v711_v62, %v715_v32 }
  0x3b   :  { %1016 = vmatmul.mubr.msk.bf16.gmra.mxu0 %vm26_vm1, %v1004_v37 }
  0x3c   :  { %654 = vmatprep.mubr.bf16.mxu0 %v1192_v1 }
  0x43   :  { %1053 = vmatmul.mubr.msk.bf16.vlgmr.msra.gmra.mxu0 %vm26_vm1, %v1041_v43 }
  0x44   :  { %664 = vmatprep.mubr.bf16.mxu0 %v1192_v1 }
  0x4b   :  { %1054 = vmatmul.mubr.msk.bf16.gmra.mxu0 %vm26_vm1, %v1042_v47 }
  0x4c   :  { %674 = vmatprep.mubr.bf16.mxu0 %v1192_v1 }
  0x53   :  { %1055 = vmatmul.mubr.msk.bf16.gmra.mxu0 %vm26_vm1, %v1043_v50 }
  0x54   :  { %684 = vmatprep.mubr.bf16.mxu0 %v1192_v1  ;;  %v1156_v1 = vld [vmem:[%s1638_s3 + $0x18] sm:$0xff]  }
  0x55   :  { %1101 = vmatprep.subr.bf16.mxu1 %v1156_v1 }
  0x56   :  { %1102 = vmatpush3.bf16.msra.mxu1 %v1156_v1 }
  0x5b   :  { %1056 = vmatmul.mubr.msk.bf16.gmra.mxu0 %vm26_vm1, %v1044_v57 }
  0xd7   :  { %v510_v3 = vpop.f32.mrf.mxu1 }
  0xd9   :  { %v512_v4 = vpop.f32.mrf.mxu1 }
  0xdb   :  { %v514_v5 = vpop.f32.mrf.mxu1 }
  0xdd   :  { %v516_v63 = vpop.f32.mrf.mxu1 }
  0xdf   :  { %v520_v0 = vpop.f32.mrf.mxu1 }
  0xe1   :  { %v522_v6 = vpop.f32.mrf.mxu1 }
  0xe3   :  { %v381_v7 = vpop.f32.mrf.mxu0  ;;  %v524_v8 = vpop.f32.mrf.mxu1 }
  0xe4   :  { %v511_v31 = vadd.f32 %v510_v3, %v381_v7 }
  0xe5   :  { %v383_v9 = vpop.f32.mrf.mxu0  ;;  %v526_v10 = vpop.f32.mrf.mxu1 }
  0xe6   :  { %v513_v11 = vadd.f32 %v512_v4, %v383_v9 }
  0xe7   :  { %v385_v12 = vpop.f32.mrf.mxu0  ;;  %v530_v13 = vpop.f32.mrf.mxu1 }
  0xe8   :  { %v515_v47 = vadd.f32 %v514_v5, %v385_v12 }
  0xe9   :  { %v387_v14 = vpop.f32.mrf.mxu0  ;;  %v532_v17 = vpop.f32.mrf.mxu1 }
  0xea   :  { %v517_v15 = vadd.f32 %v516_v63, %v387_v14 }
  0xeb   :  { %v391_v16 = vpop.f32.mrf.mxu0  ;;  %v534_v23 = vpop.f32.mrf.mxu1 }
  0xec   :  { %v521_v51 = vadd.f32 %v520_v0, %v391_v16 }
  0xed   :  { %v393_v18 = vpop.f32.mrf.mxu0  ;;  %v536_v29 = vpop.f32.mrf.mxu1 }
  0xee   :  { %v523_v21 = vadd.f32 %v522_v6, %v393_v18 }
  0xef   :  { %v395_v22 = vpop.f32.mrf.mxu0  ;;  %v540_v37 = vpop.f32.mrf.mxu1 }
  0xf0   :  { %v525_v60 = vadd.f32 %v524_v8, %v395_v22 }
  0xf1   :  { %v397_v26 = vpop.f32.mrf.mxu0  ;;  %v542_v41 = vpop.f32.mrf.mxu1 }
  0xf2   :  { %v527_v27 = vadd.f32 %v526_v10, %v397_v26 }
  0xf3   :  { %v401_v28 = vpop.f32.mrf.mxu0  ;;  %v544_v18 = vpop.f32.mrf.mxu1 }
  0xf4   :  { %v531_v0 = vadd.f32 %v530_v13, %v401_v28 }
  0xf5   :  { %v403_v30 = vpop.f32.mrf.mxu0 }
  0xf6   :  { %v533_v34 = vadd.f32 %v532_v17, %v403_v30 }
  0xf7   :  { %v405_v36 = vpop.f32.mrf.mxu0 }
  0xf8   :  { %v535_v14 = vadd.f32 %v534_v23, %v405_v36 }
  0xf9   :  { %v407_v38 = vpop.f32.mrf.mxu0 }
  0xfa   :  { %v1496_v39 = vadd.f32 %v536_v29, %v407_v38  ;;  %v546_v38 = vpop.f32.mrf.mxu1 }
  0xfb   :  { %v411_v40 = vpop.f32.mrf.mxu0 }
  0xfc   :  { %v541_v29 = vadd.f32 %v540_v37, %v411_v40 }
  0xfd   :  { %v413_v42 = vpop.f32.mrf.mxu0 }
  0xfe   :  { %v1498_v58 = vadd.f32 %v542_v41, %v413_v42 }
  0xff   :  { %v1500_v43 = vpop.f32.mrf.mxu0 }
 0x100   :  { %v545_v37 = vadd.f32 %v544_v18, %v1500_v43 }
 0x101   :  { %v1502_v35 = vpop.f32.mrf.mxu0 }
 0x103   :  { %v656_v44 = vpop.f32.mrf.mxu0 }
 0x104   :  { %v695_v45 = vadd.f32 %v656_v44, %v511_v31 }
 0x105   :  { %v658_v46 = vpop.f32.mrf.mxu0 }
 0x106   :  { %v1507_v48 = vadd.f32 %v1504_v33, %v695_v45  ;;  %v696_v52 = vadd.f32 %v658_v46, %v513_v11  ;;  %v547_v46 = vadd.f32 %v546_v38, %v1502_v35 }
 0x107   :  { %v660_v53 = vpop.f32.mrf.mxu0 }
 0x108   :  { %v1057_v55 = vmul.f32 -1.442695, %v1507_v48  ;;  %v1511_v56 = vadd.f32 %v1491_v2, %v696_v52  ;;  %v697_v49 = vadd.f32 %v660_v53, %v515_v47  ;;  %v1157_v52 = vld [vmem:[%s1638_s3 + $0x10] sm:$0xff]  }
 0x109   :  { %v662_v50 = vpop.f32.mrf.mxu0  ;;  %1103 = vmatprep.subr.bf16.mxu1 %v1157_v52 }
 0x10a   :  { %1160 = vpow2.f32 %v1057_v55  ;;  %v1514_v19 = vadd.f32 %v1504_v33, %v697_v49  ;;  %v698_v20 = vadd.f32 %v662_v50, %v517_v15  ;;  %1104 = vmatpush3.bf16.msra.mxu1 %v1157_v52 }
 0x10b   :  { %v666_v24 = vpop.f32.mrf.mxu0 }
 0x10c   :  { %v1058_v25 = vmul.f32 -1.442695, %v1514_v19  ;;  %v1518_v54 = vadd.f32 %v1491_v2, %v698_v20  ;;  %v699_v57 = vadd.f32 %v666_v24, %v521_v51 }
 0x10d   :  { %v668_v59 = vpop.f32.mrf.mxu0 }
 0x10e   :  { %1162 = vpow2.f32 %v1058_v25  ;;  %v1521_v61 = vadd.f32 %v1504_v33, %v699_v57  ;;  %v700_v62 = vadd.f32 %v668_v59, %v523_v21  ;;  %v1158_v57 = vld [vmem:[%s1638_s3 + $0x8] sm:$0xff]  }
 0x10f   :  { %v670_v1 = vpop.f32.mrf.mxu0  ;;  %1105 = vmatprep.subr.bf16.mxu1 %v1158_v57 }
 0x110   :  { %v1059_v3 = vmul.f32 -1.442695, %v1521_v61  ;;  %v1525_v4 = vadd.f32 %v1491_v2, %v700_v62  ;;  %v701_v5 = vadd.f32 %v670_v1, %v525_v60  ;;  %1106 = vmatpush3.bf16.msra.mxu1 %v1158_v57  ;;  %v1159_v62 = vld [vmem:[%s1638_s3] sm:$0xff]  }
 0x111   :  { %v672_v63 = vpop.f32.mrf.mxu0  ;;  %1107 = vmatprep.subr.bf16.mxu1 %v1159_v62 }
 0x112   :  { %1164 = vpow2.f32 %v1059_v3  ;;  %v1528_v6 = vadd.f32 %v1504_v33, %v701_v5  ;;  %v702_v7 = vadd.f32 %v672_v63, %v527_v27 }
 0x113   :  { %v676_v8 = vpop.f32.mrf.mxu0 }
 0x114   :  { %v1060_v9 = vmul.f32 -1.442695, %v1528_v6  ;;  %v1532_v10 = vadd.f32 %v1491_v2, %v702_v7  ;;  %v703_v11 = vadd.f32 %v676_v8, %v531_v0  ;;  %1108 = vmatpush3.bf16.msra.mxu1 %v1159_v62 }
 0x115   :  { %v678_v12 = vpop.f32.mrf.mxu0 }
 0x116   :  { %1166 = vpow2.f32 %v1060_v9  ;;  %v1535_v15 = vadd.f32 %v1504_v33, %v703_v11  ;;  %v704_v16 = vadd.f32 %v678_v12, %v533_v34 }
 0x117   :  { %v1161_v13 = vpop.eup %1160  ;;  %v680_v17 = vpop.f32.mrf.mxu0 }
 0x118   :  { %v763_v21 = vadd.f32 1.0, %v1161_v13  ;;  %v1061_v22 = vmul.f32 -1.442695, %v1535_v15  ;;  %v1539_v26 = vadd.f32 %v1491_v2, %v704_v16  ;;  %v705_v27 = vadd.f32 %v680_v17, %v535_v14 }
 0x119   :  { %v682_v28 = vpop.f32.mrf.mxu0 }
 0x11a   :  { %1168 = vrcp.f32 %v763_v21  ;;  %v1542_v23 = vadd.f32 %v1504_v33, %v705_v27  ;;  %v706_v30 = vadd.f32 %v682_v28, %v1496_v39 }
 0x11b   :  { %v1163_v36 = vpop.eup %1162  ;;  %1170 = vpow2.f32 %v1061_v22  ;;  %v686_v34 = vpop.f32.mrf.mxu0 }
 0x11c   :  { %v764_v41 = vadd.f32 1.0, %v1163_v36  ;;  %v1062_v42 = vmul.f32 -1.442695, %v1542_v23  ;;  %v1547_v32 = vadd.f32 %v1491_v2, %v706_v30  ;;  %v707_v31 = vadd.f32 %v686_v34, %v541_v29 }
 0x11d   :  { %v688_v44 = vpop.f32.mrf.mxu0 }
 0x11e   :  { %1172 = vrcp.f32 %v764_v41  ;;  %v1551_v40 = vadd.f32 %v1504_v33, %v707_v31  ;;  %v708_v39 = vadd.f32 %v688_v44, %v1498_v58 }
 0x11f   :  { %v1165_v45 = vpop.eup %1164  ;;  %1174 = vpow2.f32 %v1062_v42  ;;  %v690_v47 = vpop.f32.mrf.mxu0 }
 0x120   :  { %v765_v53 = vadd.f32 1.0, %v1165_v45  ;;  %v1063_v55 = vmul.f32 -1.442695, %v1551_v40  ;;  %v1560_v43 = vadd.f32 %v1491_v2, %v708_v39  ;;  %v709_v49 = vadd.f32 %v690_v47, %v545_v37 }
 0x121   :  { %v692_v50 = vpop.f32.mrf.mxu0 }
 0x122   :  { %1176 = vrcp.f32 %v765_v53  ;;  %v1563_v58 = vadd.f32 %v1504_v33, %v709_v49  ;;  %v710_v35 = vadd.f32 %v692_v50, %v547_v46 }
 0x123   :  { %v1167_v51 = vpop.eup %1166  ;;  %1178 = vpow2.f32 %v1063_v55 }
 0x124   :  { %v766_v20 = vadd.f32 1.0, %v1167_v51  ;;  %v1064_v24 = vmul.f32 -1.442695, %v1563_v58  ;;  %v1567_v25 = vadd.f32 %v1491_v2, %v710_v35 }
 0x126   :  { %1180 = vrcp.f32 %v766_v20 }
 0x127   :  { %v1169_v59 = vpop.eup %1168  ;;  %1182 = vpow2.f32 %v1064_v24 }
 0x128   :  { %v1171_v60 = vpop.eup %1170  ;;  %795 = vrot.lane.b32.xlu0 %v1169_v59, %s1194_s6 }
 0x129   :  { %v767_v33 = vadd.f32 1.0, %v1171_v60 }
 0x12b   :  { %v1173_v2 = vpop.eup %1172  ;;  %1184 = vrcp.f32 %v767_v33 }
 0x12c   :  { %v1175_v1 = vpop.eup %1174  ;;  %797 = vrot.lane.b32.xlu0 %v1173_v2, %s1194_s6 }
 0x12d   :  { %v768_v3 = vadd.f32 1.0, %v1175_v1 }
 0x12f   :  { %v1177_v5 = vpop.eup %1176  ;;  %1186 = vrcp.f32 %v768_v3 }
 0x130   :  { %v1179_v63 = vpop.eup %1178  ;;  %799 = vrot.lane.b32.xlu1 %v1177_v5, %s1194_s6 }
 0x131   :  { %v769_v0 = vadd.f32 1.0, %v1179_v63 }
 0x133   :  { %v1181_v7 = vpop.eup %1180  ;;  %1188 = vrcp.f32 %v769_v0 }
 0x134   :  { %v1183_v8 = vpop.eup %1182  ;;  %801 = vrot.lane.b32.xlu1 %v1181_v7, %s1194_s6 }
 0x135   :  { %v770_v9 = vadd.f32 1.0, %v1183_v8 }
 0x137   :  { %1190 = vrcp.f32 %v770_v9 }
 0x138   :  { %v1185_v11 = vpop.eup %1184 }
 0x139   :  { %803 = vrot.lane.b32.xlu0 %v1185_v11, %s1194_s6 }
 0x13c   :  { %v1187_v12 = vpop.eup %1186 }
 0x13d   :  { %805 = vrot.lane.b32.xlu1 %v1187_v12, %s1194_s6 }
 0x140   :  { %v1189_v14 = vpop.eup %1188 }
 0x141   :  { %807 = vrot.lane.b32.xlu0 %v1189_v14, %s1194_s6 }
 0x144   :  { %v1191_v16 = vpop.eup %1190 }
 0x145   :  { %809 = vrot.lane.b32.xlu1 %v1191_v16, %s1194_s6 }
 0x19a   :  { %v796_v13 = vpop.permute.xlu0 %795 }
 0x19b   :  { %v819_v17 = vadd.f32 %v796_v13, %v1507_v48 }
 0x19d   :  { %v827_v21 = vadd.f32 %v819_v17, %v1511_v56 }
 0x19e   :  { %v798_v18 = vpop.permute.xlu0 %797 }
 0x19f   :  { %v820_v22 = vadd.f32 %v798_v18, %v1514_v19  ;;  %v835_v29 = vmax.f32 %v827_v21, 0.0 }
 0x1a1   :  { %v828_v27 = vadd.f32 %v820_v22, %v1518_v54 }
 0x1a2   :  { %v800_v28 = vpop.permute.xlu1 %799 }
 0x1a3   :  { %v836_v30 = vmax.f32 %v828_v27, 0.0  ;;  %v821_v36 = vadd.f32 %v800_v28, %v1521_v61 }
 0x1a5   :  { %v843_v34 = vpack.c.bf16 %v836_v30, %v835_v29  ;;  %v829_v41 = vadd.f32 %v821_v36, %v1525_v4 }
 0x1a6   :  { %v802_v38 = vpop.permute.xlu1 %801 }
 0x1a7   :  { %v822_v42 = vadd.f32 %v802_v38, %v1528_v6  ;;  %1109 = vmatprep.mubr.msk.bf16.mxu1 %vm26_vm1, %v843_v34  ;;  %v837_v56 = vmax.f32 %v829_v41, 0.0 }
 0x1a9   :  { %v830_v48 = vadd.f32 %v822_v42, %v1532_v10 }
 0x1ab   :  { %v838_v31 = vmax.f32 %v830_v48, 0.0  ;;  %v804_v19 = vpop.permute.xlu0 %803 }
 0x1ac   :  { %v823_v54 = vadd.f32 %v804_v19, %v1535_v15 }
 0x1ad   :  { %v844_v44 = vpack.c.bf16 %v838_v31, %v837_v56 }
 0x1ae   :  { %v831_v61 = vadd.f32 %v823_v54, %v1539_v26 }
 0x1af   :  { %v806_v37 = vpop.permute.xlu1 %805  ;;  %1110 = vmatmul.mubr.msk.bf16.vlgmr.msra.gmra.mxu1 %vm26_vm1, %v844_v44 }
 0x1b0   :  { %v824_v39 = vadd.f32 %v806_v37, %v1542_v23  ;;  %v839_v45 = vmax.f32 %v831_v61, 0.0 }
 0x1b2   :  { %v832_v4 = vadd.f32 %v824_v39, %v1547_v32 }
 0x1b3   :  { %v808_v6 = vpop.permute.xlu0 %807 }
 0x1b4   :  { %v840_v46 = vmax.f32 %v832_v4, 0.0  ;;  %v825_v10 = vadd.f32 %v808_v6, %v1551_v40 }
 0x1b6   :  { %v845_v47 = vpack.c.bf16 %v840_v46, %v839_v45  ;;  %v833_v53 = vadd.f32 %v825_v10, %v1560_v43 }
 0x1b7   :  { %v810_v52 = vpop.permute.xlu1 %809 }
 0x1b8   :  { %v826_v15 = vadd.f32 %v810_v52, %v1563_v58  ;;  %1113 = vmatprep.mubr.msk.bf16.mxu1 %vm26_vm1, %v845_v47  ;;  %v841_v26 = vmax.f32 %v833_v53, 0.0 }
 0x1ba   :  { %v834_v55 = vadd.f32 %v826_v15, %v1567_v25 }
 0x1bc   :  { %v842_v49 = vmax.f32 %v834_v55, 0.0 }
 0x1be   :  { %v846_v23 = vpack.c.bf16 %v842_v49, %v841_v26 }
 0x1c0   :  { %1114 = vmatmul.mubr.msk.bf16.gmra.mxu1 %vm26_vm1, %v846_v23 }
 0x26f   :  { %v1111_v32 = vpop.f32.mrf.mxu1 }
 0x270   :  { %959 = vst.msk [vmem:[%s1639_s4 + $0x10] sm:$0xff] %vm956_vm8, %v1111_v32 }
 0x271   :  { %v925_v40 = vpop.f32.mrf.mxu1 }
 0x272   :  { %957 = vst.msk [vmem:[%s1639_s4] sm:$0xff] %vm956_vm8, %v925_v40 }
 0x273   :  { %v1112_v43 = vpop.f32.mrf.mxu1 }
 0x274   :  { %960 = vst.msk [vmem:[%s1639_s4 + $0x18] sm:$0xff] %vm956_vm8, %v1112_v43 }
 0x275   :  { %v928_v50 = vpop.f32.mrf.mxu1 }
 0x276   :  { %958 = vst.msk [vmem:[%s1639_s4 + $0x8] sm:$0xff] %vm956_vm8, %v928_v50 }
 0x280   :  { %v1115_v58 = vpop.f32.mrf.mxu1 }
 0x281   :  { %963 = vst.msk [vmem:[%s1639_s4 + $0x30] sm:$0xff] %vm956_vm8, %v1115_v58 }
 0x282   :  { %v941_v35 = vpop.f32.mrf.mxu1 }
 0x283   :  { %961 = vst.msk [vmem:[%s1639_s4 + $0x20] sm:$0xff] %vm956_vm8, %v941_v35 }
 0x284   :  { %v1116_v51 = vpop.f32.mrf.mxu1 }
 0x285   :  { %964 = vst.msk [vmem:[%s1639_s4 + $0x38] sm:$0xff] %vm956_vm8, %v1116_v51 }
 0x286   :  { %v944_v20 = vpop.f32.mrf.mxu1 }
 0x287   :  { %962 = vst.msk [vmem:[%s1639_s4 + $0x28] sm:$0xff] %vm956_vm8, %v944_v20 }

// kernel: stgcn_forward.32
= control target key start
LH: loop header
LB: loop body
LE: loop exit
PB: predicated region body
PF: predicated region fallthrough
CT: control target
= control target key end

     0   :  { %vm32_vm0 = vcmask 516096   ;;  %v1047_v1 = vmov 0   ;;  %v1048_v2 = vmov 0.0   ;;  %vm23_vm1 = vcmask 523264   ;;  %s1507_s1 = inlined_call_operand.vmem [shape: bf16[3,64,192], index: 1, kind: input, shape index: {}]   ;;  %s1508_s0 = inlined_call_operand.vmem [shape: f32[8,8,64], index: 0, kind: input, shape index: {}]   ;;  %s1509_s2 = inlined_call_operand.vmem [shape: f32[1,192], index: 2, kind: input, shape index: {}]   ;;  %s1510_s3 = inlined_call_operand.vmem [shape: f32[8,8,64], index: 3, kind: output, shape index: {}]  }
   0x1   :  { %v979_v0 = vld [vmem:[%s1507_s1 + $0x74] ss:$8 sps:$4 sm:$0xff]   ;;  %376 = vmatprep.mubr.bf16.mxu0 %v1047_v1  ;;  %396 = vmatprep.mubr.bf16.mxu1 %v1047_v1  ;;  %33 = vst.msk [vmem:[#allocation2] sm:$0x1] %vm32_vm0, %v1048_v2  ;;  %34 = vst.msk [vmem:[#allocation2 + $0x10] sm:$0x1] %vm32_vm0, %v1048_v2 }
   0x2   :  { %41 = vst.msk [vmem:[#allocation2 + $0x9] sm:$0x1] %vm32_vm0, %v1048_v2  ;;  %42 = vst.msk [vmem:[#allocation2 + $0x19] sm:$0x1] %vm32_vm0, %v1048_v2  ;;  %v981_v3 = vld [vmem:[%s1507_s1 + $0x70] ss:$8 sps:$4 sm:$0xff]   ;;  %968 = vmatprep.subr.bf16.mxu1 %v979_v0  ;;  %352 = vmatprep.subr.bf16.mxu0 %v979_v0 }
   0x3   :  { %35 = vst.msk [vmem:[#allocation2 + $0x20] sm:$0x1] %vm32_vm0, %v1048_v2  ;;  %36 = vst.msk [vmem:[#allocation2 + $0x30] sm:$0x1] %vm32_vm0, %v1048_v2  ;;  %v982_v4 = vld [vmem:[%s1507_s1 + $0x64] ss:$8 sps:$4 sm:$0xff]   ;;  %972 = vmatpush1.bf16.msra.mxu1 %v981_v3  ;;  %353 = vmatpush1.bf16.msra.mxu0 %v981_v3 }
   0x4   :  { %37 = vst.msk [vmem:[#allocation2 + $0x40] sm:$0x1] %vm32_vm0, %v1048_v2  ;;  %38 = vst.msk [vmem:[#allocation2 + $0x50] sm:$0x1] %vm32_vm0, %v1048_v2  ;;  %v984_v5 = vld [vmem:[%s1507_s1 + $0x60] ss:$8 sps:$4 sm:$0xff]   ;;  %969 = vmatprep.subr.bf16.mxu1 %v982_v4  ;;  %354 = vmatprep.subr.bf16.mxu0 %v982_v4 }
   0x5   :  { %39 = vst.msk [vmem:[#allocation2 + $0x60] sm:$0x1] %vm32_vm0, %v1048_v2  ;;  %40 = vst.msk [vmem:[#allocation2 + $0x70] sm:$0x1] %vm32_vm0, %v1048_v2  ;;  %v985_v6 = vld [vmem:[%s1507_s1 + $0x54] ss:$8 sps:$4 sm:$0xff]  }
   0x6   :  { %43 = vst.msk [vmem:[#allocation2 + $0x29] sm:$0x1] %vm32_vm0, %v1048_v2  ;;  %44 = vst.msk [vmem:[#allocation2 + $0x39] sm:$0x1] %vm32_vm0, %v1048_v2  ;;  %v987_v7 = vld [vmem:[%s1507_s1 + $0x50] ss:$8 sps:$4 sm:$0xff]  }
   0x7   :  { %45 = vst.msk [vmem:[#allocation2 + $0x49] sm:$0x1] %vm32_vm0, %v1048_v2  ;;  %46 = vst.msk [vmem:[#allocation2 + $0x59] sm:$0x1] %vm32_vm0, %v1048_v2  ;;  %v15_v8 = vld [vmem:[%s1508_s0] sm:$0xff]  ;;  %973 = vmatpush1.bf16.msra.mxu1 %v984_v5  ;;  %355 = vmatpush1.bf16.msra.mxu0 %v984_v5  ;;  %v16_v10 = vld [vmem:[%s1508_s0 + $0x8] sm:$0xff] }
   0x8   :  { %47 = vst.msk [vmem:[#allocation2 + $0x69] sm:$0x1] %vm32_vm0, %v1048_v2  ;;  %48 = vst.msk [vmem:[#allocation2 + $0x79] sm:$0x1] %vm32_vm0, %v1048_v2  ;;  %v988_v9 = vld [vmem:[%s1507_s1 + $0x44] ss:$8 sps:$4 sm:$0xff]   ;;  %970 = vmatprep.subr.bf16.mxu1 %v985_v6  ;;  %356 = vmatprep.subr.bf16.mxu0 %v985_v6 }
   0x9   :  { %24 = vst.msk [vmem:[#allocation2 + $0x1] sm:$0xff] %vm23_vm1, %v15_v8  ;;  %v19_v11 = vld [vmem:[%s1508_s0 + $0x20] sm:$0xff]  ;;  %25 = vst.msk [vmem:[#allocation2 + $0x11] sm:$0xff] %vm23_vm1, %v16_v10  ;;  %v20_v12 = vld [vmem:[%s1508_s0 + $0x28] sm:$0xff]  ;;  %vm113_vm2 = vsmask.f32 3328 }
   0xa   :  { %28 = vst.msk [vmem:[#allocation2 + $0x41] sm:$0xff] %vm23_vm1, %v19_v11  ;;  %29 = vst.msk [vmem:[#allocation2 + $0x51] sm:$0xff] %vm23_vm1, %v20_v12  ;;  %v990_v13 = vld [vmem:[%s1507_s1 + $0x40] ss:$8 sps:$4 sm:$0xff]   ;;  %v993_v14 = vld [vmem:[%s1507_s1 + $0x34] ss:$8 sps:$4 sm:$0xff]  }
   0xb   :  { %974 = vmatpush1.bf16.msra.mxu1 %v987_v7  ;;  %357 = vmatpush1.bf16.msra.mxu0 %v987_v7  ;;  %v996_v15 = vld [vmem:[%s1507_s1 + $0xb4] ss:$8 sps:$4 sm:$0xff]   ;;  %vm114_vm3 = vsmask.f32 7440  ;;  %v994_v11 = vld [vmem:[%s1507_s1 + $0xb0] ss:$8 sps:$4 sm:$0xff]  }
   0xc   :  { %971 = vmatprep.subr.bf16.mxu1 %v988_v9  ;;  %358 = vmatprep.subr.bf16.mxu0 %v988_v9  ;;  %v17_v16 = vld [vmem:[%s1508_s0 + $0x10] sm:$0xff]  ;;  %v18_v19 = vld [vmem:[%s1508_s0 + $0x18] sm:$0xff]  ;;  %vm1192_vm4 = vmor %vm113_vm2, %vm114_vm3  ;;  %vm228_vm5 = vcmask 1042432   ;;  %vm229_vm6 = vcmask 1046532  }
   0xd   :  { %26 = vst.msk [vmem:[#allocation2 + $0x21] sm:$0xff] %vm23_vm1, %v17_v16  ;;  %27 = vst.msk [vmem:[#allocation2 + $0x31] sm:$0xff] %vm23_vm1, %v18_v19  ;;  %v21_v34 = vld [vmem:[%s1508_s0 + $0x30] sm:$0xff]  ;;  %v22_v35 = vld [vmem:[%s1508_s0 + $0x38] sm:$0xff] }
   0xe   :  { %30 = vst.msk [vmem:[#allocation2 + $0x61] sm:$0xff] %vm23_vm1, %v21_v34  ;;  %31 = vst.msk [vmem:[#allocation2 + $0x71] sm:$0xff] %vm23_vm1, %v22_v35  ;;  %v1002_v16 = vld [vmem:[%s1507_s1 + $0xa4] ss:$8 sps:$4 sm:$0xff]  }
   0xf   :  { %975 = vmatpush1.bf16.msra.mxu1 %v990_v13  ;;  %359 = vmatpush1.bf16.msra.mxu0 %v990_v13  ;;  %vm1301_vm7 = vmor %vm228_vm5, %vm229_vm6 }
  0x10   :  { %v1137_v17 = vld [vmem:[#allocation2] sm:$0xff]  ;;  %v50_v18 = vld [vmem:[#allocation2 + $0x8] sm:$0x3]  ;;  %v1143_v20 = vld [vmem:[#allocation2 + $0x10] sm:$0xff]  ;;  %481 = vmatprep.subr.bf16.mxu1 %v993_v14  ;;  %627 = vmatprep.subr.bf16.mxu0 %v996_v15 }
  0x11   :  { %v52_v21 = vld [vmem:[#allocation2 + $0x18] sm:$0x3]  ;;  %v1147_v22 = vpack.c.bf16 %v1137_v17, %v1137_v17  ;;  %v1149_v23 = vpack.c.bf16 %v50_v18, %v50_v18  ;;  %v1151_v24 = vld [vmem:[#allocation2 + $0x40] sm:$0xff]  ;;  %v1156_v25 = vpack.c.bf16 %v1143_v20, %v1143_v20  ;;  %v58_v27 = vld [vmem:[#allocation2 + $0x48] sm:$0x3] }
  0x12   :  { %v1158_v26 = vpack.c.bf16 %v52_v21, %v52_v21  ;;  %v60_v28 = vld [vmem:[#allocation2 + $0x58] sm:$0x3]  ;;  %v1163_v32 = vld [vmem:[#allocation2 + $0x50] sm:$0xff]  ;;  %v1167_v33 = vpack.c.bf16 %v1151_v24, %v1151_v24  ;;  %v1180_v42 = vpack.c.bf16 %v58_v27, %v58_v27 }
  0x13   :  { %v117_v29 = vshrl.u32 %v1147_v22, 16  ;;  %v120_v30 = vshll.u32 %v1147_v22, 16  ;;  %v126_v31 = vshll.u32 %v1149_v23, 16  ;;  %v131_v36 = vshrl.u32 %v1156_v25, 16  ;;  %v991_v27 = vld [vmem:[%s1507_s1 + $0x30] ss:$8 sps:$4 sm:$0xff]  }
  0x14   :  { %v134_v37 = vshll.u32 %v1156_v25, 16  ;;  %v140_v38 = vshll.u32 %v1158_v26, 16  ;;  %v1184_v46 = vpack.c.bf16 %v1163_v32, %v1163_v32  ;;  %v1186_v48 = vpack.c.bf16 %v60_v28, %v60_v28  ;;  %v1199_v56 = vld [vmem:[#allocation2 + $0x20] sm:$0xff]  ;;  %v54_v57 = vld [vmem:[#allocation2 + $0x28] sm:$0x3]  ;;  %v1202_v62 = vld [vmem:[#allocation2 + $0x30] sm:$0xff] }
  0x15   :  { %v119_v39 = vrot.slane %v117_v29, 4  ;;  %v122_v40 = vrot.slane %v120_v30, 5  ;;  %v128_v41 = vrot.slane %v126_v31, 5  ;;  %v133_v43 = vrot.slane %v131_v36, 4  ;;  %v56_v4 = vld [vmem:[#allocation2 + $0x38] sm:$0x3] }
  0x16   :  { %v136_v44 = vrot.slane %v134_v37, 5  ;;  %v142_v45 = vrot.slane %v140_v38, 5  ;;  %v173_v49 = vshrl.u32 %v1167_v33, 16  ;;  %v176_v50 = vshll.u32 %v1167_v33, 16  ;;  %v1227_v21 = vld [vmem:[#allocation2 + $0x60] sm:$0xff] }
  0x17   :  { %v123_v47 = vor.u32 %v122_v40, %v119_v39  ;;  %v182_v53 = vshll.u32 %v1180_v42, 16  ;;  %v187_v54 = vshrl.u32 %v1184_v46, 16  ;;  %v190_v55 = vshll.u32 %v1184_v46, 16  ;;  %v62_v34 = vld [vmem:[#allocation2 + $0x68] sm:$0x3]  ;;  %v1240_v39 = vld [vmem:[#allocation2 + $0x70] sm:$0xff] }
  0x18   :  { %v137_v52 = vor.u32 %v136_v44, %v133_v43  ;;  %v175_v59 = vrot.slane %v173_v49, 4  ;;  %v178_v60 = vrot.slane %v176_v50, 5  ;;  %v196_v61 = vshll.u32 %v1186_v48, 16  ;;  %v64_v40 = vld [vmem:[#allocation2 + $0x78] sm:$0x3] }
  0x19   :  { %v124_v58 = vrot.slane %v123_v47, 4  ;;  %v184_v0 = vrot.slane %v182_v53, 5  ;;  %v189_v2 = vrot.slane %v187_v54, 4  ;;  %v192_v3 = vrot.slane %v190_v55, 5  ;;  %v1000_v44 = vld [vmem:[%s1507_s1 + $0xa0] ss:$8 sps:$4 sm:$0xff]  }
  0x1a   :  { %v138_v63 = vrot.slane %v137_v52, 4  ;;  %v179_v6 = vor.u32 %v178_v60, %v175_v59  ;;  %v198_v7 = vrot.slane %v196_v61, 5  ;;  %v1208_v8 = vpack.c.bf16 %v1199_v56, %v1199_v56  ;;  %v999_v50 = vld [vmem:[%s1507_s1 + $0x24] ss:$8 sps:$4 sm:$0xff]   ;;  %v997_v55 = vld [vmem:[%s1507_s1 + $0x20] ss:$8 sps:$4 sm:$0xff]  }
  0x1b   :  { %v129_v5 = vsel %vm1192_vm4, %v124_v58, %v128_v41  ;;  %v193_v10 = vor.u32 %v192_v3, %v189_v2  ;;  %v1215_v12 = vpack.c.bf16 %v54_v57, %v54_v57  ;;  %v1219_v13 = vpack.c.bf16 %v1202_v62, %v1202_v62  ;;  %v1008_v61 = vld [vmem:[%s1507_s1 + $0x94] ss:$8 sps:$4 sm:$0xff]  }
  0x1c   :  { %v143_v9 = vsel %vm1192_vm4, %v138_v63, %v142_v45  ;;  %v180_v15 = vrot.slane %v179_v6, 4  ;;  %v1224_v18 = vpack.c.bf16 %v56_v4, %v56_v4  ;;  %v145_v19 = vshrl.u32 %v1208_v8, 16  ;;  %v1005_v63 = vld [vmem:[%s1507_s1 + $0x14] ss:$8 sps:$4 sm:$0xff]  }
  0x1d   :  { %v884_v14 = vcombine.low %v129_v5, %v143_v9  ;;  %v194_v28 = vrot.slane %v193_v10, 4  ;;  %v148_v29 = vshll.u32 %v1208_v8, 16  ;;  %v154_v30 = vshll.u32 %v1215_v12, 16  ;;  %v1006_v10 = vld [vmem:[%s1507_s1 + $0x90] ss:$8 sps:$4 sm:$0xff]  }
  0x1e   :  { %v159_v31 = vshrl.u32 %v1219_v13, 16  ;;  %v185_v35 = vsel %vm1192_vm4, %v180_v15, %v184_v0  ;;  %v147_v36 = vrot.slane %v145_v19, 4  ;;  %v162_v37 = vshll.u32 %v1219_v13, 16  ;;  %v1014_v19 = vld [vmem:[%s1507_s1 + $0x84] ss:$8 sps:$4 sm:$0xff]  }
  0x1f   :  { %896 = vmatmul.mubr.msk.bf16.vlgmr.msra.gmra.mxu0 %vm23_vm1, %v884_v14  ;;  %v168_v38 = vshll.u32 %v1224_v18, 16  ;;  %v233_v41 = vrot.slane %v1149_v23, 5  ;;  %v199_v43 = vsel %vm1192_vm4, %v194_v28, %v198_v7  ;;  %v150_v45 = vrot.slane %v148_v29, 5 }
  0x20   :  { %628 = vmatpush1.bf16.msra.mxu0 %v994_v11  ;;  %386 = vmatprep.mubr.bf16.mxu0 %v1047_v1  ;;  %v161_v47 = vrot.slane %v159_v31, 4  ;;  %v886_v49 = vcombine.low %v185_v35, %v199_v43  ;;  %v156_v52 = vrot.slane %v154_v30, 5  ;;  %v164_v53 = vrot.slane %v162_v37, 5  ;;  %v1003_v37 = vld [vmem:[%s1507_s1 + $0x10] ss:$8 sps:$4 sm:$0xff]  }
  0x21   :  { %629 = vmatprep.subr.bf16.mxu0 %v1002_v16  ;;  %v1254_v54 = vpack.c.bf16 %v1227_v21, %v1227_v21  ;;  %v151_v57 = vor.u32 %v150_v45, %v147_v36  ;;  %v1259_v58 = vpack.c.bf16 %v62_v34, %v62_v34  ;;  %v1263_v59 = vpack.c.bf16 %v1240_v39, %v1240_v39  ;;  %v1012_v43 = vld [vmem:[%s1507_s1 + $0x80] ss:$8 sps:$4 sm:$0xff]  }
  0x22   :  { %v1265_v60 = vpack.c.bf16 %v64_v40, %v64_v40  ;;  %898 = vmatmul.mubr.msk.bf16.vlgmr.msra.gmra.mxu1 %vm23_vm1, %v886_v49  ;;  %v165_v0 = vor.u32 %v164_v53, %v161_v47  ;;  %v170_v2 = vrot.slane %v168_v38, 5  ;;  %v868_v36 = vrot.slane %v1147_v22, 9  ;;  %v1011_v47 = vld [vmem:[%s1507_s1 + $0x4] ss:$8 sps:$4 sm:$0xff]  }
  0x23   :  { %v201_v3 = vshrl.u32 %v1254_v54, 16  ;;  %v204_v4 = vshll.u32 %v1254_v54, 16  ;;  %482 = vmatpush1.bf16.msra.mxu1 %v991_v27  ;;  %v152_v5 = vrot.slane %v151_v57, 4  ;;  %v210_v6 = vshll.u32 %v1259_v58, 16  ;;  %406 = vmatprep.mubr.bf16.mxu1 %v1047_v1 }
  0x24   :  { %630 = vmatpush1.bf16.msra.mxu0 %v1000_v44  ;;  %v215_v7 = vshrl.u32 %v1263_v59, 16  ;;  %v218_v9 = vshll.u32 %v1263_v59, 16  ;;  %483 = vmatprep.subr.bf16.mxu1 %v999_v50  ;;  %v166_v11 = vrot.slane %v165_v0, 4  ;;  %v224_v16 = vshll.u32 %v1265_v60, 16 }
  0x25   :  { %v203_v14 = vrot.slane %v201_v3, 4  ;;  %v206_v15 = vrot.slane %v204_v4, 5  ;;  %v237_v27 = vrot.slane %v1158_v26, 5  ;;  %v157_v28 = vsel %vm1192_vm4, %v152_v5, %v156_v52  ;;  %631 = vmatprep.subr.bf16.mxu0 %v1008_v61 }
  0x26   :  { %v217_v29 = vrot.slane %v215_v7, 4  ;;  %v220_v30 = vrot.slane %v218_v9, 5  ;;  %v171_v31 = vsel %vm1192_vm4, %v166_v11, %v170_v2  ;;  %v212_v35 = vrot.slane %v210_v6, 5  ;;  %v708_v7 = vld [vmem:[%s1509_s2] sm:$0x3]  ;;  %s1049_s2 = smov 64  }
  0x27   :  { %v207_v34 = vor.u32 %v206_v15, %v203_v14  ;;  %484 = vmatpush1.bf16.msra.mxu1 %v997_v55  ;;  %v885_v38 = vcombine.low %v157_v28, %v171_v31  ;;  %v226_v40 = vrot.slane %v224_v16, 5  ;;  %v869_v22 = vrot.slane %v1156_v25, 9  ;;  %v1009_v55 = vld [vmem:[%s1507_s1] ss:$8 sps:$4 sm:$0xff]  }
  0x28   :  { %v221_v26 = vor.u32 %v220_v30, %v217_v29  ;;  %632 = vmatpush1.bf16.msra.mxu0 %v1006_v10  ;;  %485 = vmatprep.subr.bf16.mxu1 %v1005_v63  ;;  %v234_v25 = vsel %vm1301_vm7, %v868_v36, %v233_v41  ;;  %v870_v23 = vrot.slane %v1208_v8, 9  ;;  %v241_v41 = vrot.slane %v1215_v12, 5 }
  0x29   :  { %v208_v45 = vrot.slane %v207_v34, 4  ;;  %633 = vmatprep.subr.bf16.mxu0 %v1014_v19  ;;  %897 = vmatmul.mubr.msk.bf16.gmra.mxu0 %vm23_vm1, %v885_v38  ;;  %v238_v52 = vsel %vm1301_vm7, %v869_v22, %v237_v27  ;;  %v871_v63 = vrot.slane %v1219_v13, 9  ;;  %v245_v51 = vrot.slane %v1224_v18, 5 }
  0x2a   :  { %v222_v49 = vrot.slane %v221_v26, 4  ;;  %651 = vmatprep.mubr.bf16.mxu0 %v1047_v1  ;;  %v924_v61 = vcombine.low %v234_v25, %v238_v52  ;;  %v964_v0 = vpack.c.bf16 %v1143_v20, %v1137_v17  ;;  %v242_v2 = vsel %vm1301_vm7, %v870_v23, %v241_v41 }
  0x2b   :  { %v213_v50 = vsel %vm1192_vm4, %v208_v45, %v212_v35  ;;  %486 = vmatpush1.bf16.msra.mxu1 %v1003_v37  ;;  %v246_v8 = vsel %vm1301_vm7, %v871_v63, %v245_v51  ;;  %v872_v13 = vrot.slane %v1167_v33, 9  ;;  %v249_v18 = vrot.slane %v1180_v42, 5 }
  0x2c   :  { %v227_v53 = vsel %vm1192_vm4, %v222_v49, %v226_v40  ;;  %634 = vmatpush1.bf16.msra.mxu0 %v1012_v43  ;;  %487 = vmatprep.subr.bf16.mxu1 %v1011_v47  ;;  %v925_v12 = vcombine.low %v242_v2, %v246_v8  ;;  %v873_v3 = vrot.slane %v1184_v46, 9  ;;  %v253_v4 = vrot.slane %v1186_v48, 5 }
  0x2d   :  { %v887_v57 = vcombine.low %v213_v50, %v227_v53  ;;  %v965_v17 = vpack.c.bf16 %v1202_v62, %v1199_v56  ;;  %v250_v20 = vsel %vm1301_vm7, %v872_v13, %v249_v18  ;;  %v874_v46 = vrot.slane %v1254_v54, 9 }
  0x2e   :  { %v254_v33 = vsel %vm1301_vm7, %v873_v3, %v253_v4  ;;  %v257_v48 = vrot.slane %v1259_v58, 5  ;;  %v875_v5 = vrot.slane %v1263_v59, 9  ;;  %v261_v6 = vrot.slane %v1265_v60, 5 }
  0x2f   :  { %899 = vmatmul.mubr.msk.bf16.gmra.mxu1 %vm23_vm1, %v887_v57  ;;  %v926_v42 = vcombine.low %v250_v20, %v254_v33  ;;  %v966_v56 = vpack.c.bf16 %v1163_v32, %v1151_v24  ;;  %v967_v59 = vpack.c.bf16 %v1240_v39, %v1227_v21  ;;  %v710_v24 = vlaneseq }
  0x30   :  { %488 = vmatpush1.bf16.msra.mxu1 %v1009_v55  ;;  %505 = vmatprep.mubr.bf16.mxu1 %v1047_v1  ;;  %v258_v62 = vsel %vm1301_vm7, %v874_v46, %v257_v48  ;;  %v262_v54 = vsel %vm1301_vm7, %v875_v5, %v261_v6 }
  0x31   :  { %936 = vmatmul.mubr.msk.bf16.vlgmr.msra.gmra.mxu0 %vm23_vm1, %v924_v61  ;;  %v927_v58 = vcombine.low %v258_v62, %v262_v54  ;;  %v711_v32 = vshrl.u32 %v710_v24, 7 }
  0x32   :  { %661 = vmatprep.mubr.bf16.mxu0 %v1047_v1 }
  0x33   :  { %v716_v60 = vsub.s32 1, %v711_v32  ;;  %v712_v36 = vsub.s32 0, %v711_v32 }
  0x35   :  { %v1375_v9 = vrot.slane %v708_v7, %v716_v60  ;;  %v1393_v44 = vrot.slane %v708_v7, %v712_v36 }
  0x37   :  { %912 = vmatmul.mubr.msk.bf16.vlgmr.msra.gmra.mxu1 %vm23_vm1, %v964_v0 }
  0x38   :  { %515 = vmatprep.mubr.bf16.mxu1 %v1047_v1 }
  0x39   :  { %937 = vmatmul.mubr.msk.bf16.gmra.mxu0 %vm23_vm1, %v925_v12 }
  0x3a   :  { %671 = vmatprep.mubr.bf16.mxu0 %v1047_v1 }
  0x3f   :  { %913 = vmatmul.mubr.msk.bf16.gmra.mxu1 %vm23_vm1, %v965_v17 }
  0x40   :  { %525 = vmatprep.mubr.bf16.mxu1 %v1047_v1 }
  0x41   :  { %938 = vmatmul.mubr.msk.bf16.gmra.mxu0 %vm23_vm1, %v926_v42 }
  0x42   :  { %681 = vmatprep.mubr.bf16.mxu0 %v1047_v1 }
  0x47   :  { %914 = vmatmul.mubr.msk.bf16.gmra.mxu1 %vm23_vm1, %v966_v56 }
  0x48   :  { %535 = vmatprep.mubr.bf16.mxu1 %v1047_v1 }
  0x49   :  { %939 = vmatmul.mubr.msk.bf16.gmra.mxu0 %vm23_vm1, %v927_v58 }
  0x4f   :  { %915 = vmatmul.mubr.msk.bf16.gmra.mxu1 %vm23_vm1, %v967_v59 }
  0xdf   :  { %v378_v10 = vpop.f32.mrf.mxu0 }
  0xe1   :  { %v380_v11 = vpop.f32.mrf.mxu0 }
  0xe2   :  { %v1377_v14 = vpop.f32.mrf.mxu1 }
  0xe3   :  { %v382_v1 = vpop.f32.mrf.mxu0 }
  0xe4   :  { %v1379_v15 = vpop.f32.mrf.mxu1 }
  0xe5   :  { %v384_v16 = vpop.f32.mrf.mxu0 }
  0xe6   :  { %v1381_v21 = vpop.f32.mrf.mxu1 }
  0xe8   :  { %v1383_v19 = vpop.f32.mrf.mxu1 }
  0xe9   :  { %v388_v39 = vpop.f32.mrf.mxu0 }
  0xeb   :  { %v390_v27 = vpop.f32.mrf.mxu0 }
  0xed   :  { %v392_v28 = vpop.f32.mrf.mxu0 }
  0xef   :  { %v1385_v29 = vpop.f32.mrf.mxu1  ;;  %v394_v30 = vpop.f32.mrf.mxu0 }
  0xf1   :  { %v1387_v31 = vpop.f32.mrf.mxu1  ;;  %v653_v34 = vpop.f32.mrf.mxu0 }
  0xf3   :  { %v1389_v35 = vpop.f32.mrf.mxu1  ;;  %v655_v37 = vpop.f32.mrf.mxu0 }
  0xf5   :  { %v1391_v38 = vpop.f32.mrf.mxu1  ;;  %v657_v26 = vpop.f32.mrf.mxu0 }
  0xf7   :  { %v507_v40 = vpop.f32.mrf.mxu1  ;;  %v659_v22 = vpop.f32.mrf.mxu0 }
  0xf8   :  { %v508_v43 = vadd.f32 %v507_v40, %v378_v10 }
  0xf9   :  { %v509_v45 = vpop.f32.mrf.mxu1  ;;  %v663_v50 = vpop.f32.mrf.mxu0 }
  0xfa   :  { %v692_v47 = vadd.f32 %v653_v34, %v508_v43  ;;  %v510_v49 = vadd.f32 %v509_v45, %v380_v11 }
  0xfb   :  { %v511_v25 = vpop.f32.mrf.mxu1  ;;  %v665_v57 = vpop.f32.mrf.mxu0 }
  0xfc   :  { %v1396_v52 = vadd.f32 %v1393_v44, %v692_v47  ;;  %v693_v53 = vadd.f32 %v655_v37, %v510_v49  ;;  %v512_v55 = vadd.f32 %v511_v25, %v382_v1 }
  0xfd   :  { %v513_v61 = vpop.f32.mrf.mxu1  ;;  %v667_v0 = vpop.f32.mrf.mxu0 }
  0xfe   :  { %v940_v23 = vmul.f32 -1.442695, %v1396_v52  ;;  %v1400_v41 = vadd.f32 %v1375_v9, %v693_v53  ;;  %v694_v63 = vadd.f32 %v657_v26, %v512_v55  ;;  %v514_v51 = vadd.f32 %v513_v61, %v384_v16 }
  0xff   :  { %v517_v2 = vpop.f32.mrf.mxu1  ;;  %v669_v18 = vpop.f32.mrf.mxu0 }
 0x100   :  { %1015 = vpow2.f32 %v940_v23  ;;  %v1403_v8 = vadd.f32 %v1393_v44, %v694_v63  ;;  %v695_v12 = vadd.f32 %v659_v22, %v514_v51  ;;  %v518_v13 = vadd.f32 %v517_v2, %v388_v39 }
 0x101   :  { %v519_v3 = vpop.f32.mrf.mxu1  ;;  %v673_v42 = vpop.f32.mrf.mxu0 }
 0x102   :  { %v941_v4 = vmul.f32 -1.442695, %v1403_v8  ;;  %v1407_v17 = vadd.f32 %v1375_v9, %v695_v12  ;;  %v696_v20 = vadd.f32 %v663_v50, %v518_v13  ;;  %v520_v33 = vadd.f32 %v519_v3, %v390_v27 }
 0x103   :  { %v521_v46 = vpop.f32.mrf.mxu1  ;;  %v675_v56 = vpop.f32.mrf.mxu0 }
 0x104   :  { %1017 = vpow2.f32 %v941_v4  ;;  %v1410_v48 = vadd.f32 %v1393_v44, %v696_v20  ;;  %v697_v5 = vadd.f32 %v665_v57, %v520_v33  ;;  %v522_v6 = vadd.f32 %v521_v46, %v392_v28 }
 0x105   :  { %v523_v62 = vpop.f32.mrf.mxu1  ;;  %v677_v32 = vpop.f32.mrf.mxu0 }
 0x106   :  { %v942_v54 = vmul.f32 -1.442695, %v1410_v48  ;;  %v1414_v58 = vadd.f32 %v1375_v9, %v697_v5  ;;  %v698_v59 = vadd.f32 %v667_v0, %v522_v6  ;;  %v524_v24 = vadd.f32 %v523_v62, %v394_v30 }
 0x107   :  { %v527_v60 = vpop.f32.mrf.mxu1  ;;  %v679_v1 = vpop.f32.mrf.mxu0 }
 0x108   :  { %1019 = vpow2.f32 %v942_v54  ;;  %v1417_v7 = vadd.f32 %v1393_v44, %v698_v59  ;;  %v699_v10 = vadd.f32 %v669_v18, %v524_v24  ;;  %v528_v11 = vadd.f32 %v527_v60, %v1377_v14 }
 0x109   :  { %v529_v16 = vpop.f32.mrf.mxu1  ;;  %v683_v40 = vpop.f32.mrf.mxu0 }
 0x10a   :  { %v943_v39 = vmul.f32 -1.442695, %v1417_v7  ;;  %v1422_v27 = vadd.f32 %v1375_v9, %v699_v10  ;;  %v700_v28 = vadd.f32 %v673_v42, %v528_v11  ;;  %v530_v34 = vadd.f32 %v529_v16, %v1379_v15 }
 0x10b   :  { %v531_v30 = vpop.f32.mrf.mxu1 }
 0x10c   :  { %1021 = vpow2.f32 %v943_v39  ;;  %v1426_v36 = vadd.f32 %v1393_v44, %v700_v28  ;;  %v701_v37 = vadd.f32 %v675_v56, %v530_v34  ;;  %v532_v26 = vadd.f32 %v531_v30, %v1381_v21  ;;  %v685_v21 = vpop.f32.mrf.mxu0 }
 0x10d   :  { %v1016_v14 = vpop.eup %1015  ;;  %v533_v43 = vpop.f32.mrf.mxu1 }
 0x10e   :  { %v760_v22 = vadd.f32 1.0, %v1016_v14  ;;  %v944_v45 = vmul.f32 -1.442695, %v1426_v36  ;;  %v1431_v47 = vadd.f32 %v1375_v9, %v701_v37  ;;  %v702_v49 = vadd.f32 %v677_v32, %v532_v26  ;;  %v687_v18 = vpop.f32.mrf.mxu0 }
 0x10f   :  { %v534_v15 = vadd.f32 %v533_v43, %v1383_v19  ;;  %v537_v50 = vpop.f32.mrf.mxu1 }
 0x110   :  { %1023 = vrcp.f32 %v760_v22  ;;  %v1435_v25 = vadd.f32 %v1393_v44, %v702_v49  ;;  %v538_v53 = vadd.f32 %v537_v50, %v1385_v29  ;;  %v689_v6 = vpop.f32.mrf.mxu0 }
 0x111   :  { %v1018_v55 = vpop.eup %1017  ;;  %1025 = vpow2.f32 %v944_v45  ;;  %v703_v57 = vadd.f32 %v679_v1, %v534_v15  ;;  %v539_v61 = vpop.f32.mrf.mxu1 }
 0x112   :  { %v761_v23 = vadd.f32 1.0, %v1018_v55  ;;  %v945_v63 = vmul.f32 -1.442695, %v1435_v25  ;;  %v704_v51 = vadd.f32 %v683_v40, %v538_v53  ;;  %v540_v0 = vadd.f32 %v539_v61, %v1387_v31 }
 0x113   :  { %v1441_v19 = vadd.f32 %v1375_v9, %v703_v57  ;;  %v541_v2 = vpop.f32.mrf.mxu1 }
 0x114   :  { %1027 = vrcp.f32 %v761_v23  ;;  %v1444_v12 = vadd.f32 %v1393_v44, %v704_v51  ;;  %v705_v29 = vadd.f32 %v685_v21, %v540_v0  ;;  %v542_v13 = vadd.f32 %v541_v2, %v1389_v35 }
 0x115   :  { %v1020_v3 = vpop.eup %1019  ;;  %1029 = vpow2.f32 %v945_v63  ;;  %v543_v4 = vpop.f32.mrf.mxu1 }
 0x116   :  { %v762_v20 = vadd.f32 1.0, %v1020_v3  ;;  %v946_v33 = vmul.f32 -1.442695, %v1444_v12  ;;  %v1449_v31 = vadd.f32 %v1375_v9, %v705_v29  ;;  %v706_v42 = vadd.f32 %v687_v18, %v542_v13 }
 0x117   :  { %v544_v46 = vadd.f32 %v543_v4, %v1391_v38 }
 0x118   :  { %1031 = vrcp.f32 %v762_v20  ;;  %v1453_v5 = vadd.f32 %v1393_v44, %v706_v42 }
 0x119   :  { %v1022_v56 = vpop.eup %1021  ;;  %1033 = vpow2.f32 %v946_v33  ;;  %v707_v35 = vadd.f32 %v689_v6, %v544_v46 }
 0x11a   :  { %v763_v62 = vadd.f32 1.0, %v1022_v56  ;;  %v947_v54 = vmul.f32 -1.442695, %v1453_v5 }
 0x11b   :  { %v1457_v59 = vadd.f32 %v1375_v9, %v707_v35 }
 0x11c   :  { %1035 = vrcp.f32 %v763_v62 }
 0x11d   :  { %v1024_v24 = vpop.eup %1023  ;;  %1037 = vpow2.f32 %v947_v54 }
 0x11e   :  { %v1026_v32 = vpop.eup %1025  ;;  %792 = vrot.lane.b32.xlu0 %v1024_v24, %s1049_s2 }
 0x11f   :  { %v764_v38 = vadd.f32 1.0, %v1026_v32 }
 0x121   :  { %v1028_v60 = vpop.eup %1027  ;;  %1039 = vrcp.f32 %v764_v38 }
 0x122   :  { %v1030_v44 = vpop.eup %1029  ;;  %794 = vrot.lane.b32.xlu0 %v1028_v60, %s1049_s2 }
 0x123   :  { %v765_v10 = vadd.f32 1.0, %v1030_v44 }
 0x125   :  { %v1032_v11 = vpop.eup %1031  ;;  %1041 = vrcp.f32 %v765_v10 }
 0x126   :  { %v1034_v1 = vpop.eup %1033  ;;  %796 = vrot.lane.b32.xlu1 %v1032_v11, %s1049_s2 }
 0x127   :  { %v766_v16 = vadd.f32 1.0, %v1034_v1 }
 0x129   :  { %v1036_v39 = vpop.eup %1035  ;;  %1043 = vrcp.f32 %v766_v16 }
 0x12a   :  { %v1038_v9 = vpop.eup %1037  ;;  %798 = vrot.lane.b32.xlu1 %v1036_v39, %s1049_s2 }
 0x12b   :  { %v767_v28 = vadd.f32 1.0, %v1038_v9 }
 0x12d   :  { %1045 = vrcp.f32 %v767_v28 }
 0x12e   :  { %v1040_v34 = vpop.eup %1039 }
 0x12f   :  { %800 = vrot.lane.b32.xlu0 %v1040_v34, %s1049_s2 }
 0x132   :  { %v1042_v30 = vpop.eup %1041 }
 0x133   :  { %802 = vrot.lane.b32.xlu1 %v1042_v30, %s1049_s2 }
 0x136   :  { %v1044_v37 = vpop.eup %1043 }
 0x137   :  { %804 = vrot.lane.b32.xlu0 %v1044_v37, %s1049_s2 }
 0x13a   :  { %v1046_v26 = vpop.eup %1045 }
 0x13b   :  { %806 = vrot.lane.b32.xlu1 %v1046_v26, %s1049_s2 }
 0x190   :  { %v793_v40 = vpop.permute.xlu0 %792 }
 0x191   :  { %v816_v14 = vadd.f32 %v793_v40, %v1396_v52 }
 0x193   :  { %v824_v43 = vadd.f32 %v816_v14, %v1400_v41 }
 0x194   :  { %v795_v22 = vpop.permute.xlu0 %794 }
 0x195   :  { %v832_v45 = vmax.f32 %v824_v43, 0.0  ;;  %v817_v49 = vadd.f32 %v795_v22, %v1403_v8 }
 0x197   :  { %840 = vst.msk [vmem:[%s1510_s3] sm:$0xff] %vm23_vm1, %v832_v45  ;;  %v825_v15 = vadd.f32 %v817_v49, %v1407_v17 }
 0x198   :  { %v797_v50 = vpop.permute.xlu1 %796 }
 0x199   :  { %v833_v53 = vmax.f32 %v825_v15, 0.0  ;;  %v818_v21 = vadd.f32 %v797_v50, %v1410_v48 }
 0x19b   :  { %841 = vst.msk [vmem:[%s1510_s3 + $0x8] sm:$0xff] %vm23_vm1, %v833_v53  ;;  %v826_v52 = vadd.f32 %v818_v21, %v1414_v58 }
 0x19c   :  { %v799_v41 = vpop.permute.xlu1 %798 }
 0x19d   :  { %v834_v8 = vmax.f32 %v826_v52, 0.0  ;;  %v819_v55 = vadd.f32 %v799_v41, %v1417_v7 }
 0x19f   :  { %842 = vst.msk [vmem:[%s1510_s3 + $0x10] sm:$0xff] %vm23_vm1, %v834_v8  ;;  %v827_v17 = vadd.f32 %v819_v55, %v1422_v27 }
 0x1a1   :  { %v835_v57 = vmax.f32 %v827_v17, 0.0  ;;  %v801_v48 = vpop.permute.xlu0 %800 }
 0x1a2   :  { %v820_v61 = vadd.f32 %v801_v48, %v1426_v36 }
 0x1a3   :  { %843 = vst.msk [vmem:[%s1510_s3 + $0x18] sm:$0xff] %vm23_vm1, %v835_v57 }
 0x1a4   :  { %v828_v58 = vadd.f32 %v820_v61, %v1431_v47 }
 0x1a5   :  { %v803_v23 = vpop.permute.xlu1 %802 }
 0x1a6   :  { %v836_v7 = vmax.f32 %v828_v58, 0.0  ;;  %v821_v63 = vadd.f32 %v803_v23, %v1435_v25 }
 0x1a8   :  { %844 = vst.msk [vmem:[%s1510_s3 + $0x20] sm:$0xff] %vm23_vm1, %v836_v7  ;;  %v829_v27 = vadd.f32 %v821_v63, %v1441_v19 }
 0x1a9   :  { %v805_v51 = vpop.permute.xlu0 %804 }
 0x1aa   :  { %v837_v36 = vmax.f32 %v829_v27, 0.0  ;;  %v822_v0 = vadd.f32 %v805_v51, %v1444_v12 }
 0x1ac   :  { %845 = vst.msk [vmem:[%s1510_s3 + $0x28] sm:$0xff] %vm23_vm1, %v837_v36  ;;  %v830_v47 = vadd.f32 %v822_v0, %v1449_v31 }
 0x1ad   :  { %v807_v2 = vpop.permute.xlu1 %806 }
 0x1ae   :  { %v838_v25 = vmax.f32 %v830_v47, 0.0  ;;  %v823_v29 = vadd.f32 %v807_v2, %v1453_v5 }
 0x1b0   :  { %846 = vst.msk [vmem:[%s1510_s3 + $0x30] sm:$0xff] %vm23_vm1, %v838_v25  ;;  %v831_v19 = vadd.f32 %v823_v29, %v1457_v59 }
 0x1b2   :  { %v839_v13 = vmax.f32 %v831_v19, 0.0 }
 0x1b4   :  { %847 = vst.msk [vmem:[%s1510_s3 + $0x38] sm:$0xff] %vm23_vm1, %v839_v13 }

// kernel: stgcn_forward.34
= control target key start
LH: loop header
LB: loop body
LE: loop exit
PB: predicated region body
PF: predicated region fallthrough
CT: control target
= control target key end

     0   :  { %vm16_vm0 = vcmask 523264   ;;  %v891_v1 = vmov 0   ;;  %v892_v2 = vmov 0.0   ;;  %s893_s23 = smov 64   ;;  %s1168_s1 = inlined_call_operand.vmem [shape: bf16[64,256], index: 1, kind: input, shape index: {}]   ;;  %s1169_s0 = inlined_call_operand.vmem [shape: f32[8,8,256], index: 0, kind: input, shape index: {}]   ;;  %s1170_s2 = inlined_call_operand.vmem [shape: f32[8,8,64], index: 2, kind: output, shape index: {}]  }
   0x1   :  { %v912_v0 = vld [vmem:[%s1168_s1 + $0x34] ss:$8 sps:$4 sm:$0xff]   ;;  %108 = vmatprep.mubr.bf16.mxu0 %v891_v1  ;;  %17 = vst.msk [vmem:[#allocation2] sm:$0xff] %vm16_vm0, %v892_v2  ;;  %18 = vst.msk [vmem:[#allocation3] sm:$0xff] %vm16_vm0, %v892_v2  ;;  %192 = vmatprep.mubr.bf16.mxu1 %v891_v1  ;;  %v921_v3 = vld [vmem:[%s1168_s1 + $0x30] ss:$8 sps:$4 sm:$0xff]  }
   0x2   :  { %84 = vmatprep.subr.bf16.mxu0 %v912_v0  ;;  %v927_v4 = vld [vmem:[%s1168_s1 + $0x24] ss:$8 sps:$4 sm:$0xff]   ;;  %168 = vmatprep.subr.bf16.mxu1 %v912_v0  ;;  %v934_v5 = vld [vmem:[%s1168_s1 + $0x20] ss:$8 sps:$4 sm:$0xff]   ;;  %v941_v6 = vld [vmem:[%s1168_s1 + $0x14] ss:$8 sps:$4 sm:$0xff]  }
   0x3   :  { %85 = vmatpush1.bf16.msra.mxu0 %v921_v3  ;;  %169 = vmatpush1.bf16.msra.mxu1 %v921_v3  ;;  %v948_v7 = vld [vmem:[%s1168_s1 + $0x10] ss:$8 sps:$4 sm:$0xff]   ;;  %v955_v9 = vld [vmem:[%s1168_s1 + $0x4] ss:$8 sps:$4 sm:$0xff]   ;;  %v963_v10 = vld [vmem:[%s1168_s1] ss:$8 sps:$4 sm:$0xff]  }
   0x4   :  { %86 = vmatprep.subr.bf16.mxu0 %v927_v4  ;;  %170 = vmatprep.subr.bf16.mxu1 %v927_v4  ;;  %v29_v13 = vld [vmem:[%s1169_s0] sm:$0xff]  ;;  %v30_v20 = vld [vmem:[%s1169_s0 + $0x8] sm:$0xff]  ;;  %v738_v39 = vld [vmem:[%s1169_s0 + $0x10] sm:$0xff] }
   0x5   :  { %v739_v46 = vld [vmem:[%s1169_s0 + $0x18] sm:$0xff]  ;;  %v744_v2 = vld [vmem:[%s1169_s0 + $0x20] sm:$0xff] }
   0x7   :  { %87 = vmatpush1.bf16.msra.mxu0 %v934_v5  ;;  %171 = vmatpush1.bf16.msra.mxu1 %v934_v5 }
   0x8   :  { %v28_v8 = vld [vmem:[#allocation3] sm:$0xff]  ;;  %88 = vmatprep.subr.bf16.mxu0 %v941_v6  ;;  %172 = vmatprep.subr.bf16.mxu1 %v941_v6  ;;  %v27_v11 = vld [vmem:[#allocation2] sm:$0xff] }
   0x9   :  { %133 = vrot.lane.b32.xlu0 %v28_v8, %s893_s23  ;;  %v31_v12 = vpack.c.bf16 %v27_v11, %v27_v11 }
   0xb   :  { %89 = vmatpush1.bf16.msra.mxu0 %v948_v7  ;;  %173 = vmatpush1.bf16.msra.mxu1 %v948_v7 }
   0xc   :  { %90 = vmatprep.subr.bf16.mxu0 %v955_v9  ;;  %174 = vmatprep.subr.bf16.mxu1 %v955_v9 }
   0xf   :  { %91 = vmatpush1.bf16.msra.mxu0 %v963_v10  ;;  %175 = vmatpush1.bf16.msra.mxu1 %v963_v10 }
  0x10   :  { %249 = vmatprep.subr.bf16.mxu0 %v912_v0  ;;  %330 = vmatprep.subr.bf16.mxu1 %v912_v0 }
  0x12   :  { %735 = vmatmul.mubr.msk.bf16.vlgmr.msra.gmra.mxu0 %vm16_vm0, %v31_v12 }
  0x13   :  { %250 = vmatpush1.bf16.msra.mxu0 %v921_v3  ;;  %273 = vmatprep.mubr.bf16.mxu0 %v891_v1 }
  0x14   :  { %251 = vmatprep.subr.bf16.mxu0 %v927_v4 }
  0x17   :  { %252 = vmatpush1.bf16.msra.mxu0 %v934_v5 }
  0x18   :  { %253 = vmatprep.subr.bf16.mxu0 %v941_v6 }
  0x1b   :  { %254 = vmatpush1.bf16.msra.mxu0 %v948_v7 }
  0x1c   :  { %255 = vmatprep.subr.bf16.mxu0 %v955_v9 }
  0x1f   :  { %256 = vmatpush1.bf16.msra.mxu0 %v963_v10 }
  0x20   :  { %411 = vmatprep.subr.bf16.mxu0 %v912_v0 }
  0x7b   :  { %v134_v29 = vpop.permute.xlu0 %133 }
  0xd2   :  { %v110_v14 = vpop.f32.mrf.mxu0 }
  0xd3   :  { %v117_v15 = vadd.f32 %v110_v14, %v29_v13 }
  0xd4   :  { %v112_v16 = vpop.f32.mrf.mxu0 }
  0xd5   :  { %v736_v17 = vmul.f32 -1.442695, %v117_v15  ;;  %v118_v21 = vadd.f32 %v112_v16, %v30_v20  ;;  %v745_v16 = vld [vmem:[%s1169_s0 + $0x28] sm:$0xff] }
  0xd6   :  { %v114_v18 = vpop.f32.mrf.mxu0 }
  0xd7   :  { %795 = vpow2.f32 %v736_v17  ;;  %v737_v27 = vmul.f32 -1.442695, %v118_v21 }
  0xd8   :  { %v115_v19 = vpop.f32.mrf.mxu0  ;;  %797 = vtanh.f32 %v118_v21 }
  0xe4   :  { %v796_v22 = vpop.eup %795 }
  0xe5   :  { %v122_v23 = vadd.f32 1.0, %v796_v22  ;;  %v798_v24 = vpop.eup %797 }
  0xe7   :  { %799 = vrcp.f32 %v122_v23 }
  0xe8   :  { %801 = vpow2.f32 %v737_v27 }
  0xf4   :  { %v800_v25 = vpop.eup %799 }
  0xf5   :  { %v137_v26 = vmul.f32 %v800_v25, %v798_v24  ;;  %v802_v28 = vpop.eup %801  ;;  %v136_v31 = vmul.f32 %v800_v25, %v134_v29 }
  0xf6   :  { %v129_v30 = vadd.f32 1.0, %v802_v28 }
  0xf7   :  { %139 = vrot.lane.b32.xlu0 %v137_v26, %s893_s23 }
  0xf8   :  { %803 = vrcp.f32 %v129_v30 }
 0x105   :  { %v804_v34 = vpop.eup %803 }
 0x169   :  { %v140_v32 = vpop.permute.xlu0 %139 }
 0x16a   :  { %v142_v33 = vadd.f32 %v140_v32, %v136_v31 }
 0x16c   :  { %805 = vtanh.f32 %v142_v33 }
 0x179   :  { %v806_v35 = vpop.eup %805 }
 0x17a   :  { %v989_v36 = vmul.f32 %v806_v35, %v804_v34  ;;  %v750_v34 = vld [vmem:[%s1169_s0 + $0x30] sm:$0xff] }
 0x17c   :  { %v153_v37 = vpack.c.bf16 %v989_v36, %v989_v36 }
 0x17e   :  { %155 = vrot.lane.b32.xlu1 %v153_v37, %s893_s23 }
 0x1f0   :  { %v156_v38 = vpop.permute.xlu1 %155 }
 0x1f1   :  { %740 = vmatmul.mubr.msk.bf16.vlgmr.msra.gmra.mxu1 %vm16_vm0, %v156_v38 }
 0x1f2   :  { %331 = vmatpush1.bf16.msra.mxu1 %v921_v3  ;;  %354 = vmatprep.mubr.bf16.mxu1 %v891_v1 }
 0x1f3   :  { %332 = vmatprep.subr.bf16.mxu1 %v927_v4 }
 0x1f6   :  { %333 = vmatpush1.bf16.msra.mxu1 %v934_v5 }
 0x1f7   :  { %334 = vmatprep.subr.bf16.mxu1 %v941_v6 }
 0x1fa   :  { %335 = vmatpush1.bf16.msra.mxu1 %v948_v7 }
 0x1fb   :  { %336 = vmatprep.subr.bf16.mxu1 %v955_v9 }
 0x1fe   :  { %337 = vmatpush1.bf16.msra.mxu1 %v963_v10 }
 0x1ff   :  { %492 = vmatprep.subr.bf16.mxu1 %v912_v0 }
 0x2b1   :  { %v194_v40 = vpop.f32.mrf.mxu1 }
 0x2b2   :  { %v201_v41 = vadd.f32 %v738_v39, %v194_v40 }
 0x2b3   :  { %v196_v42 = vpop.f32.mrf.mxu1 }
 0x2b4   :  { %v741_v43 = vmul.f32 -1.442695, %v201_v41  ;;  %v202_v47 = vadd.f32 %v739_v46, %v196_v42  ;;  %v751_v42 = vld [vmem:[%s1169_s0 + $0x38] sm:$0xff] }
 0x2b5   :  { %v198_v44 = vpop.f32.mrf.mxu1 }
 0x2b6   :  { %807 = vpow2.f32 %v741_v43  ;;  %v742_v53 = vmul.f32 -1.442695, %v202_v47 }
 0x2b7   :  { %v199_v45 = vpop.f32.mrf.mxu1  ;;  %809 = vtanh.f32 %v202_v47 }
 0x2c3   :  { %v808_v48 = vpop.eup %807 }
 0x2c4   :  { %v206_v49 = vadd.f32 1.0, %v808_v48  ;;  %v810_v50 = vpop.eup %809 }
 0x2c6   :  { %811 = vrcp.f32 %v206_v49 }
 0x2c7   :  { %813 = vpow2.f32 %v742_v53 }
 0x2d3   :  { %v812_v51 = vpop.eup %811 }
 0x2d4   :  { %v217_v52 = vmul.f32 %v812_v51, %v810_v50  ;;  %v814_v54 = vpop.eup %813  ;;  %v216_v56 = vmul.f32 %v812_v51, %v142_v33 }
 0x2d5   :  { %v213_v55 = vadd.f32 1.0, %v814_v54 }
 0x2d6   :  { %219 = vrot.lane.b32.xlu1 %v217_v52, %s893_s23 }
 0x2d7   :  { %815 = vrcp.f32 %v213_v55 }
 0x2e4   :  { %v816_v59 = vpop.eup %815 }
 0x348   :  { %v220_v57 = vpop.permute.xlu1 %219 }
 0x349   :  { %v222_v58 = vadd.f32 %v220_v57, %v216_v56 }
 0x34b   :  { %817 = vtanh.f32 %v222_v58 }
 0x358   :  { %v818_v60 = vpop.eup %817 }
 0x359   :  { %v1011_v61 = vmul.f32 %v818_v60, %v816_v59  ;;  %v756_v59 = vld [vmem:[%s1169_s0 + $0x40] sm:$0xff] }
 0x35b   :  { %v234_v62 = vpack.c.bf16 %v1011_v61, %v1011_v61 }
 0x35d   :  { %236 = vrot.lane.b32.xlu0 %v234_v62, %s893_s23 }
 0x3cf   :  { %v237_v63 = vpop.permute.xlu0 %236 }
 0x3d0   :  { %746 = vmatmul.mubr.msk.bf16.vlgmr.msra.gmra.mxu0 %vm16_vm0, %v237_v63 }
 0x3d1   :  { %412 = vmatpush1.bf16.msra.mxu0 %v921_v3  ;;  %435 = vmatprep.mubr.bf16.mxu0 %v891_v1 }
 0x3d2   :  { %413 = vmatprep.subr.bf16.mxu0 %v927_v4 }
 0x3d5   :  { %414 = vmatpush1.bf16.msra.mxu0 %v934_v5 }
 0x3d6   :  { %415 = vmatprep.subr.bf16.mxu0 %v941_v6 }
 0x3d9   :  { %416 = vmatpush1.bf16.msra.mxu0 %v948_v7 }
 0x3da   :  { %417 = vmatprep.subr.bf16.mxu0 %v955_v9 }
 0x3dd   :  { %418 = vmatpush1.bf16.msra.mxu0 %v963_v10 }
 0x3de   :  { %573 = vmatprep.subr.bf16.mxu0 %v912_v0 }
 0x490   :  { %v275_v8 = vpop.f32.mrf.mxu0 }
 0x491   :  { %v282_v11 = vadd.f32 %v744_v2, %v275_v8 }
 0x492   :  { %v277_v12 = vpop.f32.mrf.mxu0 }
 0x493   :  { %v747_v13 = vmul.f32 -1.442695, %v282_v11  ;;  %v283_v17 = vadd.f32 %v745_v16, %v277_v12  ;;  %v757_v12 = vld [vmem:[%s1169_s0 + $0x48] sm:$0xff] }
 0x494   :  { %v279_v14 = vpop.f32.mrf.mxu0 }
 0x495   :  { %819 = vpow2.f32 %v747_v13  ;;  %v748_v23 = vmul.f32 -1.442695, %v283_v17 }
 0x496   :  { %v280_v15 = vpop.f32.mrf.mxu0  ;;  %821 = vtanh.f32 %v283_v17 }
 0x4a2   :  { %v820_v18 = vpop.eup %819 }
 0x4a3   :  { %v287_v19 = vadd.f32 1.0, %v820_v18  ;;  %v822_v20 = vpop.eup %821 }
 0x4a5   :  { %823 = vrcp.f32 %v287_v19 }
 0x4a6   :  { %825 = vpow2.f32 %v748_v23 }
 0x4b2   :  { %v824_v21 = vpop.eup %823 }
 0x4b3   :  { %v298_v22 = vmul.f32 %v824_v21, %v822_v20  ;;  %v826_v24 = vpop.eup %825  ;;  %v297_v26 = vmul.f32 %v824_v21, %v222_v58 }
 0x4b4   :  { %v294_v25 = vadd.f32 1.0, %v826_v24 }
 0x4b5   :  { %300 = vrot.lane.b32.xlu1 %v298_v22, %s893_s23 }
 0x4b6   :  { %827 = vrcp.f32 %v294_v25 }
 0x4c3   :  { %v828_v29 = vpop.eup %827 }
 0x527   :  { %v301_v27 = vpop.permute.xlu1 %300 }
 0x528   :  { %v303_v28 = vadd.f32 %v301_v27, %v297_v26 }
 0x52a   :  { %829 = vtanh.f32 %v303_v28 }
 0x537   :  { %v830_v30 = vpop.eup %829 }
 0x538   :  { %v1033_v31 = vmul.f32 %v830_v30, %v828_v29  ;;  %v762_v30 = vld [vmem:[%s1169_s0 + $0x50] sm:$0xff] }
 0x53a   :  { %v315_v32 = vpack.c.bf16 %v1033_v31, %v1033_v31 }
 0x53c   :  { %317 = vrot.lane.b32.xlu0 %v315_v32, %s893_s23 }
 0x5ae   :  { %v318_v33 = vpop.permute.xlu0 %317 }
 0x5af   :  { %752 = vmatmul.mubr.msk.bf16.vlgmr.msra.gmra.mxu1 %vm16_vm0, %v318_v33 }
 0x5b0   :  { %493 = vmatpush1.bf16.msra.mxu1 %v921_v3  ;;  %516 = vmatprep.mubr.bf16.mxu1 %v891_v1 }
 0x5b1   :  { %494 = vmatprep.subr.bf16.mxu1 %v927_v4 }
 0x5b4   :  { %495 = vmatpush1.bf16.msra.mxu1 %v934_v5 }
 0x5b5   :  { %496 = vmatprep.subr.bf16.mxu1 %v941_v6 }
 0x5b8   :  { %497 = vmatpush1.bf16.msra.mxu1 %v948_v7 }
 0x5b9   :  { %498 = vmatprep.subr.bf16.mxu1 %v955_v9 }
 0x5bc   :  { %499 = vmatpush1.bf16.msra.mxu1 %v963_v10 }
 0x5bd   :  { %654 = vmatprep.subr.bf16.mxu1 %v912_v0 }
 0x66f   :  { %v356_v35 = vpop.f32.mrf.mxu1 }
 0x670   :  { %v363_v37 = vadd.f32 %v750_v34, %v356_v35 }
 0x671   :  { %v358_v38 = vpop.f32.mrf.mxu1 }
 0x672   :  { %v753_v39 = vmul.f32 -1.442695, %v363_v37  ;;  %v364_v43 = vadd.f32 %v751_v42, %v358_v38 }
 0x673   :  { %v360_v40 = vpop.f32.mrf.mxu1 }
 0x674   :  { %831 = vpow2.f32 %v753_v39  ;;  %v754_v48 = vmul.f32 -1.442695, %v364_v43 }
 0x675   :  { %v361_v41 = vpop.f32.mrf.mxu1  ;;  %833 = vtanh.f32 %v364_v43 }
 0x681   :  { %v832_v44 = vpop.eup %831 }
 0x682   :  { %v368_v45 = vadd.f32 1.0, %v832_v44  ;;  %v834_v0 = vpop.eup %833 }
 0x684   :  { %835 = vrcp.f32 %v368_v45 }
 0x685   :  { %837 = vpow2.f32 %v754_v48  ;;  %v768_v48 = vld [vmem:[%s1169_s0 + $0x60] sm:$0xff] }
 0x691   :  { %v836_v46 = vpop.eup %835 }
 0x692   :  { %v379_v47 = vmul.f32 %v836_v46, %v834_v0  ;;  %v838_v49 = vpop.eup %837  ;;  %v378_v51 = vmul.f32 %v836_v46, %v303_v28 }
 0x693   :  { %v375_v50 = vadd.f32 1.0, %v838_v49 }
 0x694   :  { %381 = vrot.lane.b32.xlu1 %v379_v47, %s893_s23 }
 0x695   :  { %839 = vrcp.f32 %v375_v50 }
 0x6a2   :  { %v840_v54 = vpop.eup %839 }
 0x706   :  { %v382_v52 = vpop.permute.xlu1 %381 }
 0x707   :  { %v384_v53 = vadd.f32 %v382_v52, %v378_v51 }
 0x709   :  { %841 = vtanh.f32 %v384_v53 }
 0x716   :  { %v842_v55 = vpop.eup %841 }
 0x717   :  { %v1055_v56 = vmul.f32 %v842_v55, %v840_v54  ;;  %v769_v55 = vld [vmem:[%s1169_s0 + $0x68] sm:$0xff] }
 0x719   :  { %v396_v57 = vpack.c.bf16 %v1055_v56, %v1055_v56 }
 0x71b   :  { %398 = vrot.lane.b32.xlu0 %v396_v57, %s893_s23 }
 0x78d   :  { %v399_v58 = vpop.permute.xlu0 %398 }
 0x78e   :  { %758 = vmatmul.mubr.msk.bf16.vlgmr.msra.gmra.mxu0 %vm16_vm0, %v399_v58 }
 0x78f   :  { %574 = vmatpush1.bf16.msra.mxu0 %v921_v3  ;;  %597 = vmatprep.mubr.bf16.mxu0 %v891_v1 }
 0x790   :  { %575 = vmatprep.subr.bf16.mxu0 %v927_v4 }
 0x793   :  { %576 = vmatpush1.bf16.msra.mxu0 %v934_v5 }
 0x794   :  { %577 = vmatprep.subr.bf16.mxu0 %v941_v6 }
 0x797   :  { %578 = vmatpush1.bf16.msra.mxu0 %v948_v7 }
 0x798   :  { %579 = vmatprep.subr.bf16.mxu0 %v955_v9 }
 0x79b   :  { %580 = vmatpush1.bf16.msra.mxu0 %v963_v10 }
 0x84e   :  { %v437_v60 = vpop.f32.mrf.mxu0 }
 0x84f   :  { %v444_v62 = vadd.f32 %v756_v59, %v437_v60 }
 0x850   :  { %v439_v63 = vpop.f32.mrf.mxu0 }
 0x851   :  { %v759_v2 = vmul.f32 -1.442695, %v444_v62  ;;  %v445_v13 = vadd.f32 %v757_v12, %v439_v63 }
 0x852   :  { %v441_v8 = vpop.f32.mrf.mxu0 }
 0x853   :  { %843 = vpow2.f32 %v759_v2  ;;  %v760_v19 = vmul.f32 -1.442695, %v445_v13 }
 0x854   :  { %v442_v11 = vpop.f32.mrf.mxu0  ;;  %845 = vtanh.f32 %v445_v13 }
 0x860   :  { %v844_v14 = vpop.eup %843 }
 0x861   :  { %v449_v15 = vadd.f32 1.0, %v844_v14  ;;  %v846_v16 = vpop.eup %845 }
 0x863   :  { %847 = vrcp.f32 %v449_v15 }
 0x864   :  { %849 = vpow2.f32 %v760_v19 }
 0x870   :  { %v848_v17 = vpop.eup %847 }
 0x871   :  { %v460_v18 = vmul.f32 %v848_v17, %v846_v16  ;;  %v850_v20 = vpop.eup %849  ;;  %v459_v22 = vmul.f32 %v848_v17, %v384_v53 }
 0x872   :  { %v456_v21 = vadd.f32 1.0, %v850_v20 }
 0x873   :  { %462 = vrot.lane.b32.xlu1 %v460_v18, %s893_s23 }
 0x874   :  { %851 = vrcp.f32 %v456_v21 }
 0x881   :  { %v852_v25 = vpop.eup %851 }
 0x8e5   :  { %v463_v23 = vpop.permute.xlu1 %462 }
 0x8e6   :  { %v465_v24 = vadd.f32 %v463_v23, %v459_v22  ;;  %v774_v22 = vld [vmem:[%s1169_s0 + $0x70] sm:$0xff] }
 0x8e8   :  { %853 = vtanh.f32 %v465_v24 }
 0x8f5   :  { %v854_v26 = vpop.eup %853 }
 0x8f6   :  { %v1076_v27 = vmul.f32 %v854_v26, %v852_v25 }
 0x8f8   :  { %v477_v28 = vpack.c.bf16 %v1076_v27, %v1076_v27 }
 0x8fa   :  { %479 = vrot.lane.b32.xlu0 %v477_v28, %s893_s23 }
 0x96c   :  { %v480_v29 = vpop.permute.xlu0 %479 }
 0x96d   :  { %764 = vmatmul.mubr.msk.bf16.vlgmr.msra.gmra.mxu1 %vm16_vm0, %v480_v29  ;;  %v775_v29 = vld [vmem:[%s1169_s0 + $0x78] sm:$0xff] }
 0x96e   :  { %655 = vmatpush1.bf16.msra.mxu1 %v921_v3  ;;  %678 = vmatprep.mubr.bf16.mxu1 %v891_v1 }
 0x96f   :  { %656 = vmatprep.subr.bf16.mxu1 %v927_v4 }
 0x972   :  { %657 = vmatpush1.bf16.msra.mxu1 %v934_v5  ;;  %v763_v5 = vld [vmem:[%s1169_s0 + $0x58] sm:$0xff] }
 0x973   :  { %658 = vmatprep.subr.bf16.mxu1 %v941_v6 }
 0x976   :  { %659 = vmatpush1.bf16.msra.mxu1 %v948_v7 }
 0x977   :  { %660 = vmatprep.subr.bf16.mxu1 %v955_v9 }
 0x97a   :  { %661 = vmatpush1.bf16.msra.mxu1 %v963_v10 }
 0xa2d   :  { %v518_v32 = vpop.f32.mrf.mxu1 }
 0xa2e   :  { %v525_v3 = vadd.f32 %v762_v30, %v518_v32 }
 0xa2f   :  { %v520_v33 = vpop.f32.mrf.mxu1 }
 0xa30   :  { %v765_v1 = vmul.f32 -1.442695, %v525_v3  ;;  %v526_v6 = vadd.f32 %v763_v5, %v520_v33 }
 0xa31   :  { %v522_v34 = vpop.f32.mrf.mxu1 }
 0xa32   :  { %855 = vpow2.f32 %v765_v1  ;;  %v766_v38 = vmul.f32 -1.442695, %v526_v6 }
 0xa33   :  { %v523_v4 = vpop.f32.mrf.mxu1  ;;  %857 = vtanh.f32 %v526_v6 }
 0xa3f   :  { %v856_v7 = vpop.eup %855 }
 0xa40   :  { %v530_v9 = vadd.f32 1.0, %v856_v7  ;;  %v858_v10 = vpop.eup %857 }
 0xa42   :  { %859 = vrcp.f32 %v530_v9 }
 0xa43   :  { %861 = vpow2.f32 %v766_v38 }
 0xa4f   :  { %v860_v35 = vpop.eup %859 }
 0xa50   :  { %v541_v37 = vmul.f32 %v860_v35, %v858_v10  ;;  %v862_v39 = vpop.eup %861  ;;  %v540_v41 = vmul.f32 %v860_v35, %v465_v24 }
 0xa51   :  { %v537_v40 = vadd.f32 1.0, %v862_v39 }
 0xa52   :  { %543 = vrot.lane.b32.xlu1 %v541_v37, %s893_s23 }
 0xa53   :  { %863 = vrcp.f32 %v537_v40 }
 0xa60   :  { %v864_v44 = vpop.eup %863 }
 0xac4   :  { %v544_v42 = vpop.permute.xlu1 %543 }
 0xac5   :  { %v546_v43 = vadd.f32 %v544_v42, %v540_v41 }
 0xac7   :  { %865 = vtanh.f32 %v546_v43 }
 0xad4   :  { %v866_v45 = vpop.eup %865 }
 0xad5   :  { %v1097_v0 = vmul.f32 %v866_v45, %v864_v44 }
 0xad7   :  { %v558_v46 = vpack.c.bf16 %v1097_v0, %v1097_v0 }
 0xad9   :  { %560 = vrot.lane.b32.xlu0 %v558_v46, %s893_s23 }
 0xb4b   :  { %v561_v47 = vpop.permute.xlu0 %560 }
 0xb4c   :  { %770 = vmatmul.mubr.msk.bf16.vlgmr.msra.gmra.mxu0 %vm16_vm0, %v561_v47 }
 0xc0c   :  { %v599_v49 = vpop.f32.mrf.mxu0 }
 0xc0d   :  { %v606_v50 = vadd.f32 %v768_v48, %v599_v49 }
 0xc0e   :  { %v601_v51 = vpop.f32.mrf.mxu0 }
 0xc0f   :  { %v771_v52 = vmul.f32 -1.442695, %v606_v50  ;;  %v607_v57 = vadd.f32 %v769_v55, %v601_v51 }
 0xc10   :  { %v603_v53 = vpop.f32.mrf.mxu0 }
 0xc11   :  { %867 = vpow2.f32 %v771_v52  ;;  %v772_v2 = vmul.f32 -1.442695, %v607_v57 }
 0xc12   :  { %v604_v54 = vpop.f32.mrf.mxu0  ;;  %869 = vtanh.f32 %v607_v57 }
 0xc1e   :  { %v868_v58 = vpop.eup %867 }
 0xc1f   :  { %v611_v59 = vadd.f32 1.0, %v868_v58  ;;  %v870_v60 = vpop.eup %869 }
 0xc21   :  { %871 = vrcp.f32 %v611_v59 }
 0xc22   :  { %873 = vpow2.f32 %v772_v2 }
 0xc2e   :  { %v872_v62 = vpop.eup %871 }
 0xc2f   :  { %v622_v63 = vmul.f32 %v872_v62, %v870_v60  ;;  %v874_v8 = vpop.eup %873  ;;  %v621_v12 = vmul.f32 %v872_v62, %v546_v43 }
 0xc30   :  { %v618_v11 = vadd.f32 1.0, %v874_v8 }
 0xc31   :  { %624 = vrot.lane.b32.xlu1 %v622_v63, %s893_s23 }
 0xc32   :  { %875 = vrcp.f32 %v618_v11 }
 0xc3f   :  { %v876_v15 = vpop.eup %875 }
 0xca3   :  { %v625_v13 = vpop.permute.xlu1 %624 }
 0xca4   :  { %v627_v14 = vadd.f32 %v625_v13, %v621_v12 }
 0xca6   :  { %877 = vtanh.f32 %v627_v14 }
 0xcb3   :  { %v878_v16 = vpop.eup %877 }
 0xcb4   :  { %v629_v17 = vmul.f32 %v878_v16, %v876_v15 }
 0xcb6   :  { %v639_v18 = vpack.c.bf16 %v629_v17, %v629_v17 }
 0xcb8   :  { %641 = vrot.lane.b32.xlu0 %v639_v18, %s893_s23 }
 0xcbc   :  { %146 = vrot.lane.b32.xlu0 %v989_v36, %s893_s23 }
 0xcc0   :  { %307 = vrot.lane.b32.xlu0 %v1033_v31, %s893_s23 }
 0xcc4   :  { %469 = vrot.lane.b32.xlu0 %v1076_v27, %s893_s23 }
 0xcc8   :  { %631 = vrot.lane.b32.xlu0 %v629_v17, %s893_s23 }
 0xd2a   :  { %v642_v19 = vpop.permute.xlu0 %641 }
 0xd2b   :  { %776 = vmatmul.mubr.msk.bf16.vlgmr.msra.gmra.mxu1 %vm16_vm0, %v642_v19 }
 0xd2e   :  { %v147_v20 = vpop.permute.xlu0 %146 }
 0xd2f   :  { %149 = vst.msk [vmem:[%s1170_s2] sm:$0xff] %vm16_vm0, %v147_v20 }
 0xd32   :  { %v308_v21 = vpop.permute.xlu0 %307 }
 0xd33   :  { %749 = vst.msk [vmem:[%s1170_s2 + $0x10] sm:$0xff] %vm16_vm0, %v308_v21 }
 0xd36   :  { %v470_v36 = vpop.permute.xlu0 %469 }
 0xd37   :  { %761 = vst.msk [vmem:[%s1170_s2 + $0x20] sm:$0xff] %vm16_vm0, %v470_v36 }
 0xd3a   :  { %v632_v31 = vpop.permute.xlu0 %631 }
 0xd3b   :  { %773 = vst.msk [vmem:[%s1170_s2 + $0x30] sm:$0xff] %vm16_vm0, %v632_v31 }
 0xdeb   :  { %v680_v23 = vpop.f32.mrf.mxu1 }
 0xdec   :  { %v687_v24 = vadd.f32 %v774_v22, %v680_v23 }
 0xded   :  { %v682_v25 = vpop.f32.mrf.mxu1 }
 0xdee   :  { %v777_v26 = vmul.f32 -1.442695, %v687_v24  ;;  %v688_v30 = vadd.f32 %v775_v29, %v682_v25 }
 0xdef   :  { %v684_v27 = vpop.f32.mrf.mxu1 }
 0xdf0   :  { %879 = vpow2.f32 %v777_v26  ;;  %v778_v4 = vmul.f32 -1.442695, %v688_v30 }
 0xdf1   :  { %v685_v28 = vpop.f32.mrf.mxu1  ;;  %881 = vtanh.f32 %v688_v30 }
 0xdfd   :  { %v880_v32 = vpop.eup %879 }
 0xdfe   :  { %v692_v3 = vadd.f32 1.0, %v880_v32  ;;  %v882_v33 = vpop.eup %881 }
 0xe00   :  { %883 = vrcp.f32 %v692_v3 }
 0xe01   :  { %885 = vpow2.f32 %v778_v4 }
 0xe0d   :  { %v884_v1 = vpop.eup %883 }
 0xe0e   :  { %v703_v34 = vmul.f32 %v884_v1, %v882_v33  ;;  %v886_v5 = vpop.eup %885  ;;  %v702_v7 = vmul.f32 %v884_v1, %v627_v14 }
 0xe0f   :  { %v699_v6 = vadd.f32 1.0, %v886_v5 }
 0xe10   :  { %705 = vrot.lane.b32.xlu1 %v703_v34, %s893_s23 }
 0xe11   :  { %887 = vrcp.f32 %v699_v6 }
 0xe14   :  { %226 = vrot.lane.b32.xlu1 %v1011_v61, %s893_s23 }
 0xe18   :  { %388 = vrot.lane.b32.xlu1 %v1055_v56, %s893_s23 }
 0xe1c   :  { %550 = vrot.lane.b32.xlu1 %v1097_v0, %s893_s23 }
 0xe1e   :  { %v888_v37 = vpop.eup %887 }
 0xe82   :  { %v706_v9 = vpop.permute.xlu1 %705 }
 0xe83   :  { %v708_v10 = vadd.f32 %v706_v9, %v702_v7 }
 0xe85   :  { %889 = vtanh.f32 %v708_v10  ;;  %719 = vrot.lane.b32.xlu0 %v708_v10, %s893_s23 }
 0xe86   :  { %v227_v35 = vpop.permute.xlu1 %226 }
 0xe87   :  { %743 = vst.msk [vmem:[%s1170_s2 + $0x8] sm:$0xff] %vm16_vm0, %v227_v35 }
 0xe8a   :  { %v389_v61 = vpop.permute.xlu1 %388 }
 0xe8b   :  { %755 = vst.msk [vmem:[%s1170_s2 + $0x18] sm:$0xff] %vm16_vm0, %v389_v61 }
 0xe8e   :  { %v551_v56 = vpop.permute.xlu1 %550 }
 0xe8f   :  { %767 = vst.msk [vmem:[%s1170_s2 + $0x28] sm:$0xff] %vm16_vm0, %v551_v56 }
 0xe92   :  { %v890_v38 = vpop.eup %889 }
 0xe93   :  { %v710_v39 = vmul.f32 %v890_v38, %v888_v37 }
 0xe95   :  { %712 = vrot.lane.b32.xlu1 %v710_v39, %s893_s23 }
 0xef7   :  { %v720_v40 = vpop.permute.xlu0 %719 }
 0xef8   :  { %722 = vst.msk [vmem:[#allocation3] sm:$0xff] %vm16_vm0, %v720_v40 }
 0xf07   :  { %v713_v41 = vpop.permute.xlu1 %712 }
 0xf08   :  { %779 = vst.msk [vmem:[%s1170_s2 + $0x38] sm:$0xff] %vm16_vm0, %v713_v41  ;;  %717 = vst.msk [vmem:[#allocation2] sm:$0xff] %vm16_vm0, %v713_v41 }

// kernel: stgcn_forward.39
= control target key start
LH: loop header
LB: loop body
LE: loop exit
PB: predicated region body
PF: predicated region fallthrough
CT: control target
= control target key end

     0   :  { %vm366_vm0 = vcmask 23552   ;;  %s615_s1 = inlined_call_operand.vmem [shape: bf16[512,3], index: 1, kind: input, shape index: {}]   ;;  %s616_s0 = inlined_call_operand.vmem [shape: f32[8,512], index: 0, kind: input, shape index: {}]   ;;  %s617_s2 = inlined_call_operand.vmem [shape: f32[1,3], index: 2, kind: input, shape index: {}]   ;;  %s618_s3 = inlined_call_operand.vmem [shape: f32[8,3], index: 3, kind: output, shape index: {}]  }
   0x1   :  { %v449_v0 = vld [vmem:[%s615_s1 + $0x78] sm:$0xff]   ;;  %v453_v4 = vld [vmem:[%s615_s1 + $0x70] sm:$0xff]   ;;  %v457_v8 = vld [vmem:[%s615_s1 + $0x68] sm:$0xff]  }
   0x2   :  { %v450_v1 = vld [vmem:[%s615_s1 + $0xf8] sm:$0xff]   ;;  %405 = vmatprep.subr.bf16.mxu0 %v449_v0  ;;  %v454_v5 = vld [vmem:[%s615_s1 + $0xf0] sm:$0xff]   ;;  %v458_v9 = vld [vmem:[%s615_s1 + $0xe8] sm:$0xff]  }
   0x3   :  { %v451_v2 = vld [vmem:[%s615_s1 + $0x38] sm:$0xff]   ;;  %427 = vmatprep.subr.bf16.mxu1 %v450_v1  ;;  %v455_v6 = vld [vmem:[%s615_s1 + $0x30] sm:$0xff]   ;;  %v459_v10 = vld [vmem:[%s615_s1 + $0x28] sm:$0xff]  }
   0x4   :  { %v452_v3 = vld [vmem:[%s615_s1 + $0xb8] sm:$0xff]   ;;  %406 = vmatpush3.bf16.msra.mxu0 %v451_v2  ;;  %v456_v7 = vld [vmem:[%s615_s1 + $0xb0] sm:$0xff]   ;;  %v460_v11 = vld [vmem:[%s615_s1 + $0xa8] sm:$0xff]  }
   0x5   :  { %428 = vmatpush3.bf16.msra.mxu1 %v452_v3  ;;  %407 = vmatprep.subr.bf16.mxu0 %v453_v4  ;;  %v461_v12 = vld [vmem:[%s615_s1 + $0x60] sm:$0xff]   ;;  %v465_v16 = vld [vmem:[%s615_s1 + $0x58] sm:$0xff]   ;;  %v469_v20 = vld [vmem:[%s615_s1 + $0x50] sm:$0xff]  }
   0x6   :  { %429 = vmatprep.subr.bf16.mxu1 %v454_v5  ;;  %v462_v13 = vld [vmem:[%s615_s1 + $0xe0] sm:$0xff]   ;;  %v466_v17 = vld [vmem:[%s615_s1 + $0xd8] sm:$0xff]   ;;  %v470_v21 = vld [vmem:[%s615_s1 + $0xd0] sm:$0xff]  }
   0x7   :  { %v463_v14 = vld [vmem:[%s615_s1 + $0x20] sm:$0xff]   ;;  %v467_v18 = vld [vmem:[%s615_s1 + $0x18] sm:$0xff]   ;;  %v471_v22 = vld [vmem:[%s615_s1 + $0x10] sm:$0xff]  }
   0x8   :  { %408 = vmatpush3.bf16.msra.mxu0 %v455_v6  ;;  %v464_v15 = vld [vmem:[%s615_s1 + $0xa0] sm:$0xff]   ;;  %v468_v19 = vld [vmem:[%s615_s1 + $0x98] sm:$0xff]   ;;  %v472_v23 = vld [vmem:[%s615_s1 + $0x90] sm:$0xff]  }
   0x9   :  { %430 = vmatpush3.bf16.msra.mxu1 %v456_v7  ;;  %409 = vmatprep.subr.bf16.mxu0 %v457_v8  ;;  %v473_v24 = vld [vmem:[%s615_s1 + $0x48] sm:$0xff]   ;;  %v477_v28 = vld [vmem:[%s615_s1 + $0x40] sm:$0xff]   ;;  %v18_v33 = vld [vmem:[%s616_s0 + $0x18] sm:$0xff] }
   0xa   :  { %431 = vmatprep.subr.bf16.mxu1 %v458_v9  ;;  %v474_v25 = vld [vmem:[%s615_s1 + $0xc8] sm:$0xff]   ;;  %v478_v29 = vld [vmem:[%s615_s1 + $0xc0] sm:$0xff]   ;;  %v22_v36 = vpack.c.bf16 %v18_v33, %v18_v33  ;;  %v17_v38 = vld [vmem:[%s616_s0 + $0x10] sm:$0xff] }
   0xb   :  { %v475_v26 = vld [vmem:[%s615_s1 + $0x8] sm:$0xff]   ;;  %v479_v30 = vld [vmem:[%s615_s1] sm:$0xff]   ;;  %v21_v39 = vpack.c.bf16 %v17_v38, %v17_v38 }
   0xc   :  { %410 = vmatpush3.bf16.msra.mxu0 %v459_v10  ;;  %v476_v27 = vld [vmem:[%s615_s1 + $0x88] sm:$0xff]   ;;  %v480_v31 = vld [vmem:[%s615_s1 + $0x80] sm:$0xff]   ;;  %358 = vmatprep.mubr.bf16.mxu1 %v22_v36 }
   0xd   :  { %432 = vmatpush3.bf16.msra.mxu1 %v460_v11  ;;  %411 = vmatprep.subr.bf16.mxu0 %v461_v12  ;;  %v16_v32 = vld [vmem:[%s616_s0 + $0x8] sm:$0xff]  ;;  %v15_v34 = vld [vmem:[%s616_s0] sm:$0xff] }
   0xe   :  { %433 = vmatprep.subr.bf16.mxu1 %v462_v13  ;;  %v20_v35 = vpack.c.bf16 %v16_v32, %v16_v32  ;;  %v19_v37 = vpack.c.bf16 %v15_v34, %v15_v34  ;;  %v372_v42 = vld [vmem:[%s617_s2] ss:$0 sm:$0xff] }
  0x10   :  { %412 = vmatpush3.bf16.msra.mxu0 %v463_v14  ;;  %318 = vmatprep.mubr.bf16.mxu0 %v20_v35 }
  0x11   :  { %434 = vmatpush3.bf16.msra.mxu1 %v464_v15  ;;  %413 = vmatprep.subr.bf16.mxu0 %v465_v16 }
  0x12   :  { %435 = vmatprep.subr.bf16.mxu1 %v466_v17 }
  0x14   :  { %414 = vmatpush3.bf16.msra.mxu0 %v467_v18 }
  0x15   :  { %436 = vmatpush3.bf16.msra.mxu1 %v468_v19  ;;  %415 = vmatprep.subr.bf16.mxu0 %v469_v20 }
  0x16   :  { %437 = vmatprep.subr.bf16.mxu1 %v470_v21 }
  0x18   :  { %416 = vmatpush3.bf16.msra.mxu0 %v471_v22 }
  0x19   :  { %438 = vmatpush3.bf16.msra.mxu1 %v472_v23  ;;  %417 = vmatprep.subr.bf16.mxu0 %v473_v24 }
  0x1a   :  { %439 = vmatprep.subr.bf16.mxu1 %v474_v25 }
  0x1c   :  { %418 = vmatpush3.bf16.msra.mxu0 %v475_v26 }
  0x1d   :  { %440 = vmatpush3.bf16.msra.mxu1 %v476_v27  ;;  %419 = vmatprep.subr.bf16.mxu0 %v477_v28 }
  0x1e   :  { %441 = vmatprep.subr.bf16.mxu1 %v478_v29 }
  0x20   :  { %420 = vmatpush3.bf16.msra.mxu0 %v479_v30 }
  0x21   :  { %442 = vmatpush3.bf16.msra.mxu1 %v480_v31 }
  0x23   :  { %319 = vmatmul.mubr.bf16.vlgmr.msra.gmra.mxu0 %v19_v37 }
  0x24   :  { %359 = vmatmul.mubr.bf16.vlgmr.msra.gmra.mxu1 %v21_v39 }
  0xe3   :  { %v421_v40 = vpop.f32.mrf.mxu0 }
  0xe4   :  { %v443_v41 = vpop.f32.mrf.mxu1 }
  0xe5   :  { %v422_v43 = vpop.f32.mrf.mxu0 }
  0xe6   :  { %v444_v44 = vpop.f32.mrf.mxu1  ;;  %v423_v45 = vadd.f32 %v422_v43, %v421_v40 }
  0xe7   :  { %v424_v46 = vpop.f32.mrf.mxu0  ;;  %v445_v49 = vadd.f32 %v444_v44, %v443_v41 }
  0xe8   :  { %v446_v47 = vpop.f32.mrf.mxu1  ;;  %v321_v48 = vadd.f32 %v423_v45, %v372_v42 }
  0xe9   :  { %v425_v50 = vpop.f32.mrf.mxu0 }
  0xea   :  { %v447_v51 = vpop.f32.mrf.mxu1  ;;  %v361_v52 = vadd.f32 %v445_v49, %v321_v48 }
  0xec   :  { %367 = vst.msk [vmem:[%s618_s3] sm:$0xff] %vm366_vm0, %v361_v52 }

</bundles_post_ra>
